<compile_context>
chip_gen: v7x
topology: tpu7x:2x2x1
jax: 0.10.0
libtpu: 0.0.40
codegen_flags: <defaults>
</compile_context>

<pallas_src>
import functools

import jax
import jax.numpy as jnp
from jax import lax
from jax.experimental import pallas as pl
from jax.experimental.pallas import tpu as pltpu


# ----------------------------------------------------------------------------
# Fused Pallas kernel: seg conv + appear/attention + masked image conv + blend
# ----------------------------------------------------------------------------
def _bigt_fused_kernel(kern_ref, clsf_ref, clsb_ref, imf_ref, imb_ref,
                       pred_ref, disf_ref, disb_ref, attn_ref, attnc_ref,
                       wm_ref, z_ref,
                       *, n_class, ksize, m_range, height, width,
                       im_channel, batch_block):
    """One grid step = `batch_block` batch elements.

    kern_ref  : (n_class*K*K,) flattened conv weights (SMEM scalars)
    cls*_ref  : (Bt, H+2R, W+2R) int32 motion labels, border = n_class sentinel
    im*_ref   : (Bt, C, H, W) images
    pred_ref  : (Bt, C, H, W) blended prediction (also used to stage pred_f)
    dis*_ref  : (Bt, H, W)   1 - appear
    attn*_ref : (Bt, H, W)   attention / 1 - attention
    wm_ref    : (K*K, Bt, H, W) VMEM scratch, shared between both directions
    z_ref     : (Bt, C, H+2R, W+2R) VMEM scratch, shared between both directions
    """
    H, W, K, R = height, width, ksize, m_range
    NC, C, Bt = n_class, im_channel, batch_block
    f32 = jnp.float32

    # Hoist the tiny SMEM weight scalars once; reused by both directions.
    wvals = [kern_ref[i] for i in range(NC * K * K)]

    # Zero the padded-z scratch every grid step (cheap; keeps the R-wide
    # zero border valid no matter how the parallel batch axis is sharded
    # across TensorCores).  The interior is overwritten below.
    z_ref[...] = jnp.zeros_like(z_ref)

    def weighted_masks_and_seg(cls_ref):
        """Per-tap class-gathered weights (stored in wm_ref) and their sum.

        wm_t[b,y,x] = m_kernel[class_pad[b, y+ky, x+kx], ky, kx] (0 for the
        padding sentinel), so seg = sum over taps = zero-padded conv of the
        one-hot masks with m_kernel.
        """
        seg = jnp.zeros((Bt, H, W), f32)
        t = 0
        for ky in range(K):
            for kx in range(K):
                win = cls_ref[:, pl.ds(ky, H), pl.ds(kx, W)]     # (Bt,H,W) i32
                # Select chain: 2 VALU ops per class (vs 4 before).
                wm = jnp.zeros((Bt, H, W), f32)
                for c in range(NC):
                    wm = jnp.where(win == c, wvals[c * K * K + ky * K + kx], wm)
                wm_ref[t, :, :, :] = wm                          # reused below
                seg = seg + wm
                t += 1
        return seg

    def masked_image_conv(im_ref, appear):
        """Zero-padded conv of (im * appear * one_hot) reusing wm_ref taps."""
        # Store only the interior; the border of z_ref stays zero.
        z_ref[:, :, pl.ds(R, H), pl.ds(R, W)] = im_ref[...] * appear[:, None]
        acc = jnp.zeros((Bt, C, H, W), f32)
        t = 0
        for ky in range(K):
            for kx in range(K):
                zwin = z_ref[:, :, pl.ds(ky, H), pl.ds(kx, W)]   # (Bt,C,H,W)
                acc = acc + zwin * wm_ref[t][:, None]
                t += 1
        return acc

    # ---- forward direction -------------------------------------------------
    seg_f = weighted_masks_and_seg(clsf_ref)
    appear_f = jnp.maximum(1.0 - jnp.maximum(seg_f - 1.0, 0.0), 0.0)
    disf_ref[...] = 1.0 - appear_f
    segc_f = 1.0 - jnp.maximum(1.0 - seg_f, 0.0)
    # Stage the unscaled forward prediction in the output buffer.
    pred_ref[...] = masked_image_conv(imf_ref, appear_f)

    # ---- backward direction (reuses wm_ref / z_ref) -------------------------
    seg_b = weighted_masks_and_seg(clsb_ref)
    appear_b = jnp.maximum(1.0 - jnp.maximum(seg_b - 1.0, 0.0), 0.0)
    disb_ref[...] = 1.0 - appear_b
    segc_b = 1.0 - jnp.maximum(1.0 - seg_b, 0.0)
    pred_b = masked_image_conv(imb_ref, appear_b)

    # ---- attention + blend (accumulate into the output) ---------------------
    attn = (segc_f + 1e-5) / (segc_f + segc_b + 2e-5)
    attn_ref[...] = attn
    attnc = 1.0 - attn
    attnc_ref[...] = attnc
    pred_ref[...] = attn[:, None] * pred_ref[...] + attnc[:, None] * pred_b


# ----------------------------------------------------------------------------
# Wrapper
# ----------------------------------------------------------------------------
def _device_vmem_limit_bytes():
    """Derive a scoped-VMEM limit from the device, with a safe fallback."""
    try:
        info = pltpu.get_tpu_info()
        cap = int(getattr(info, "vmem_capacity_bytes", 0) or 0)
    except Exception:
        cap = 0
    if cap <= 0:
        cap = 64 * 1024 * 1024            # conservative (v7x-sized) fallback
    limit = (cap * 3) // 4                # leave headroom for the compiler
    return max(32 * 1024 * 1024, min(limit, 96 * 1024 * 1024))


def _choose_batch_block(B, C, H, W, Hp, Wp, K, vmem_limit):
    """Largest divisor of B whose per-step VMEM footprint fits the budget."""
    io = 4 * (2 * Hp * Wp                 # two padded int32 label planes
              + 2 * C * H * W             # two image blocks
              + C * H * W                 # pred output
              + 4 * H * W)                # dis_f, dis_b, attn, attn_c outputs
    scratch = 4 * (K * K * H * W          # shared per-tap weight scratch
                   + C * Hp * Wp)         # shared padded (im * appear) scratch
    temps = 4 * (3 * C * H * W            # conv accumulator / window temps
                 + 6 * H * W)             # seg / appear / segc / attn planes
    per_elem = 2 * io + scratch + temps   # in/out blocks are double-buffered
    budget = int(vmem_limit * 0.65)
    bt = max(1, min(B, budget // max(per_elem, 1)))
    if B >= 2:                            # keep >= 2 grid steps (v7x megacore)
        bt = min(bt, B // 2)
    bt = max(1, bt)
    while B % bt:
        bt -= 1
    return bt


def bigt_net_forward(im_input_f, im_input_b, gt_motion_f, gt_motion_b,
                     m_kernel, *, im_channel, n_class, m_range,
                     batch_block=None):
    f32 = jnp.float32
    B = im_input_f.shape[0]
    H, W = im_input_f.shape[2], im_input_f.shape[3]
    C, R, NC = im_channel, m_range, n_class
    K = 2 * R + 1
    Hp, Wp = H + 2 * R, W + 2 * R

    im_f = im_input_f[:, -C:].astype(f32)
    im_b = im_input_b[:, -C:].astype(f32)

    cls_f = gt_motion_f.astype(jnp.int32).reshape(B, H, W)
    cls_b = gt_motion_b.astype(jnp.int32).reshape(B, H, W)

    # One-hot masks are module outputs only; the kernel never reads them.
    cls_range = jnp.arange(NC, dtype=jnp.int32).reshape(1, NC, 1, 1)
    m_mask_f = (cls_f[:, None, :, :] == cls_range).astype(f32)
    m_mask_b = (cls_b[:, None, :, :] == cls_range).astype(f32)

    # Pad ONLY the tiny int32 label planes; sentinel NC => zero conv padding.
    cls_f_pad = jnp.pad(cls_f, ((0, 0), (R, R), (R, R)), constant_values=NC)
    cls_b_pad = jnp.pad(cls_b, ((0, 0), (R, R), (R, R)), constant_values=NC)

    kern_flat = m_kernel.reshape(-1).astype(f32)                 # (NC*K*K,)

    vmem_limit = _device_vmem_limit_bytes()
    bt = batch_block if batch_block is not None else _choose_batch_block(
        B, C, H, W, Hp, Wp, K, vmem_limit)
    grid = (B // bt,)

    smem_spec = pl.BlockSpec(memory_space=pltpu.MemorySpace.SMEM)
    cls_spec = pl.BlockSpec((bt, Hp, Wp), lambda i: (i, 0, 0))
    im_spec = pl.BlockSpec((bt, C, H, W), lambda i: (i, 0, 0, 0))
    pred_spec = pl.BlockSpec((bt, C, H, W), lambda i: (i, 0, 0, 0))
    plane_spec = pl.BlockSpec((bt, H, W), lambda i: (i, 0, 0))

    kernel = functools.partial(
        _bigt_fused_kernel, n_class=NC, ksize=K, m_range=R,
        height=H, width=W, im_channel=C, batch_block=bt)

    call = pl.pallas_call(
        kernel,
        grid=grid,
        in_specs=[smem_spec, cls_spec, cls_spec, im_spec, im_spec],
        out_specs=(pred_spec, plane_spec, plane_spec, plane_spec, plane_spec),
        out_shape=(jax.ShapeDtypeStruct((B, C, H, W), f32),
                   jax.ShapeDtypeStruct((B, H, W), f32),
                   jax.ShapeDtypeStruct((B, H, W), f32),
                   jax.ShapeDtypeStruct((B, H, W), f32),
                   jax.ShapeDtypeStruct((B, H, W), f32)),
        scratch_shapes=[pltpu.VMEM((K * K, bt, H, W), f32),
                        pltpu.VMEM((bt, C, Hp, Wp), f32)],
        compiler_params=pltpu.CompilerParams(
            dimension_semantics=("parallel",),
            vmem_limit_bytes=vmem_limit),
    )
    pred, dis_f, dis_b, attn, attn_c = call(
        kern_flat, cls_f_pad, cls_b_pad, im_f, im_b)

    dis_f = dis_f.reshape(B, 1, H, W)
    dis_b = dis_b.reshape(B, 1, H, W)
    attn = attn.reshape(B, 1, H, W)
    attn_c = attn_c.reshape(B, 1, H, W)
    return pred, m_mask_f, dis_f, attn, m_mask_b, dis_b, attn_c


# ----------------------------------------------------------------------------
# Pure-JAX reference (mirrors the PyTorch module) for validation.
# ----------------------------------------------------------------------------
def _ref_conv(x, w, r):
    return lax.conv_general_dilated(
        x, w, window_strides=(1, 1), padding=[(r, r), (r, r)],
        dimension_numbers=("NCHW", "OIHW", "NCHW"))


def bigt_net_reference(im_input_f, im_input_b, gt_motion_f, gt_motion_b,
                       m_kernel, *, im_channel, n_class, m_range):
    f32 = jnp.float32
    R = m_range
    cls = jnp.arange(n_class, dtype=jnp.int32).reshape(1, n_class, 1, 1)
    m_mask_f = (gt_motion_f.astype(jnp.int32) == cls).astype(f32)
    m_mask_b = (gt_motion_b.astype(jnp.int32) == cls).astype(f32)
    seg_f = _ref_conv(m_mask_f, m_kernel, R)
    seg_b = _ref_conv(m_mask_b, m_kernel, R)
    disappear_f = jax.nn.relu(seg_f - 1.0)
    appear_f = jax.nn.relu(1.0 - disappear_f)
    disappear_b = jax.nn.relu(seg_b - 1.0)
    appear_b = jax.nn.relu(1.0 - disappear_b)

    def construct_image(im, m_mask, appear):
        im = im * appear
        outs = []
        for i in range(im.shape[1]):
            xi = im[:, i:i + 1] * m_mask
            outs.append(_ref_conv(xi, m_kernel, R)[:, 0])
        return jnp.stack(outs, axis=1)

    pred_f = construct_image(im_input_f[:, -im_channel:].astype(f32),
                             m_mask_f, appear_f)
    pred_b = construct_image(im_input_b[:, -im_channel:].astype(f32),
                             m_mask_b, appear_b)
    seg_f = 1.0 - jax.nn.relu(1.0 - seg_f)
    seg_b = 1.0 - jax.nn.relu(1.0 - seg_b)
    attn = (seg_f + 1e-5) / (seg_f + seg_b + 2e-5)
    pred = attn * pred_f + (1.0 - attn) * pred_b
    return (pred, m_mask_f, 1.0 - appear_f, attn,
            m_mask_b, 1.0 - appear_b, 1.0 - attn)


# ----------------------------------------------------------------------------
if __name__ == "__main__":
    B, H, W = 2, 16, 16
    im_channel, n_inputs, n_class, m_range = 3, 2, 4, 1
    K = 2 * m_range + 1

    key = jax.random.PRNGKey(0)
    k1, k2, k3, k4, k5 = jax.random.split(key, 5)
    im_input_f = jax.random.uniform(k1, (B, n_inputs * im_channel, H, W),
                                    jnp.float32)
    im_input_b = jax.random.uniform(k2, (B, n_inputs * im_channel, H, W),
                                    jnp.float32)
    gt_motion_f = jax.random.randint(k3, (B, 1, H, W), 0, n_class, jnp.int32)
    gt_motion_b = jax.random.randint(k4, (B, 1, H, W), 0, n_class, jnp.int32)
    m_kernel = jax.random.uniform(k5, (1, n_class, K, K), jnp.float32) / (K * K)

    out = bigt_net_forward(im_input_f, im_input_b, gt_motion_f, gt_motion_b,
                           m_kernel, im_channel=im_channel, n_class=n_class,
                           m_range=m_range)
    out = jax.block_until_ready(out)

    ref = bigt_net_reference(im_input_f, im_input_b, gt_motion_f, gt_motion_b,
                             m_kernel, im_channel=im_channel, n_class=n_class,
                             m_range=m_range)

    for got, want in zip(out, ref):
        assert got.shape == want.shape, (got.shape, want.shape)
        err = float(jnp.max(jnp.abs(got - want)))
        assert jnp.allclose(got, want, atol=1e-4, rtol=1e-4), err

    print("KERNEL_OK")
</pallas_src>

<mosaic_0001>
module attributes {stable_mosaic.version = 11 : i64} {
  func.func @_bigt_fused_kernel(%arg0: i32, %arg1: memref<36xf32, #tpu.memory_space<smem>>, %arg2: memref<1x18x18xi32, #tpu.memory_space<vmem>>, %arg3: memref<1x18x18xi32, #tpu.memory_space<vmem>>, %arg4: memref<1x3x16x16xf32, #tpu.memory_space<vmem>>, %arg5: memref<1x3x16x16xf32, #tpu.memory_space<vmem>>, %arg6: memref<1x3x16x16xf32, #tpu.memory_space<vmem>>, %arg7: memref<1x16x16xf32, #tpu.memory_space<vmem>>, %arg8: memref<1x16x16xf32, #tpu.memory_space<vmem>>, %arg9: memref<1x16x16xf32, #tpu.memory_space<vmem>>, %arg10: memref<1x16x16xf32, #tpu.memory_space<vmem>>, %arg11: memref<9x1x16x16xf32, #tpu.memory_space<vmem>>, %arg12: memref<1x3x18x18xf32, #tpu.memory_space<vmem>>) attributes {dimension_semantics = [#tpu.dimension_semantics<parallel>], iteration_bounds = array<i64: 2>, scalar_prefetch = 0 : i64, scratch_operands = 2 : i64, tpu.core_type = #tpu.core_type<tc>, window_params = [{transform_indices = @transform_0, window_bounds = array<i64: 36>}, {transform_indices = @transform_1, window_bounds = array<i64: 1, 18, 18>}, {transform_indices = @transform_2, window_bounds = array<i64: 1, 18, 18>}, {transform_indices = @transform_3, window_bounds = array<i64: 1, 3, 16, 16>}, {transform_indices = @transform_4, window_bounds = array<i64: 1, 3, 16, 16>}, {transform_indices = @transform_5, window_bounds = array<i64: 1, 3, 16, 16>}, {transform_indices = @transform_6, window_bounds = array<i64: 1, 16, 16>}, {transform_indices = @transform_7, window_bounds = array<i64: 1, 16, 16>}, {transform_indices = @transform_8, window_bounds = array<i64: 1, 16, 16>}, {transform_indices = @transform_9, window_bounds = array<i64: 1, 16, 16>}]} {
    %c0 = arith.constant 0 : index
    %0 = memref.load %arg1[%c0] : memref<36xf32, #tpu.memory_space<smem>>
    %c1 = arith.constant 1 : index
    %1 = memref.load %arg1[%c1] : memref<36xf32, #tpu.memory_space<smem>>
    %c2 = arith.constant 2 : index
    %2 = memref.load %arg1[%c2] : memref<36xf32, #tpu.memory_space<smem>>
    %c3 = arith.constant 3 : index
    %3 = memref.load %arg1[%c3] : memref<36xf32, #tpu.memory_space<smem>>
    %c4 = arith.constant 4 : index
    %4 = memref.load %arg1[%c4] : memref<36xf32, #tpu.memory_space<smem>>
    %c5 = arith.constant 5 : index
    %5 = memref.load %arg1[%c5] : memref<36xf32, #tpu.memory_space<smem>>
    %c6 = arith.constant 6 : index
    %6 = memref.load %arg1[%c6] : memref<36xf32, #tpu.memory_space<smem>>
    %c7 = arith.constant 7 : index
    %7 = memref.load %arg1[%c7] : memref<36xf32, #tpu.memory_space<smem>>
    %c8 = arith.constant 8 : index
    %8 = memref.load %arg1[%c8] : memref<36xf32, #tpu.memory_space<smem>>
    %c9 = arith.constant 9 : index
    %9 = memref.load %arg1[%c9] : memref<36xf32, #tpu.memory_space<smem>>
    %c10 = arith.constant 10 : index
    %10 = memref.load %arg1[%c10] : memref<36xf32, #tpu.memory_space<smem>>
    %c11 = arith.constant 11 : index
    %11 = memref.load %arg1[%c11] : memref<36xf32, #tpu.memory_space<smem>>
    %c12 = arith.constant 12 : index
    %12 = memref.load %arg1[%c12] : memref<36xf32, #tpu.memory_space<smem>>
    %c13 = arith.constant 13 : index
    %13 = memref.load %arg1[%c13] : memref<36xf32, #tpu.memory_space<smem>>
    %c14 = arith.constant 14 : index
    %14 = memref.load %arg1[%c14] : memref<36xf32, #tpu.memory_space<smem>>
    %c15 = arith.constant 15 : index
    %15 = memref.load %arg1[%c15] : memref<36xf32, #tpu.memory_space<smem>>
    %c16 = arith.constant 16 : index
    %16 = memref.load %arg1[%c16] : memref<36xf32, #tpu.memory_space<smem>>
    %c17 = arith.constant 17 : index
    %17 = memref.load %arg1[%c17] : memref<36xf32, #tpu.memory_space<smem>>
    %c18 = arith.constant 18 : index
    %18 = memref.load %arg1[%c18] : memref<36xf32, #tpu.memory_space<smem>>
    %c19 = arith.constant 19 : index
    %19 = memref.load %arg1[%c19] : memref<36xf32, #tpu.memory_space<smem>>
    %c20 = arith.constant 20 : index
    %20 = memref.load %arg1[%c20] : memref<36xf32, #tpu.memory_space<smem>>
    %c21 = arith.constant 21 : index
    %21 = memref.load %arg1[%c21] : memref<36xf32, #tpu.memory_space<smem>>
    %c22 = arith.constant 22 : index
    %22 = memref.load %arg1[%c22] : memref<36xf32, #tpu.memory_space<smem>>
    %c23 = arith.constant 23 : index
    %23 = memref.load %arg1[%c23] : memref<36xf32, #tpu.memory_space<smem>>
    %c24 = arith.constant 24 : index
    %24 = memref.load %arg1[%c24] : memref<36xf32, #tpu.memory_space<smem>>
    %c25 = arith.constant 25 : index
    %25 = memref.load %arg1[%c25] : memref<36xf32, #tpu.memory_space<smem>>
    %c26 = arith.constant 26 : index
    %26 = memref.load %arg1[%c26] : memref<36xf32, #tpu.memory_space<smem>>
    %c27 = arith.constant 27 : index
    %27 = memref.load %arg1[%c27] : memref<36xf32, #tpu.memory_space<smem>>
    %c28 = arith.constant 28 : index
    %28 = memref.load %arg1[%c28] : memref<36xf32, #tpu.memory_space<smem>>
    %c29 = arith.constant 29 : index
    %29 = memref.load %arg1[%c29] : memref<36xf32, #tpu.memory_space<smem>>
    %c30 = arith.constant 30 : index
    %30 = memref.load %arg1[%c30] : memref<36xf32, #tpu.memory_space<smem>>
    %c31 = arith.constant 31 : index
    %31 = memref.load %arg1[%c31] : memref<36xf32, #tpu.memory_space<smem>>
    %c32 = arith.constant 32 : index
    %32 = memref.load %arg1[%c32] : memref<36xf32, #tpu.memory_space<smem>>
    %c33 = arith.constant 33 : index
    %33 = memref.load %arg1[%c33] : memref<36xf32, #tpu.memory_space<smem>>
    %c34 = arith.constant 34 : index
    %34 = memref.load %arg1[%c34] : memref<36xf32, #tpu.memory_space<smem>>
    %c35 = arith.constant 35 : index
    %35 = memref.load %arg1[%c35] : memref<36xf32, #tpu.memory_space<smem>>
    %cst = arith.constant 0.000000e+00 : f32
    %36 = vector.broadcast %cst : f32 to vector<1x3x18x18xf32>
    %c0_0 = arith.constant 0 : index
    %c0_1 = arith.constant 0 : index
    %c0_2 = arith.constant 0 : index
    %c0_3 = arith.constant 0 : index
    %37 = vector.load %arg12[%c0_0, %c0_1, %c0_2, %c0_3] : memref<1x3x18x18xf32, #tpu.memory_space<vmem>>, vector<1x3x18x18xf32>
    tpu.vector_store %arg12[%c0_0, %c0_1, %c0_2, %c0_3], %36 {strides = array<i32>} : memref<1x3x18x18xf32, #tpu.memory_space<vmem>>, vector<1x3x18x18xf32>,
    %cst_4 = arith.constant 0.000000e+00 : f32
    %38 = vector.broadcast %cst_4 : f32 to vector<1x16x16xf32>
    %c0_5 = arith.constant 0 : index
    %c0_6 = arith.constant 0 : index
    %c0_7 = arith.constant 0 : index
    %39 = vector.load %arg2[%c0_5, %c0_6, %c0_7] : memref<1x18x18xi32, #tpu.memory_space<vmem>>, vector<1x16x16xi32>
    %cst_8 = arith.constant 0.000000e+00 : f32
    %40 = vector.broadcast %cst_8 : f32 to vector<1x16x16xf32>
    %c0_i32 = arith.constant 0 : i32
    %41 = vector.broadcast %c0_i32 : i32 to vector<1x16x16xi32>
    %42 = arith.cmpi eq, %39, %41 : vector<1x16x16xi32>
    %43 = vector.broadcast %0 : f32 to vector<1x16x16xf32>
    %44 = arith.select %42, %43, %40 : vector<1x16x16xi1>, vector<1x16x16xf32>
    %c1_i32 = arith.constant 1 : i32
    %45 = vector.broadcast %c1_i32 : i32 to vector<1x16x16xi32>
    %46 = arith.cmpi eq, %39, %45 : vector<1x16x16xi32>
    %47 = vector.broadcast %9 : f32 to vector<1x16x16xf32>
    %48 = arith.select %46, %47, %44 : vector<1x16x16xi1>, vector<1x16x16xf32>
    %c2_i32 = arith.constant 2 : i32
    %49 = vector.broadcast %c2_i32 : i32 to vector<1x16x16xi32>
    %50 = arith.cmpi eq, %39, %49 : vector<1x16x16xi32>
    %51 = vector.broadcast %18 : f32 to vector<1x16x16xf32>
    %52 = arith.select %50, %51, %48 : vector<1x16x16xi1>, vector<1x16x16xf32>
    %c3_i32 = arith.constant 3 : i32
    %53 = vector.broadcast %c3_i32 : i32 to vector<1x16x16xi32>
    %54 = arith.cmpi eq, %39, %53 : vector<1x16x16xi32>
    %55 = vector.broadcast %27 : f32 to vector<1x16x16xf32>
    %56 = arith.select %54, %55, %52 : vector<1x16x16xi1>, vector<1x16x16xf32>
    %c0_9 = arith.constant 0 : index
    %c0_10 = arith.constant 0 : index
    %c0_11 = arith.constant 0 : index
    %c0_12 = arith.constant 0 : index
    %57 = vector.load %arg11[%c0_9, %c0_10, %c0_11, %c0_12] : memref<9x1x16x16xf32, #tpu.memory_space<vmem>>, vector<1x1x16x16xf32>
    %58 = vector.shape_cast %57 : vector<1x1x16x16xf32> to vector<1x16x16xf32>
    %59 = vector.shape_cast %56 : vector<1x16x16xf32> to vector<1x1x16x16xf32>
    tpu.vector_store %arg11[%c0_9, %c0_10, %c0_11, %c0_12], %59 {strides = array<i32>} : memref<9x1x16x16xf32, #tpu.memory_space<vmem>>, vector<1x1x16x16xf32>,
    %60 = arith.addf %38, %56 : vector<1x16x16xf32>
    %c0_13 = arith.constant 0 : index
    %c0_14 = arith.constant 0 : index
    %c1_15 = arith.constant 1 : index
    %61 = vector.load %arg2[%c0_13, %c0_14, %c1_15] : memref<1x18x18xi32, #tpu.memory_space<vmem>>, vector<1x16x16xi32>
    %cst_16 = arith.constant 0.000000e+00 : f32
    %62 = vector.broadcast %cst_16 : f32 to vector<1x16x16xf32>
    %c0_i32_17 = arith.constant 0 : i32
    %63 = vector.broadcast %c0_i32_17 : i32 to vector<1x16x16xi32>
    %64 = arith.cmpi eq, %61, %63 : vector<1x16x16xi32>
    %65 = vector.broadcast %1 : f32 to vector<1x16x16xf32>
    %66 = arith.select %64, %65, %62 : vector<1x16x16xi1>, vector<1x16x16xf32>
    %c1_i32_18 = arith.constant 1 : i32
    %67 = vector.broadcast %c1_i32_18 : i32 to vector<1x16x16xi32>
    %68 = arith.cmpi eq, %61, %67 : vector<1x16x16xi32>
    %69 = vector.broadcast %10 : f32 to vector<1x16x16xf32>
    %70 = arith.select %68, %69, %66 : vector<1x16x16xi1>, vector<1x16x16xf32>
    %c2_i32_19 = arith.constant 2 : i32
    %71 = vector.broadcast %c2_i32_19 : i32 to vector<1x16x16xi32>
    %72 = arith.cmpi eq, %61, %71 : vector<1x16x16xi32>
    %73 = vector.broadcast %19 : f32 to vector<1x16x16xf32>
    %74 = arith.select %72, %73, %70 : vector<1x16x16xi1>, vector<1x16x16xf32>
    %c3_i32_20 = arith.constant 3 : i32
    %75 = vector.broadcast %c3_i32_20 : i32 to vector<1x16x16xi32>
    %76 = arith.cmpi eq, %61, %75 : vector<1x16x16xi32>
    %77 = vector.broadcast %28 : f32 to vector<1x16x16xf32>
    %78 = arith.select %76, %77, %74 : vector<1x16x16xi1>, vector<1x16x16xf32>
    %c1_21 = arith.constant 1 : index
    %c0_22 = arith.constant 0 : index
    %c0_23 = arith.constant 0 : index
    %c0_24 = arith.constant 0 : index
    %79 = vector.load %arg11[%c1_21, %c0_22, %c0_23, %c0_24] : memref<9x1x16x16xf32, #tpu.memory_space<vmem>>, vector<1x1x16x16xf32>
    %80 = vector.shape_cast %79 : vector<1x1x16x16xf32> to vector<1x16x16xf32>
    %81 = vector.shape_cast %78 : vector<1x16x16xf32> to vector<1x1x16x16xf32>
    tpu.vector_store %arg11[%c1_21, %c0_22, %c0_23, %c0_24], %81 {strides = array<i32>} : memref<9x1x16x16xf32, #tpu.memory_space<vmem>>, vector<1x1x16x16xf32>,
    %82 = arith.addf %60, %78 : vector<1x16x16xf32>
    %c0_25 = arith.constant 0 : index
    %c0_26 = arith.constant 0 : index
    %c2_27 = arith.constant 2 : index
    %83 = vector.load %arg2[%c0_25, %c0_26, %c2_27] : memref<1x18x18xi32, #tpu.memory_space<vmem>>, vector<1x16x16xi32>
    %cst_28 = arith.constant 0.000000e+00 : f32
    %84 = vector.broadcast %cst_28 : f32 to vector<1x16x16xf32>
    %c0_i32_29 = arith.constant 0 : i32
    %85 = vector.broadcast %c0_i32_29 : i32 to vector<1x16x16xi32>
    %86 = arith.cmpi eq, %83, %85 : vector<1x16x16xi32>
    %87 = vector.broadcast %2 : f32 to vector<1x16x16xf32>
    %88 = arith.select %86, %87, %84 : vector<1x16x16xi1>, vector<1x16x16xf32>
    %c1_i32_30 = arith.constant 1 : i32
    %89 = vector.broadcast %c1_i32_30 : i32 to vector<1x16x16xi32>
    %90 = arith.cmpi eq, %83, %89 : vector<1x16x16xi32>
    %91 = vector.broadcast %11 : f32 to vector<1x16x16xf32>
    %92 = arith.select %90, %91, %88 : vector<1x16x16xi1>, vector<1x16x16xf32>
    %c2_i32_31 = arith.constant 2 : i32
    %93 = vector.broadcast %c2_i32_31 : i32 to vector<1x16x16xi32>
    %94 = arith.cmpi eq, %83, %93 : vector<1x16x16xi32>
    %95 = vector.broadcast %20 : f32 to vector<1x16x16xf32>
    %96 = arith.select %94, %95, %92 : vector<1x16x16xi1>, vector<1x16x16xf32>
    %c3_i32_32 = arith.constant 3 : i32
    %97 = vector.broadcast %c3_i32_32 : i32 to vector<1x16x16xi32>
    %98 = arith.cmpi eq, %83, %97 : vector<1x16x16xi32>
    %99 = vector.broadcast %29 : f32 to vector<1x16x16xf32>
    %100 = arith.select %98, %99, %96 : vector<1x16x16xi1>, vector<1x16x16xf32>
    %c2_33 = arith.constant 2 : index
    %c0_34 = arith.constant 0 : index
    %c0_35 = arith.constant 0 : index
    %c0_36 = arith.constant 0 : index
    %101 = vector.load %arg11[%c2_33, %c0_34, %c0_35, %c0_36] : memref<9x1x16x16xf32, #tpu.memory_space<vmem>>, vector<1x1x16x16xf32>
    %102 = vector.shape_cast %101 : vector<1x1x16x16xf32> to vector<1x16x16xf32>
    %103 = vector.shape_cast %100 : vector<1x16x16xf32> to vector<1x1x16x16xf32>
    tpu.vector_store %arg11[%c2_33, %c0_34, %c0_35, %c0_36], %103 {strides = array<i32>} : memref<9x1x16x16xf32, #tpu.memory_space<vmem>>, vector<1x1x16x16xf32>,
    %104 = arith.addf %82, %100 : vector<1x16x16xf32>
    %c0_37 = arith.constant 0 : index
    %c1_38 = arith.constant 1 : index
    %c0_39 = arith.constant 0 : index
    %105 = vector.load %arg2[%c0_37, %c1_38, %c0_39] : memref<1x18x18xi32, #tpu.memory_space<vmem>>, vector<1x16x16xi32>
    %cst_40 = arith.constant 0.000000e+00 : f32
    %106 = vector.broadcast %cst_40 : f32 to vector<1x16x16xf32>
    %c0_i32_41 = arith.constant 0 : i32
    %107 = vector.broadcast %c0_i32_41 : i32 to vector<1x16x16xi32>
    %108 = arith.cmpi eq, %105, %107 : vector<1x16x16xi32>
    %109 = vector.broadcast %3 : f32 to vector<1x16x16xf32>
    %110 = arith.select %108, %109, %106 : vector<1x16x16xi1>, vector<1x16x16xf32>
    %c1_i32_42 = arith.constant 1 : i32
    %111 = vector.broadcast %c1_i32_42 : i32 to vector<1x16x16xi32>
    %112 = arith.cmpi eq, %105, %111 : vector<1x16x16xi32>
    %113 = vector.broadcast %12 : f32 to vector<1x16x16xf32>
    %114 = arith.select %112, %113, %110 : vector<1x16x16xi1>, vector<1x16x16xf32>
    %c2_i32_43 = arith.constant 2 : i32
    %115 = vector.broadcast %c2_i32_43 : i32 to vector<1x16x16xi32>
    %116 = arith.cmpi eq, %105, %115 : vector<1x16x16xi32>
    %117 = vector.broadcast %21 : f32 to vector<1x16x16xf32>
    %118 = arith.select %116, %117, %114 : vector<1x16x16xi1>, vector<1x16x16xf32>
    %c3_i32_44 = arith.constant 3 : i32
    %119 = vector.broadcast %c3_i32_44 : i32 to vector<1x16x16xi32>
    %120 = arith.cmpi eq, %105, %119 : vector<1x16x16xi32>
    %121 = vector.broadcast %30 : f32 to vector<1x16x16xf32>
    %122 = arith.select %120, %121, %118 : vector<1x16x16xi1>, vector<1x16x16xf32>
    %c3_45 = arith.constant 3 : index
    %c0_46 = arith.constant 0 : index
    %c0_47 = arith.constant 0 : index
    %c0_48 = arith.constant 0 : index
    %123 = vector.load %arg11[%c3_45, %c0_46, %c0_47, %c0_48] : memref<9x1x16x16xf32, #tpu.memory_space<vmem>>, vector<1x1x16x16xf32>
    %124 = vector.shape_cast %123 : vector<1x1x16x16xf32> to vector<1x16x16xf32>
    %125 = vector.shape_cast %122 : vector<1x16x16xf32> to vector<1x1x16x16xf32>
    tpu.vector_store %arg11[%c3_45, %c0_46, %c0_47, %c0_48], %125 {strides = array<i32>} : memref<9x1x16x16xf32, #tpu.memory_space<vmem>>, vector<1x1x16x16xf32>,
    %126 = arith.addf %104, %122 : vector<1x16x16xf32>
    %c0_49 = arith.constant 0 : index
    %c1_50 = arith.constant 1 : index
    %c1_51 = arith.constant 1 : index
    %127 = vector.load %arg2[%c0_49, %c1_50, %c1_51] : memref<1x18x18xi32, #tpu.memory_space<vmem>>, vector<1x16x16xi32>
    %cst_52 = arith.constant 0.000000e+00 : f32
    %128 = vector.broadcast %cst_52 : f32 to vector<1x16x16xf32>
    %c0_i32_53 = arith.constant 0 : i32
    %129 = vector.broadcast %c0_i32_53 : i32 to vector<1x16x16xi32>
    %130 = arith.cmpi eq, %127, %129 : vector<1x16x16xi32>
    %131 = vector.broadcast %4 : f32 to vector<1x16x16xf32>
    %132 = arith.select %130, %131, %128 : vector<1x16x16xi1>, vector<1x16x16xf32>
    %c1_i32_54 = arith.constant 1 : i32
    %133 = vector.broadcast %c1_i32_54 : i32 to vector<1x16x16xi32>
    %134 = arith.cmpi eq, %127, %133 : vector<1x16x16xi32>
    %135 = vector.broadcast %13 : f32 to vector<1x16x16xf32>
    %136 = arith.select %134, %135, %132 : vector<1x16x16xi1>, vector<1x16x16xf32>
    %c2_i32_55 = arith.constant 2 : i32
    %137 = vector.broadcast %c2_i32_55 : i32 to vector<1x16x16xi32>
    %138 = arith.cmpi eq, %127, %137 : vector<1x16x16xi32>
    %139 = vector.broadcast %22 : f32 to vector<1x16x16xf32>
    %140 = arith.select %138, %139, %136 : vector<1x16x16xi1>, vector<1x16x16xf32>
    %c3_i32_56 = arith.constant 3 : i32
    %141 = vector.broadcast %c3_i32_56 : i32 to vector<1x16x16xi32>
    %142 = arith.cmpi eq, %127, %141 : vector<1x16x16xi32>
    %143 = vector.broadcast %31 : f32 to vector<1x16x16xf32>
    %144 = arith.select %142, %143, %140 : vector<1x16x16xi1>, vector<1x16x16xf32>
    %c4_57 = arith.constant 4 : index
    %c0_58 = arith.constant 0 : index
    %c0_59 = arith.constant 0 : index
    %c0_60 = arith.constant 0 : index
    %145 = vector.load %arg11[%c4_57, %c0_58, %c0_59, %c0_60] : memref<9x1x16x16xf32, #tpu.memory_space<vmem>>, vector<1x1x16x16xf32>
    %146 = vector.shape_cast %145 : vector<1x1x16x16xf32> to vector<1x16x16xf32>
    %147 = vector.shape_cast %144 : vector<1x16x16xf32> to vector<1x1x16x16xf32>
    tpu.vector_store %arg11[%c4_57, %c0_58, %c0_59, %c0_60], %147 {strides = array<i32>} : memref<9x1x16x16xf32, #tpu.memory_space<vmem>>, vector<1x1x16x16xf32>,
    %148 = arith.addf %126, %144 : vector<1x16x16xf32>
    %c0_61 = arith.constant 0 : index
    %c1_62 = arith.constant 1 : index
    %c2_63 = arith.constant 2 : index
    %149 = vector.load %arg2[%c0_61, %c1_62, %c2_63] : memref<1x18x18xi32, #tpu.memory_space<vmem>>, vector<1x16x16xi32>
    %cst_64 = arith.constant 0.000000e+00 : f32
    %150 = vector.broadcast %cst_64 : f32 to vector<1x16x16xf32>
    %c0_i32_65 = arith.constant 0 : i32
    %151 = vector.broadcast %c0_i32_65 : i32 to vector<1x16x16xi32>
    %152 = arith.cmpi eq, %149, %151 : vector<1x16x16xi32>
    %153 = vector.broadcast %5 : f32 to vector<1x16x16xf32>
    %154 = arith.select %152, %153, %150 : vector<1x16x16xi1>, vector<1x16x16xf32>
    %c1_i32_66 = arith.constant 1 : i32
    %155 = vector.broadcast %c1_i32_66 : i32 to vector<1x16x16xi32>
    %156 = arith.cmpi eq, %149, %155 : vector<1x16x16xi32>
    %157 = vector.broadcast %14 : f32 to vector<1x16x16xf32>
    %158 = arith.select %156, %157, %154 : vector<1x16x16xi1>, vector<1x16x16xf32>
    %c2_i32_67 = arith.constant 2 : i32
    %159 = vector.broadcast %c2_i32_67 : i32 to vector<1x16x16xi32>
    %160 = arith.cmpi eq, %149, %159 : vector<1x16x16xi32>
    %161 = vector.broadcast %23 : f32 to vector<1x16x16xf32>
    %162 = arith.select %160, %161, %158 : vector<1x16x16xi1>, vector<1x16x16xf32>
    %c3_i32_68 = arith.constant 3 : i32
    %163 = vector.broadcast %c3_i32_68 : i32 to vector<1x16x16xi32>
    %164 = arith.cmpi eq, %149, %163 : vector<1x16x16xi32>
    %165 = vector.broadcast %32 : f32 to vector<1x16x16xf32>
    %166 = arith.select %164, %165, %162 : vector<1x16x16xi1>, vector<1x16x16xf32>
    %c5_69 = arith.constant 5 : index
    %c0_70 = arith.constant 0 : index
    %c0_71 = arith.constant 0 : index
    %c0_72 = arith.constant 0 : index
    %167 = vector.load %arg11[%c5_69, %c0_70, %c0_71, %c0_72] : memref<9x1x16x16xf32, #tpu.memory_space<vmem>>, vector<1x1x16x16xf32>
    %168 = vector.shape_cast %167 : vector<1x1x16x16xf32> to vector<1x16x16xf32>
    %169 = vector.shape_cast %166 : vector<1x16x16xf32> to vector<1x1x16x16xf32>
    tpu.vector_store %arg11[%c5_69, %c0_70, %c0_71, %c0_72], %169 {strides = array<i32>} : memref<9x1x16x16xf32, #tpu.memory_space<vmem>>, vector<1x1x16x16xf32>,
    %170 = arith.addf %148, %166 : vector<1x16x16xf32>
    %c0_73 = arith.constant 0 : index
    %c2_74 = arith.constant 2 : index
    %c0_75 = arith.constant 0 : index
    %171 = vector.load %arg2[%c0_73, %c2_74, %c0_75] : memref<1x18x18xi32, #tpu.memory_space<vmem>>, vector<1x16x16xi32>
    %cst_76 = arith.constant 0.000000e+00 : f32
    %172 = vector.broadcast %cst_76 : f32 to vector<1x16x16xf32>
    %c0_i32_77 = arith.constant 0 : i32
    %173 = vector.broadcast %c0_i32_77 : i32 to vector<1x16x16xi32>
    %174 = arith.cmpi eq, %171, %173 : vector<1x16x16xi32>
    %175 = vector.broadcast %6 : f32 to vector<1x16x16xf32>
    %176 = arith.select %174, %175, %172 : vector<1x16x16xi1>, vector<1x16x16xf32>
    %c1_i32_78 = arith.constant 1 : i32
    %177 = vector.broadcast %c1_i32_78 : i32 to vector<1x16x16xi32>
    %178 = arith.cmpi eq, %171, %177 : vector<1x16x16xi32>
    %179 = vector.broadcast %15 : f32 to vector<1x16x16xf32>
    %180 = arith.select %178, %179, %176 : vector<1x16x16xi1>, vector<1x16x16xf32>
    %c2_i32_79 = arith.constant 2 : i32
    %181 = vector.broadcast %c2_i32_79 : i32 to vector<1x16x16xi32>
    %182 = arith.cmpi eq, %171, %181 : vector<1x16x16xi32>
    %183 = vector.broadcast %24 : f32 to vector<1x16x16xf32>
    %184 = arith.select %182, %183, %180 : vector<1x16x16xi1>, vector<1x16x16xf32>
    %c3_i32_80 = arith.constant 3 : i32
    %185 = vector.broadcast %c3_i32_80 : i32 to vector<1x16x16xi32>
    %186 = arith.cmpi eq, %171, %185 : vector<1x16x16xi32>
    %187 = vector.broadcast %33 : f32 to vector<1x16x16xf32>
    %188 = arith.select %186, %187, %184 : vector<1x16x16xi1>, vector<1x16x16xf32>
    %c6_81 = arith.constant 6 : index
    %c0_82 = arith.constant 0 : index
    %c0_83 = arith.constant 0 : index
    %c0_84 = arith.constant 0 : index
    %189 = vector.load %arg11[%c6_81, %c0_82, %c0_83, %c0_84] : memref<9x1x16x16xf32, #tpu.memory_space<vmem>>, vector<1x1x16x16xf32>
    %190 = vector.shape_cast %189 : vector<1x1x16x16xf32> to vector<1x16x16xf32>
    %191 = vector.shape_cast %188 : vector<1x16x16xf32> to vector<1x1x16x16xf32>
    tpu.vector_store %arg11[%c6_81, %c0_82, %c0_83, %c0_84], %191 {strides = array<i32>} : memref<9x1x16x16xf32, #tpu.memory_space<vmem>>, vector<1x1x16x16xf32>,
    %192 = arith.addf %170, %188 : vector<1x16x16xf32>
    %c0_85 = arith.constant 0 : index
    %c2_86 = arith.constant 2 : index
    %c1_87 = arith.constant 1 : index
    %193 = vector.load %arg2[%c0_85, %c2_86, %c1_87] : memref<1x18x18xi32, #tpu.memory_space<vmem>>, vector<1x16x16xi32>
    %cst_88 = arith.constant 0.000000e+00 : f32
    %194 = vector.broadcast %cst_88 : f32 to vector<1x16x16xf32>
    %c0_i32_89 = arith.constant 0 : i32
    %195 = vector.broadcast %c0_i32_89 : i32 to vector<1x16x16xi32>
    %196 = arith.cmpi eq, %193, %195 : vector<1x16x16xi32>
    %197 = vector.broadcast %7 : f32 to vector<1x16x16xf32>
    %198 = arith.select %196, %197, %194 : vector<1x16x16xi1>, vector<1x16x16xf32>
    %c1_i32_90 = arith.constant 1 : i32
    %199 = vector.broadcast %c1_i32_90 : i32 to vector<1x16x16xi32>
    %200 = arith.cmpi eq, %193, %199 : vector<1x16x16xi32>
    %201 = vector.broadcast %16 : f32 to vector<1x16x16xf32>
    %202 = arith.select %200, %201, %198 : vector<1x16x16xi1>, vector<1x16x16xf32>
    %c2_i32_91 = arith.constant 2 : i32
    %203 = vector.broadcast %c2_i32_91 : i32 to vector<1x16x16xi32>
    %204 = arith.cmpi eq, %193, %203 : vector<1x16x16xi32>
    %205 = vector.broadcast %25 : f32 to vector<1x16x16xf32>
    %206 = arith.select %204, %205, %202 : vector<1x16x16xi1>, vector<1x16x16xf32>
    %c3_i32_92 = arith.constant 3 : i32
    %207 = vector.broadcast %c3_i32_92 : i32 to vector<1x16x16xi32>
    %208 = arith.cmpi eq, %193, %207 : vector<1x16x16xi32>
    %209 = vector.broadcast %34 : f32 to vector<1x16x16xf32>
    %210 = arith.select %208, %209, %206 : vector<1x16x16xi1>, vector<1x16x16xf32>
    %c7_93 = arith.constant 7 : index
    %c0_94 = arith.constant 0 : index
    %c0_95 = arith.constant 0 : index
    %c0_96 = arith.constant 0 : index
    %211 = vector.load %arg11[%c7_93, %c0_94, %c0_95, %c0_96] : memref<9x1x16x16xf32, #tpu.memory_space<vmem>>, vector<1x1x16x16xf32>
    %212 = vector.shape_cast %211 : vector<1x1x16x16xf32> to vector<1x16x16xf32>
    %213 = vector.shape_cast %210 : vector<1x16x16xf32> to vector<1x1x16x16xf32>
    tpu.vector_store %arg11[%c7_93, %c0_94, %c0_95, %c0_96], %213 {strides = array<i32>} : memref<9x1x16x16xf32, #tpu.memory_space<vmem>>, vector<1x1x16x16xf32>,
    %214 = arith.addf %192, %210 : vector<1x16x16xf32>
    %c0_97 = arith.constant 0 : index
    %c2_98 = arith.constant 2 : index
    %c2_99 = arith.constant 2 : index
    %215 = vector.load %arg2[%c0_97, %c2_98, %c2_99] : memref<1x18x18xi32, #tpu.memory_space<vmem>>, vector<1x16x16xi32>
    %cst_100 = arith.constant 0.000000e+00 : f32
    %216 = vector.broadcast %cst_100 : f32 to vector<1x16x16xf32>
    %c0_i32_101 = arith.constant 0 : i32
    %217 = vector.broadcast %c0_i32_101 : i32 to vector<1x16x16xi32>
    %218 = arith.cmpi eq, %215, %217 : vector<1x16x16xi32>
    %219 = vector.broadcast %8 : f32 to vector<1x16x16xf32>
    %220 = arith.select %218, %219, %216 : vector<1x16x16xi1>, vector<1x16x16xf32>
    %c1_i32_102 = arith.constant 1 : i32
    %221 = vector.broadcast %c1_i32_102 : i32 to vector<1x16x16xi32>
    %222 = arith.cmpi eq, %215, %221 : vector<1x16x16xi32>
    %223 = vector.broadcast %17 : f32 to vector<1x16x16xf32>
    %224 = arith.select %222, %223, %220 : vector<1x16x16xi1>, vector<1x16x16xf32>
    %c2_i32_103 = arith.constant 2 : i32
    %225 = vector.broadcast %c2_i32_103 : i32 to vector<1x16x16xi32>
    %226 = arith.cmpi eq, %215, %225 : vector<1x16x16xi32>
    %227 = vector.broadcast %26 : f32 to vector<1x16x16xf32>
    %228 = arith.select %226, %227, %224 : vector<1x16x16xi1>, vector<1x16x16xf32>
    %c3_i32_104 = arith.constant 3 : i32
    %229 = vector.broadcast %c3_i32_104 : i32 to vector<1x16x16xi32>
    %230 = arith.cmpi eq, %215, %229 : vector<1x16x16xi32>
    %231 = vector.broadcast %35 : f32 to vector<1x16x16xf32>
    %232 = arith.select %230, %231, %228 : vector<1x16x16xi1>, vector<1x16x16xf32>
    %c8_105 = arith.constant 8 : index
    %c0_106 = arith.constant 0 : index
    %c0_107 = arith.constant 0 : index
    %c0_108 = arith.constant 0 : index
    %233 = vector.load %arg11[%c8_105, %c0_106, %c0_107, %c0_108] : memref<9x1x16x16xf32, #tpu.memory_space<vmem>>, vector<1x1x16x16xf32>
    %234 = vector.shape_cast %233 : vector<1x1x16x16xf32> to vector<1x16x16xf32>
    %235 = vector.shape_cast %232 : vector<1x16x16xf32> to vector<1x1x16x16xf32>
    tpu.vector_store %arg11[%c8_105, %c0_106, %c0_107, %c0_108], %235 {strides = array<i32>} : memref<9x1x16x16xf32, #tpu.memory_space<vmem>>, vector<1x1x16x16xf32>,
    %236 = arith.addf %214, %232 : vector<1x16x16xf32>
    %cst_109 = arith.constant 1.000000e+00 : f32
    %237 = vector.broadcast %cst_109 : f32 to vector<1x16x16xf32>
    %238 = arith.subf %236, %237 : vector<1x16x16xf32>
    %cst_110 = arith.constant 0.000000e+00 : f32
    %239 = vector.broadcast %cst_110 : f32 to vector<1x16x16xf32>
    %240 = arith.maximumf %238, %239 : vector<1x16x16xf32>
    %cst_111 = arith.constant 1.000000e+00 : f32
    %241 = vector.broadcast %cst_111 : f32 to vector<1x16x16xf32>
    %242 = arith.subf %241, %240 : vector<1x16x16xf32>
    %cst_112 = arith.constant 0.000000e+00 : f32
    %243 = vector.broadcast %cst_112 : f32 to vector<1x16x16xf32>
    %244 = arith.maximumf %242, %243 : vector<1x16x16xf32>
    %cst_113 = arith.constant 1.000000e+00 : f32
    %245 = vector.broadcast %cst_113 : f32 to vector<1x16x16xf32>
    %246 = arith.subf %245, %244 : vector<1x16x16xf32>
    %c0_114 = arith.constant 0 : index
    %c0_115 = arith.constant 0 : index
    %c0_116 = arith.constant 0 : index
    %247 = vector.load %arg7[%c0_114, %c0_115, %c0_116] : memref<1x16x16xf32, #tpu.memory_space<vmem>>, vector<1x16x16xf32>
    tpu.vector_store %arg7[%c0_114, %c0_115, %c0_116], %246 {strides = array<i32>} : memref<1x16x16xf32, #tpu.memory_space<vmem>>, vector<1x16x16xf32>,
    %cst_117 = arith.constant 1.000000e+00 : f32
    %248 = vector.broadcast %cst_117 : f32 to vector<1x16x16xf32>
    %249 = arith.subf %248, %236 : vector<1x16x16xf32>
    %cst_118 = arith.constant 0.000000e+00 : f32
    %250 = vector.broadcast %cst_118 : f32 to vector<1x16x16xf32>
    %251 = arith.maximumf %249, %250 : vector<1x16x16xf32>
    %cst_119 = arith.constant 1.000000e+00 : f32
    %252 = vector.broadcast %cst_119 : f32 to vector<1x16x16xf32>
    %253 = arith.subf %252, %251 : vector<1x16x16xf32>
    %c0_120 = arith.constant 0 : index
    %c0_121 = arith.constant 0 : index
    %c0_122 = arith.constant 0 : index
    %c0_123 = arith.constant 0 : index
    %254 = vector.load %arg4[%c0_120, %c0_121, %c0_122, %c0_123] : memref<1x3x16x16xf32, #tpu.memory_space<vmem>>, vector<1x3x16x16xf32>
    %255 = vector.shape_cast %244 : vector<1x16x16xf32> to vector<1x1x16x16xf32>
    %256 = vector.broadcast %255 : vector<1x1x16x16xf32> to vector<1x3x16x16xf32>
    %257 = arith.mulf %254, %256 : vector<1x3x16x16xf32>
    %c0_124 = arith.constant 0 : index
    %c0_125 = arith.constant 0 : index
    %c1_126 = arith.constant 1 : index
    %c1_127 = arith.constant 1 : index
    %258 = vector.load %arg12[%c0_124, %c0_125, %c1_126, %c1_127] : memref<1x3x18x18xf32, #tpu.memory_space<vmem>>, vector<1x3x16x16xf32>
    tpu.vector_store %arg12[%c0_124, %c0_125, %c1_126, %c1_127], %257 {strides = array<i32>} : memref<1x3x18x18xf32, #tpu.memory_space<vmem>>, vector<1x3x16x16xf32>,
    %cst_128 = arith.constant 0.000000e+00 : f32
    %259 = vector.broadcast %cst_128 : f32 to vector<1x3x16x16xf32>
    %c0_129 = arith.constant 0 : index
    %c0_130 = arith.constant 0 : index
    %c0_131 = arith.constant 0 : index
    %c0_132 = arith.constant 0 : index
    %260 = vector.load %arg12[%c0_129, %c0_130, %c0_131, %c0_132] : memref<1x3x18x18xf32, #tpu.memory_space<vmem>>, vector<1x3x16x16xf32>
    %c0_133 = arith.constant 0 : index
    %c0_134 = arith.constant 0 : index
    %c0_135 = arith.constant 0 : index
    %c0_136 = arith.constant 0 : index
    %261 = vector.load %arg11[%c0_133, %c0_134, %c0_135, %c0_136] : memref<9x1x16x16xf32, #tpu.memory_space<vmem>>, vector<1x1x16x16xf32>
    %262 = vector.shape_cast %261 : vector<1x1x16x16xf32> to vector<1x16x16xf32>
    %263 = vector.shape_cast %262 : vector<1x16x16xf32> to vector<1x1x16x16xf32>
    %264 = vector.broadcast %263 : vector<1x1x16x16xf32> to vector<1x3x16x16xf32>
    %265 = arith.mulf %260, %264 : vector<1x3x16x16xf32>
    %266 = arith.addf %259, %265 : vector<1x3x16x16xf32>
    %c0_137 = arith.constant 0 : index
    %c0_138 = arith.constant 0 : index
    %c0_139 = arith.constant 0 : index
    %c1_140 = arith.constant 1 : index
    %267 = vector.load %arg12[%c0_137, %c0_138, %c0_139, %c1_140] : memref<1x3x18x18xf32, #tpu.memory_space<vmem>>, vector<1x3x16x16xf32>
    %c1_141 = arith.constant 1 : index
    %c0_142 = arith.constant 0 : index
    %c0_143 = arith.constant 0 : index
    %c0_144 = arith.constant 0 : index
    %268 = vector.load %arg11[%c1_141, %c0_142, %c0_143, %c0_144] : memref<9x1x16x16xf32, #tpu.memory_space<vmem>>, vector<1x1x16x16xf32>
    %269 = vector.shape_cast %268 : vector<1x1x16x16xf32> to vector<1x16x16xf32>
    %270 = vector.shape_cast %269 : vector<1x16x16xf32> to vector<1x1x16x16xf32>
    %271 = vector.broadcast %270 : vector<1x1x16x16xf32> to vector<1x3x16x16xf32>
    %272 = arith.mulf %267, %271 : vector<1x3x16x16xf32>
    %273 = arith.addf %266, %272 : vector<1x3x16x16xf32>
    %c0_145 = arith.constant 0 : index
    %c0_146 = arith.constant 0 : index
    %c0_147 = arith.constant 0 : index
    %c2_148 = arith.constant 2 : index
    %274 = vector.load %arg12[%c0_145, %c0_146, %c0_147, %c2_148] : memref<1x3x18x18xf32, #tpu.memory_space<vmem>>, vector<1x3x16x16xf32>
    %c2_149 = arith.constant 2 : index
    %c0_150 = arith.constant 0 : index
    %c0_151 = arith.constant 0 : index
    %c0_152 = arith.constant 0 : index
    %275 = vector.load %arg11[%c2_149, %c0_150, %c0_151, %c0_152] : memref<9x1x16x16xf32, #tpu.memory_space<vmem>>, vector<1x1x16x16xf32>
    %276 = vector.shape_cast %275 : vector<1x1x16x16xf32> to vector<1x16x16xf32>
    %277 = vector.shape_cast %276 : vector<1x16x16xf32> to vector<1x1x16x16xf32>
    %278 = vector.broadcast %277 : vector<1x1x16x16xf32> to vector<1x3x16x16xf32>
    %279 = arith.mulf %274, %278 : vector<1x3x16x16xf32>
    %280 = arith.addf %273, %279 : vector<1x3x16x16xf32>
    %c0_153 = arith.constant 0 : index
    %c0_154 = arith.constant 0 : index
    %c1_155 = arith.constant 1 : index
    %c0_156 = arith.constant 0 : index
    %281 = vector.load %arg12[%c0_153, %c0_154, %c1_155, %c0_156] : memref<1x3x18x18xf32, #tpu.memory_space<vmem>>, vector<1x3x16x16xf32>
    %c3_157 = arith.constant 3 : index
    %c0_158 = arith.constant 0 : index
    %c0_159 = arith.constant 0 : index
    %c0_160 = arith.constant 0 : index
    %282 = vector.load %arg11[%c3_157, %c0_158, %c0_159, %c0_160] : memref<9x1x16x16xf32, #tpu.memory_space<vmem>>, vector<1x1x16x16xf32>
    %283 = vector.shape_cast %282 : vector<1x1x16x16xf32> to vector<1x16x16xf32>
    %284 = vector.shape_cast %283 : vector<1x16x16xf32> to vector<1x1x16x16xf32>
    %285 = vector.broadcast %284 : vector<1x1x16x16xf32> to vector<1x3x16x16xf32>
    %286 = arith.mulf %281, %285 : vector<1x3x16x16xf32>
    %287 = arith.addf %280, %286 : vector<1x3x16x16xf32>
    %c0_161 = arith.constant 0 : index
    %c0_162 = arith.constant 0 : index
    %c1_163 = arith.constant 1 : index
    %c1_164 = arith.constant 1 : index
    %288 = vector.load %arg12[%c0_161, %c0_162, %c1_163, %c1_164] : memref<1x3x18x18xf32, #tpu.memory_space<vmem>>, vector<1x3x16x16xf32>
    %c4_165 = arith.constant 4 : index
    %c0_166 = arith.constant 0 : index
    %c0_167 = arith.constant 0 : index
    %c0_168 = arith.constant 0 : index
    %289 = vector.load %arg11[%c4_165, %c0_166, %c0_167, %c0_168] : memref<9x1x16x16xf32, #tpu.memory_space<vmem>>, vector<1x1x16x16xf32>
    %290 = vector.shape_cast %289 : vector<1x1x16x16xf32> to vector<1x16x16xf32>
    %291 = vector.shape_cast %290 : vector<1x16x16xf32> to vector<1x1x16x16xf32>
    %292 = vector.broadcast %291 : vector<1x1x16x16xf32> to vector<1x3x16x16xf32>
    %293 = arith.mulf %288, %292 : vector<1x3x16x16xf32>
    %294 = arith.addf %287, %293 : vector<1x3x16x16xf32>
    %c0_169 = arith.constant 0 : index
    %c0_170 = arith.constant 0 : index
    %c1_171 = arith.constant 1 : index
    %c2_172 = arith.constant 2 : index
    %295 = vector.load %arg12[%c0_169, %c0_170, %c1_171, %c2_172] : memref<1x3x18x18xf32, #tpu.memory_space<vmem>>, vector<1x3x16x16xf32>
    %c5_173 = arith.constant 5 : index
    %c0_174 = arith.constant 0 : index
    %c0_175 = arith.constant 0 : index
    %c0_176 = arith.constant 0 : index
    %296 = vector.load %arg11[%c5_173, %c0_174, %c0_175, %c0_176] : memref<9x1x16x16xf32, #tpu.memory_space<vmem>>, vector<1x1x16x16xf32>
    %297 = vector.shape_cast %296 : vector<1x1x16x16xf32> to vector<1x16x16xf32>
    %298 = vector.shape_cast %297 : vector<1x16x16xf32> to vector<1x1x16x16xf32>
    %299 = vector.broadcast %298 : vector<1x1x16x16xf32> to vector<1x3x16x16xf32>
    %300 = arith.mulf %295, %299 : vector<1x3x16x16xf32>
    %301 = arith.addf %294, %300 : vector<1x3x16x16xf32>
    %c0_177 = arith.constant 0 : index
    %c0_178 = arith.constant 0 : index
    %c2_179 = arith.constant 2 : index
    %c0_180 = arith.constant 0 : index
    %302 = vector.load %arg12[%c0_177, %c0_178, %c2_179, %c0_180] : memref<1x3x18x18xf32, #tpu.memory_space<vmem>>, vector<1x3x16x16xf32>
    %c6_181 = arith.constant 6 : index
    %c0_182 = arith.constant 0 : index
    %c0_183 = arith.constant 0 : index
    %c0_184 = arith.constant 0 : index
    %303 = vector.load %arg11[%c6_181, %c0_182, %c0_183, %c0_184] : memref<9x1x16x16xf32, #tpu.memory_space<vmem>>, vector<1x1x16x16xf32>
    %304 = vector.shape_cast %303 : vector<1x1x16x16xf32> to vector<1x16x16xf32>
    %305 = vector.shape_cast %304 : vector<1x16x16xf32> to vector<1x1x16x16xf32>
    %306 = vector.broadcast %305 : vector<1x1x16x16xf32> to vector<1x3x16x16xf32>
    %307 = arith.mulf %302, %306 : vector<1x3x16x16xf32>
    %308 = arith.addf %301, %307 : vector<1x3x16x16xf32>
    %c0_185 = arith.constant 0 : index
    %c0_186 = arith.constant 0 : index
    %c2_187 = arith.constant 2 : index
    %c1_188 = arith.constant 1 : index
    %309 = vector.load %arg12[%c0_185, %c0_186, %c2_187, %c1_188] : memref<1x3x18x18xf32, #tpu.memory_space<vmem>>, vector<1x3x16x16xf32>
    %c7_189 = arith.constant 7 : index
    %c0_190 = arith.constant 0 : index
    %c0_191 = arith.constant 0 : index
    %c0_192 = arith.constant 0 : index
    %310 = vector.load %arg11[%c7_189, %c0_190, %c0_191, %c0_192] : memref<9x1x16x16xf32, #tpu.memory_space<vmem>>, vector<1x1x16x16xf32>
    %311 = vector.shape_cast %310 : vector<1x1x16x16xf32> to vector<1x16x16xf32>
    %312 = vector.shape_cast %311 : vector<1x16x16xf32> to vector<1x1x16x16xf32>
    %313 = vector.broadcast %312 : vector<1x1x16x16xf32> to vector<1x3x16x16xf32>
    %314 = arith.mulf %309, %313 : vector<1x3x16x16xf32>
    %315 = arith.addf %308, %314 : vector<1x3x16x16xf32>
    %c0_193 = arith.constant 0 : index
    %c0_194 = arith.constant 0 : index
    %c2_195 = arith.constant 2 : index
    %c2_196 = arith.constant 2 : index
    %316 = vector.load %arg12[%c0_193, %c0_194, %c2_195, %c2_196] : memref<1x3x18x18xf32, #tpu.memory_space<vmem>>, vector<1x3x16x16xf32>
    %c8_197 = arith.constant 8 : index
    %c0_198 = arith.constant 0 : index
    %c0_199 = arith.constant 0 : index
    %c0_200 = arith.constant 0 : index
    %317 = vector.load %arg11[%c8_197, %c0_198, %c0_199, %c0_200] : memref<9x1x16x16xf32, #tpu.memory_space<vmem>>, vector<1x1x16x16xf32>
    %318 = vector.shape_cast %317 : vector<1x1x16x16xf32> to vector<1x16x16xf32>
    %319 = vector.shape_cast %318 : vector<1x16x16xf32> to vector<1x1x16x16xf32>
    %320 = vector.broadcast %319 : vector<1x1x16x16xf32> to vector<1x3x16x16xf32>
    %321 = arith.mulf %316, %320 : vector<1x3x16x16xf32>
    %322 = arith.addf %315, %321 : vector<1x3x16x16xf32>
    %c0_201 = arith.constant 0 : index
    %c0_202 = arith.constant 0 : index
    %c0_203 = arith.constant 0 : index
    %c0_204 = arith.constant 0 : index
    %323 = vector.load %arg6[%c0_201, %c0_202, %c0_203, %c0_204] : memref<1x3x16x16xf32, #tpu.memory_space<vmem>>, vector<1x3x16x16xf32>
    tpu.vector_store %arg6[%c0_201, %c0_202, %c0_203, %c0_204], %322 {strides = array<i32>} : memref<1x3x16x16xf32, #tpu.memory_space<vmem>>, vector<1x3x16x16xf32>,
    %cst_205 = arith.constant 0.000000e+00 : f32
    %324 = vector.broadcast %cst_205 : f32 to vector<1x16x16xf32>
    %c0_206 = arith.constant 0 : index
    %c0_207 = arith.constant 0 : index
    %c0_208 = arith.constant 0 : index
    %325 = vector.load %arg3[%c0_206, %c0_207, %c0_208] : memref<1x18x18xi32, #tpu.memory_space<vmem>>, vector<1x16x16xi32>
    %cst_209 = arith.constant 0.000000e+00 : f32
    %326 = vector.broadcast %cst_209 : f32 to vector<1x16x16xf32>
    %c0_i32_210 = arith.constant 0 : i32
    %327 = vector.broadcast %c0_i32_210 : i32 to vector<1x16x16xi32>
    %328 = arith.cmpi eq, %325, %327 : vector<1x16x16xi32>
    %329 = vector.broadcast %0 : f32 to vector<1x16x16xf32>
    %330 = arith.select %328, %329, %326 : vector<1x16x16xi1>, vector<1x16x16xf32>
    %c1_i32_211 = arith.constant 1 : i32
    %331 = vector.broadcast %c1_i32_211 : i32 to vector<1x16x16xi32>
    %332 = arith.cmpi eq, %325, %331 : vector<1x16x16xi32>
    %333 = vector.broadcast %9 : f32 to vector<1x16x16xf32>
    %334 = arith.select %332, %333, %330 : vector<1x16x16xi1>, vector<1x16x16xf32>
    %c2_i32_212 = arith.constant 2 : i32
    %335 = vector.broadcast %c2_i32_212 : i32 to vector<1x16x16xi32>
    %336 = arith.cmpi eq, %325, %335 : vector<1x16x16xi32>
    %337 = vector.broadcast %18 : f32 to vector<1x16x16xf32>
    %338 = arith.select %336, %337, %334 : vector<1x16x16xi1>, vector<1x16x16xf32>
    %c3_i32_213 = arith.constant 3 : i32
    %339 = vector.broadcast %c3_i32_213 : i32 to vector<1x16x16xi32>
    %340 = arith.cmpi eq, %325, %339 : vector<1x16x16xi32>
    %341 = vector.broadcast %27 : f32 to vector<1x16x16xf32>
    %342 = arith.select %340, %341, %338 : vector<1x16x16xi1>, vector<1x16x16xf32>
    %c0_214 = arith.constant 0 : index
    %c0_215 = arith.constant 0 : index
    %c0_216 = arith.constant 0 : index
    %c0_217 = arith.constant 0 : index
    %343 = vector.load %arg11[%c0_214, %c0_215, %c0_216, %c0_217] : memref<9x1x16x16xf32, #tpu.memory_space<vmem>>, vector<1x1x16x16xf32>
    %344 = vector.shape_cast %343 : vector<1x1x16x16xf32> to vector<1x16x16xf32>
    %345 = vector.shape_cast %342 : vector<1x16x16xf32> to vector<1x1x16x16xf32>
    tpu.vector_store %arg11[%c0_214, %c0_215, %c0_216, %c0_217], %345 {strides = array<i32>} : memref<9x1x16x16xf32, #tpu.memory_space<vmem>>, vector<1x1x16x16xf32>,
    %346 = arith.addf %324, %342 : vector<1x16x16xf32>
    %c0_218 = arith.constant 0 : index
    %c0_219 = arith.constant 0 : index
    %c1_220 = arith.constant 1 : index
    %347 = vector.load %arg3[%c0_218, %c0_219, %c1_220] : memref<1x18x18xi32, #tpu.memory_space<vmem>>, vector<1x16x16xi32>
    %cst_221 = arith.constant 0.000000e+00 : f32
    %348 = vector.broadcast %cst_221 : f32 to vector<1x16x16xf32>
    %c0_i32_222 = arith.constant 0 : i32
    %349 = vector.broadcast %c0_i32_222 : i32 to vector<1x16x16xi32>
    %350 = arith.cmpi eq, %347, %349 : vector<1x16x16xi32>
    %351 = vector.broadcast %1 : f32 to vector<1x16x16xf32>
    %352 = arith.select %350, %351, %348 : vector<1x16x16xi1>, vector<1x16x16xf32>
    %c1_i32_223 = arith.constant 1 : i32
    %353 = vector.broadcast %c1_i32_223 : i32 to vector<1x16x16xi32>
    %354 = arith.cmpi eq, %347, %353 : vector<1x16x16xi32>
    %355 = vector.broadcast %10 : f32 to vector<1x16x16xf32>
    %356 = arith.select %354, %355, %352 : vector<1x16x16xi1>, vector<1x16x16xf32>
    %c2_i32_224 = arith.constant 2 : i32
    %357 = vector.broadcast %c2_i32_224 : i32 to vector<1x16x16xi32>
    %358 = arith.cmpi eq, %347, %357 : vector<1x16x16xi32>
    %359 = vector.broadcast %19 : f32 to vector<1x16x16xf32>
    %360 = arith.select %358, %359, %356 : vector<1x16x16xi1>, vector<1x16x16xf32>
    %c3_i32_225 = arith.constant 3 : i32
    %361 = vector.broadcast %c3_i32_225 : i32 to vector<1x16x16xi32>
    %362 = arith.cmpi eq, %347, %361 : vector<1x16x16xi32>
    %363 = vector.broadcast %28 : f32 to vector<1x16x16xf32>
    %364 = arith.select %362, %363, %360 : vector<1x16x16xi1>, vector<1x16x16xf32>
    %c1_226 = arith.constant 1 : index
    %c0_227 = arith.constant 0 : index
    %c0_228 = arith.constant 0 : index
    %c0_229 = arith.constant 0 : index
    %365 = vector.load %arg11[%c1_226, %c0_227, %c0_228, %c0_229] : memref<9x1x16x16xf32, #tpu.memory_space<vmem>>, vector<1x1x16x16xf32>
    %366 = vector.shape_cast %365 : vector<1x1x16x16xf32> to vector<1x16x16xf32>
    %367 = vector.shape_cast %364 : vector<1x16x16xf32> to vector<1x1x16x16xf32>
    tpu.vector_store %arg11[%c1_226, %c0_227, %c0_228, %c0_229], %367 {strides = array<i32>} : memref<9x1x16x16xf32, #tpu.memory_space<vmem>>, vector<1x1x16x16xf32>,
    %368 = arith.addf %346, %364 : vector<1x16x16xf32>
    %c0_230 = arith.constant 0 : index
    %c0_231 = arith.constant 0 : index
    %c2_232 = arith.constant 2 : index
    %369 = vector.load %arg3[%c0_230, %c0_231, %c2_232] : memref<1x18x18xi32, #tpu.memory_space<vmem>>, vector<1x16x16xi32>
    %cst_233 = arith.constant 0.000000e+00 : f32
    %370 = vector.broadcast %cst_233 : f32 to vector<1x16x16xf32>
    %c0_i32_234 = arith.constant 0 : i32
    %371 = vector.broadcast %c0_i32_234 : i32 to vector<1x16x16xi32>
    %372 = arith.cmpi eq, %369, %371 : vector<1x16x16xi32>
    %373 = vector.broadcast %2 : f32 to vector<1x16x16xf32>
    %374 = arith.select %372, %373, %370 : vector<1x16x16xi1>, vector<1x16x16xf32>
    %c1_i32_235 = arith.constant 1 : i32
    %375 = vector.broadcast %c1_i32_235 : i32 to vector<1x16x16xi32>
    %376 = arith.cmpi eq, %369, %375 : vector<1x16x16xi32>
    %377 = vector.broadcast %11 : f32 to vector<1x16x16xf32>
    %378 = arith.select %376, %377, %374 : vector<1x16x16xi1>, vector<1x16x16xf32>
    %c2_i32_236 = arith.constant 2 : i32
    %379 = vector.broadcast %c2_i32_236 : i32 to vector<1x16x16xi32>
    %380 = arith.cmpi eq, %369, %379 : vector<1x16x16xi32>
    %381 = vector.broadcast %20 : f32 to vector<1x16x16xf32>
    %382 = arith.select %380, %381, %378 : vector<1x16x16xi1>, vector<1x16x16xf32>
    %c3_i32_237 = arith.constant 3 : i32
    %383 = vector.broadcast %c3_i32_237 : i32 to vector<1x16x16xi32>
    %384 = arith.cmpi eq, %369, %383 : vector<1x16x16xi32>
    %385 = vector.broadcast %29 : f32 to vector<1x16x16xf32>
    %386 = arith.select %384, %385, %382 : vector<1x16x16xi1>, vector<1x16x16xf32>
    %c2_238 = arith.constant 2 : index
    %c0_239 = arith.constant 0 : index
    %c0_240 = arith.constant 0 : index
    %c0_241 = arith.constant 0 : index
    %387 = vector.load %arg11[%c2_238, %c0_239, %c0_240, %c0_241] : memref<9x1x16x16xf32, #tpu.memory_space<vmem>>, vector<1x1x16x16xf32>
    %388 = vector.shape_cast %387 : vector<1x1x16x16xf32> to vector<1x16x16xf32>
    %389 = vector.shape_cast %386 : vector<1x16x16xf32> to vector<1x1x16x16xf32>
    tpu.vector_store %arg11[%c2_238, %c0_239, %c0_240, %c0_241], %389 {strides = array<i32>} : memref<9x1x16x16xf32, #tpu.memory_space<vmem>>, vector<1x1x16x16xf32>,
    %390 = arith.addf %368, %386 : vector<1x16x16xf32>
    %c0_242 = arith.constant 0 : index
    %c1_243 = arith.constant 1 : index
    %c0_244 = arith.constant 0 : index
    %391 = vector.load %arg3[%c0_242, %c1_243, %c0_244] : memref<1x18x18xi32, #tpu.memory_space<vmem>>, vector<1x16x16xi32>
    %cst_245 = arith.constant 0.000000e+00 : f32
    %392 = vector.broadcast %cst_245 : f32 to vector<1x16x16xf32>
    %c0_i32_246 = arith.constant 0 : i32
    %393 = vector.broadcast %c0_i32_246 : i32 to vector<1x16x16xi32>
    %394 = arith.cmpi eq, %391, %393 : vector<1x16x16xi32>
    %395 = vector.broadcast %3 : f32 to vector<1x16x16xf32>
    %396 = arith.select %394, %395, %392 : vector<1x16x16xi1>, vector<1x16x16xf32>
    %c1_i32_247 = arith.constant 1 : i32
    %397 = vector.broadcast %c1_i32_247 : i32 to vector<1x16x16xi32>
    %398 = arith.cmpi eq, %391, %397 : vector<1x16x16xi32>
    %399 = vector.broadcast %12 : f32 to vector<1x16x16xf32>
    %400 = arith.select %398, %399, %396 : vector<1x16x16xi1>, vector<1x16x16xf32>
    %c2_i32_248 = arith.constant 2 : i32
    %401 = vector.broadcast %c2_i32_248 : i32 to vector<1x16x16xi32>
    %402 = arith.cmpi eq, %391, %401 : vector<1x16x16xi32>
    %403 = vector.broadcast %21 : f32 to vector<1x16x16xf32>
    %404 = arith.select %402, %403, %400 : vector<1x16x16xi1>, vector<1x16x16xf32>
    %c3_i32_249 = arith.constant 3 : i32
    %405 = vector.broadcast %c3_i32_249 : i32 to vector<1x16x16xi32>
    %406 = arith.cmpi eq, %391, %405 : vector<1x16x16xi32>
    %407 = vector.broadcast %30 : f32 to vector<1x16x16xf32>
    %408 = arith.select %406, %407, %404 : vector<1x16x16xi1>, vector<1x16x16xf32>
    %c3_250 = arith.constant 3 : index
    %c0_251 = arith.constant 0 : index
    %c0_252 = arith.constant 0 : index
    %c0_253 = arith.constant 0 : index
    %409 = vector.load %arg11[%c3_250, %c0_251, %c0_252, %c0_253] : memref<9x1x16x16xf32, #tpu.memory_space<vmem>>, vector<1x1x16x16xf32>
    %410 = vector.shape_cast %409 : vector<1x1x16x16xf32> to vector<1x16x16xf32>
    %411 = vector.shape_cast %408 : vector<1x16x16xf32> to vector<1x1x16x16xf32>
    tpu.vector_store %arg11[%c3_250, %c0_251, %c0_252, %c0_253], %411 {strides = array<i32>} : memref<9x1x16x16xf32, #tpu.memory_space<vmem>>, vector<1x1x16x16xf32>,
    %412 = arith.addf %390, %408 : vector<1x16x16xf32>
    %c0_254 = arith.constant 0 : index
    %c1_255 = arith.constant 1 : index
    %c1_256 = arith.constant 1 : index
    %413 = vector.load %arg3[%c0_254, %c1_255, %c1_256] : memref<1x18x18xi32, #tpu.memory_space<vmem>>, vector<1x16x16xi32>
    %cst_257 = arith.constant 0.000000e+00 : f32
    %414 = vector.broadcast %cst_257 : f32 to vector<1x16x16xf32>
    %c0_i32_258 = arith.constant 0 : i32
    %415 = vector.broadcast %c0_i32_258 : i32 to vector<1x16x16xi32>
    %416 = arith.cmpi eq, %413, %415 : vector<1x16x16xi32>
    %417 = vector.broadcast %4 : f32 to vector<1x16x16xf32>
    %418 = arith.select %416, %417, %414 : vector<1x16x16xi1>, vector<1x16x16xf32>
    %c1_i32_259 = arith.constant 1 : i32
    %419 = vector.broadcast %c1_i32_259 : i32 to vector<1x16x16xi32>
    %420 = arith.cmpi eq, %413, %419 : vector<1x16x16xi32>
    %421 = vector.broadcast %13 : f32 to vector<1x16x16xf32>
    %422 = arith.select %420, %421, %418 : vector<1x16x16xi1>, vector<1x16x16xf32>
    %c2_i32_260 = arith.constant 2 : i32
    %423 = vector.broadcast %c2_i32_260 : i32 to vector<1x16x16xi32>
    %424 = arith.cmpi eq, %413, %423 : vector<1x16x16xi32>
    %425 = vector.broadcast %22 : f32 to vector<1x16x16xf32>
    %426 = arith.select %424, %425, %422 : vector<1x16x16xi1>, vector<1x16x16xf32>
    %c3_i32_261 = arith.constant 3 : i32
    %427 = vector.broadcast %c3_i32_261 : i32 to vector<1x16x16xi32>
    %428 = arith.cmpi eq, %413, %427 : vector<1x16x16xi32>
    %429 = vector.broadcast %31 : f32 to vector<1x16x16xf32>
    %430 = arith.select %428, %429, %426 : vector<1x16x16xi1>, vector<1x16x16xf32>
    %c4_262 = arith.constant 4 : index
    %c0_263 = arith.constant 0 : index
    %c0_264 = arith.constant 0 : index
    %c0_265 = arith.constant 0 : index
    %431 = vector.load %arg11[%c4_262, %c0_263, %c0_264, %c0_265] : memref<9x1x16x16xf32, #tpu.memory_space<vmem>>, vector<1x1x16x16xf32>
    %432 = vector.shape_cast %431 : vector<1x1x16x16xf32> to vector<1x16x16xf32>
    %433 = vector.shape_cast %430 : vector<1x16x16xf32> to vector<1x1x16x16xf32>
    tpu.vector_store %arg11[%c4_262, %c0_263, %c0_264, %c0_265], %433 {strides = array<i32>} : memref<9x1x16x16xf32, #tpu.memory_space<vmem>>, vector<1x1x16x16xf32>,
    %434 = arith.addf %412, %430 : vector<1x16x16xf32>
    %c0_266 = arith.constant 0 : index
    %c1_267 = arith.constant 1 : index
    %c2_268 = arith.constant 2 : index
    %435 = vector.load %arg3[%c0_266, %c1_267, %c2_268] : memref<1x18x18xi32, #tpu.memory_space<vmem>>, vector<1x16x16xi32>
    %cst_269 = arith.constant 0.000000e+00 : f32
    %436 = vector.broadcast %cst_269 : f32 to vector<1x16x16xf32>
    %c0_i32_270 = arith.constant 0 : i32
    %437 = vector.broadcast %c0_i32_270 : i32 to vector<1x16x16xi32>
    %438 = arith.cmpi eq, %435, %437 : vector<1x16x16xi32>
    %439 = vector.broadcast %5 : f32 to vector<1x16x16xf32>
    %440 = arith.select %438, %439, %436 : vector<1x16x16xi1>, vector<1x16x16xf32>
    %c1_i32_271 = arith.constant 1 : i32
    %441 = vector.broadcast %c1_i32_271 : i32 to vector<1x16x16xi32>
    %442 = arith.cmpi eq, %435, %441 : vector<1x16x16xi32>
    %443 = vector.broadcast %14 : f32 to vector<1x16x16xf32>
    %444 = arith.select %442, %443, %440 : vector<1x16x16xi1>, vector<1x16x16xf32>
    %c2_i32_272 = arith.constant 2 : i32
    %445 = vector.broadcast %c2_i32_272 : i32 to vector<1x16x16xi32>
    %446 = arith.cmpi eq, %435, %445 : vector<1x16x16xi32>
    %447 = vector.broadcast %23 : f32 to vector<1x16x16xf32>
    %448 = arith.select %446, %447, %444 : vector<1x16x16xi1>, vector<1x16x16xf32>
    %c3_i32_273 = arith.constant 3 : i32
    %449 = vector.broadcast %c3_i32_273 : i32 to vector<1x16x16xi32>
    %450 = arith.cmpi eq, %435, %449 : vector<1x16x16xi32>
    %451 = vector.broadcast %32 : f32 to vector<1x16x16xf32>
    %452 = arith.select %450, %451, %448 : vector<1x16x16xi1>, vector<1x16x16xf32>
    %c5_274 = arith.constant 5 : index
    %c0_275 = arith.constant 0 : index
    %c0_276 = arith.constant 0 : index
    %c0_277 = arith.constant 0 : index
    %453 = vector.load %arg11[%c5_274, %c0_275, %c0_276, %c0_277] : memref<9x1x16x16xf32, #tpu.memory_space<vmem>>, vector<1x1x16x16xf32>
    %454 = vector.shape_cast %453 : vector<1x1x16x16xf32> to vector<1x16x16xf32>
    %455 = vector.shape_cast %452 : vector<1x16x16xf32> to vector<1x1x16x16xf32>
    tpu.vector_store %arg11[%c5_274, %c0_275, %c0_276, %c0_277], %455 {strides = array<i32>} : memref<9x1x16x16xf32, #tpu.memory_space<vmem>>, vector<1x1x16x16xf32>,
    %456 = arith.addf %434, %452 : vector<1x16x16xf32>
    %c0_278 = arith.constant 0 : index
    %c2_279 = arith.constant 2 : index
    %c0_280 = arith.constant 0 : index
    %457 = vector.load %arg3[%c0_278, %c2_279, %c0_280] : memref<1x18x18xi32, #tpu.memory_space<vmem>>, vector<1x16x16xi32>
    %cst_281 = arith.constant 0.000000e+00 : f32
    %458 = vector.broadcast %cst_281 : f32 to vector<1x16x16xf32>
    %c0_i32_282 = arith.constant 0 : i32
    %459 = vector.broadcast %c0_i32_282 : i32 to vector<1x16x16xi32>
    %460 = arith.cmpi eq, %457, %459 : vector<1x16x16xi32>
    %461 = vector.broadcast %6 : f32 to vector<1x16x16xf32>
    %462 = arith.select %460, %461, %458 : vector<1x16x16xi1>, vector<1x16x16xf32>
    %c1_i32_283 = arith.constant 1 : i32
    %463 = vector.broadcast %c1_i32_283 : i32 to vector<1x16x16xi32>
    %464 = arith.cmpi eq, %457, %463 : vector<1x16x16xi32>
    %465 = vector.broadcast %15 : f32 to vector<1x16x16xf32>
    %466 = arith.select %464, %465, %462 : vector<1x16x16xi1>, vector<1x16x16xf32>
    %c2_i32_284 = arith.constant 2 : i32
    %467 = vector.broadcast %c2_i32_284 : i32 to vector<1x16x16xi32>
    %468 = arith.cmpi eq, %457, %467 : vector<1x16x16xi32>
    %469 = vector.broadcast %24 : f32 to vector<1x16x16xf32>
    %470 = arith.select %468, %469, %466 : vector<1x16x16xi1>, vector<1x16x16xf32>
    %c3_i32_285 = arith.constant 3 : i32
    %471 = vector.broadcast %c3_i32_285 : i32 to vector<1x16x16xi32>
    %472 = arith.cmpi eq, %457, %471 : vector<1x16x16xi32>
    %473 = vector.broadcast %33 : f32 to vector<1x16x16xf32>
    %474 = arith.select %472, %473, %470 : vector<1x16x16xi1>, vector<1x16x16xf32>
    %c6_286 = arith.constant 6 : index
    %c0_287 = arith.constant 0 : index
    %c0_288 = arith.constant 0 : index
    %c0_289 = arith.constant 0 : index
    %475 = vector.load %arg11[%c6_286, %c0_287, %c0_288, %c0_289] : memref<9x1x16x16xf32, #tpu.memory_space<vmem>>, vector<1x1x16x16xf32>
    %476 = vector.shape_cast %475 : vector<1x1x16x16xf32> to vector<1x16x16xf32>
    %477 = vector.shape_cast %474 : vector<1x16x16xf32> to vector<1x1x16x16xf32>
    tpu.vector_store %arg11[%c6_286, %c0_287, %c0_288, %c0_289], %477 {strides = array<i32>} : memref<9x1x16x16xf32, #tpu.memory_space<vmem>>, vector<1x1x16x16xf32>,
    %478 = arith.addf %456, %474 : vector<1x16x16xf32>
    %c0_290 = arith.constant 0 : index
    %c2_291 = arith.constant 2 : index
    %c1_292 = arith.constant 1 : index
    %479 = vector.load %arg3[%c0_290, %c2_291, %c1_292] : memref<1x18x18xi32, #tpu.memory_space<vmem>>, vector<1x16x16xi32>
    %cst_293 = arith.constant 0.000000e+00 : f32
    %480 = vector.broadcast %cst_293 : f32 to vector<1x16x16xf32>
    %c0_i32_294 = arith.constant 0 : i32
    %481 = vector.broadcast %c0_i32_294 : i32 to vector<1x16x16xi32>
    %482 = arith.cmpi eq, %479, %481 : vector<1x16x16xi32>
    %483 = vector.broadcast %7 : f32 to vector<1x16x16xf32>
    %484 = arith.select %482, %483, %480 : vector<1x16x16xi1>, vector<1x16x16xf32>
    %c1_i32_295 = arith.constant 1 : i32
    %485 = vector.broadcast %c1_i32_295 : i32 to vector<1x16x16xi32>
    %486 = arith.cmpi eq, %479, %485 : vector<1x16x16xi32>
    %487 = vector.broadcast %16 : f32 to vector<1x16x16xf32>
    %488 = arith.select %486, %487, %484 : vector<1x16x16xi1>, vector<1x16x16xf32>
    %c2_i32_296 = arith.constant 2 : i32
    %489 = vector.broadcast %c2_i32_296 : i32 to vector<1x16x16xi32>
    %490 = arith.cmpi eq, %479, %489 : vector<1x16x16xi32>
    %491 = vector.broadcast %25 : f32 to vector<1x16x16xf32>
    %492 = arith.select %490, %491, %488 : vector<1x16x16xi1>, vector<1x16x16xf32>
    %c3_i32_297 = arith.constant 3 : i32
    %493 = vector.broadcast %c3_i32_297 : i32 to vector<1x16x16xi32>
    %494 = arith.cmpi eq, %479, %493 : vector<1x16x16xi32>
    %495 = vector.broadcast %34 : f32 to vector<1x16x16xf32>
    %496 = arith.select %494, %495, %492 : vector<1x16x16xi1>, vector<1x16x16xf32>
    %c7_298 = arith.constant 7 : index
    %c0_299 = arith.constant 0 : index
    %c0_300 = arith.constant 0 : index
    %c0_301 = arith.constant 0 : index
    %497 = vector.load %arg11[%c7_298, %c0_299, %c0_300, %c0_301] : memref<9x1x16x16xf32, #tpu.memory_space<vmem>>, vector<1x1x16x16xf32>
    %498 = vector.shape_cast %497 : vector<1x1x16x16xf32> to vector<1x16x16xf32>
    %499 = vector.shape_cast %496 : vector<1x16x16xf32> to vector<1x1x16x16xf32>
    tpu.vector_store %arg11[%c7_298, %c0_299, %c0_300, %c0_301], %499 {strides = array<i32>} : memref<9x1x16x16xf32, #tpu.memory_space<vmem>>, vector<1x1x16x16xf32>,
    %500 = arith.addf %478, %496 : vector<1x16x16xf32>
    %c0_302 = arith.constant 0 : index
    %c2_303 = arith.constant 2 : index
    %c2_304 = arith.constant 2 : index
    %501 = vector.load %arg3[%c0_302, %c2_303, %c2_304] : memref<1x18x18xi32, #tpu.memory_space<vmem>>, vector<1x16x16xi32>
    %cst_305 = arith.constant 0.000000e+00 : f32
    %502 = vector.broadcast %cst_305 : f32 to vector<1x16x16xf32>
    %c0_i32_306 = arith.constant 0 : i32
    %503 = vector.broadcast %c0_i32_306 : i32 to vector<1x16x16xi32>
    %504 = arith.cmpi eq, %501, %503 : vector<1x16x16xi32>
    %505 = vector.broadcast %8 : f32 to vector<1x16x16xf32>
    %506 = arith.select %504, %505, %502 : vector<1x16x16xi1>, vector<1x16x16xf32>
    %c1_i32_307 = arith.constant 1 : i32
    %507 = vector.broadcast %c1_i32_307 : i32 to vector<1x16x16xi32>
    %508 = arith.cmpi eq, %501, %507 : vector<1x16x16xi32>
    %509 = vector.broadcast %17 : f32 to vector<1x16x16xf32>
    %510 = arith.select %508, %509, %506 : vector<1x16x16xi1>, vector<1x16x16xf32>
    %c2_i32_308 = arith.constant 2 : i32
    %511 = vector.broadcast %c2_i32_308 : i32 to vector<1x16x16xi32>
    %512 = arith.cmpi eq, %501, %511 : vector<1x16x16xi32>
    %513 = vector.broadcast %26 : f32 to vector<1x16x16xf32>
    %514 = arith.select %512, %513, %510 : vector<1x16x16xi1>, vector<1x16x16xf32>
    %c3_i32_309 = arith.constant 3 : i32
    %515 = vector.broadcast %c3_i32_309 : i32 to vector<1x16x16xi32>
    %516 = arith.cmpi eq, %501, %515 : vector<1x16x16xi32>
    %517 = vector.broadcast %35 : f32 to vector<1x16x16xf32>
    %518 = arith.select %516, %517, %514 : vector<1x16x16xi1>, vector<1x16x16xf32>
    %c8_310 = arith.constant 8 : index
    %c0_311 = arith.constant 0 : index
    %c0_312 = arith.constant 0 : index
    %c0_313 = arith.constant 0 : index
    %519 = vector.load %arg11[%c8_310, %c0_311, %c0_312, %c0_313] : memref<9x1x16x16xf32, #tpu.memory_space<vmem>>, vector<1x1x16x16xf32>
    %520 = vector.shape_cast %519 : vector<1x1x16x16xf32> to vector<1x16x16xf32>
    %521 = vector.shape_cast %518 : vector<1x16x16xf32> to vector<1x1x16x16xf32>
    tpu.vector_store %arg11[%c8_310, %c0_311, %c0_312, %c0_313], %521 {strides = array<i32>} : memref<9x1x16x16xf32, #tpu.memory_space<vmem>>, vector<1x1x16x16xf32>,
    %522 = arith.addf %500, %518 : vector<1x16x16xf32>
    %cst_314 = arith.constant 1.000000e+00 : f32
    %523 = vector.broadcast %cst_314 : f32 to vector<1x16x16xf32>
    %524 = arith.subf %522, %523 : vector<1x16x16xf32>
    %cst_315 = arith.constant 0.000000e+00 : f32
    %525 = vector.broadcast %cst_315 : f32 to vector<1x16x16xf32>
    %526 = arith.maximumf %524, %525 : vector<1x16x16xf32>
    %cst_316 = arith.constant 1.000000e+00 : f32
    %527 = vector.broadcast %cst_316 : f32 to vector<1x16x16xf32>
    %528 = arith.subf %527, %526 : vector<1x16x16xf32>
    %cst_317 = arith.constant 0.000000e+00 : f32
    %529 = vector.broadcast %cst_317 : f32 to vector<1x16x16xf32>
    %530 = arith.maximumf %528, %529 : vector<1x16x16xf32>
    %cst_318 = arith.constant 1.000000e+00 : f32
    %531 = vector.broadcast %cst_318 : f32 to vector<1x16x16xf32>
    %532 = arith.subf %531, %530 : vector<1x16x16xf32>
    %c0_319 = arith.constant 0 : index
    %c0_320 = arith.constant 0 : index
    %c0_321 = arith.constant 0 : index
    %533 = vector.load %arg8[%c0_319, %c0_320, %c0_321] : memref<1x16x16xf32, #tpu.memory_space<vmem>>, vector<1x16x16xf32>
    tpu.vector_store %arg8[%c0_319, %c0_320, %c0_321], %532 {strides = array<i32>} : memref<1x16x16xf32, #tpu.memory_space<vmem>>, vector<1x16x16xf32>,
    %cst_322 = arith.constant 1.000000e+00 : f32
    %534 = vector.broadcast %cst_322 : f32 to vector<1x16x16xf32>
    %535 = arith.subf %534, %522 : vector<1x16x16xf32>
    %cst_323 = arith.constant 0.000000e+00 : f32
    %536 = vector.broadcast %cst_323 : f32 to vector<1x16x16xf32>
    %537 = arith.maximumf %535, %536 : vector<1x16x16xf32>
    %cst_324 = arith.constant 1.000000e+00 : f32
    %538 = vector.broadcast %cst_324 : f32 to vector<1x16x16xf32>
    %539 = arith.subf %538, %537 : vector<1x16x16xf32>
    %c0_325 = arith.constant 0 : index
    %c0_326 = arith.constant 0 : index
    %c0_327 = arith.constant 0 : index
    %c0_328 = arith.constant 0 : index
    %540 = vector.load %arg5[%c0_325, %c0_326, %c0_327, %c0_328] : memref<1x3x16x16xf32, #tpu.memory_space<vmem>>, vector<1x3x16x16xf32>
    %541 = vector.shape_cast %530 : vector<1x16x16xf32> to vector<1x1x16x16xf32>
    %542 = vector.broadcast %541 : vector<1x1x16x16xf32> to vector<1x3x16x16xf32>
    %543 = arith.mulf %540, %542 : vector<1x3x16x16xf32>
    %c0_329 = arith.constant 0 : index
    %c0_330 = arith.constant 0 : index
    %c1_331 = arith.constant 1 : index
    %c1_332 = arith.constant 1 : index
    %544 = vector.load %arg12[%c0_329, %c0_330, %c1_331, %c1_332] : memref<1x3x18x18xf32, #tpu.memory_space<vmem>>, vector<1x3x16x16xf32>
    tpu.vector_store %arg12[%c0_329, %c0_330, %c1_331, %c1_332], %543 {strides = array<i32>} : memref<1x3x18x18xf32, #tpu.memory_space<vmem>>, vector<1x3x16x16xf32>,
    %cst_333 = arith.constant 0.000000e+00 : f32
    %545 = vector.broadcast %cst_333 : f32 to vector<1x3x16x16xf32>
    %c0_334 = arith.constant 0 : index
    %c0_335 = arith.constant 0 : index
    %c0_336 = arith.constant 0 : index
    %c0_337 = arith.constant 0 : index
    %546 = vector.load %arg12[%c0_334, %c0_335, %c0_336, %c0_337] : memref<1x3x18x18xf32, #tpu.memory_space<vmem>>, vector<1x3x16x16xf32>
    %c0_338 = arith.constant 0 : index
    %c0_339 = arith.constant 0 : index
    %c0_340 = arith.constant 0 : index
    %c0_341 = arith.constant 0 : index
    %547 = vector.load %arg11[%c0_338, %c0_339, %c0_340, %c0_341] : memref<9x1x16x16xf32, #tpu.memory_space<vmem>>, vector<1x1x16x16xf32>
    %548 = vector.shape_cast %547 : vector<1x1x16x16xf32> to vector<1x16x16xf32>
    %549 = vector.shape_cast %548 : vector<1x16x16xf32> to vector<1x1x16x16xf32>
    %550 = vector.broadcast %549 : vector<1x1x16x16xf32> to vector<1x3x16x16xf32>
    %551 = arith.mulf %546, %550 : vector<1x3x16x16xf32>
    %552 = arith.addf %545, %551 : vector<1x3x16x16xf32>
    %c0_342 = arith.constant 0 : index
    %c0_343 = arith.constant 0 : index
    %c0_344 = arith.constant 0 : index
    %c1_345 = arith.constant 1 : index
    %553 = vector.load %arg12[%c0_342, %c0_343, %c0_344, %c1_345] : memref<1x3x18x18xf32, #tpu.memory_space<vmem>>, vector<1x3x16x16xf32>
    %c1_346 = arith.constant 1 : index
    %c0_347 = arith.constant 0 : index
    %c0_348 = arith.constant 0 : index
    %c0_349 = arith.constant 0 : index
    %554 = vector.load %arg11[%c1_346, %c0_347, %c0_348, %c0_349] : memref<9x1x16x16xf32, #tpu.memory_space<vmem>>, vector<1x1x16x16xf32>
    %555 = vector.shape_cast %554 : vector<1x1x16x16xf32> to vector<1x16x16xf32>
    %556 = vector.shape_cast %555 : vector<1x16x16xf32> to vector<1x1x16x16xf32>
    %557 = vector.broadcast %556 : vector<1x1x16x16xf32> to vector<1x3x16x16xf32>
    %558 = arith.mulf %553, %557 : vector<1x3x16x16xf32>
    %559 = arith.addf %552, %558 : vector<1x3x16x16xf32>
    %c0_350 = arith.constant 0 : index
    %c0_351 = arith.constant 0 : index
    %c0_352 = arith.constant 0 : index
    %c2_353 = arith.constant 2 : index
    %560 = vector.load %arg12[%c0_350, %c0_351, %c0_352, %c2_353] : memref<1x3x18x18xf32, #tpu.memory_space<vmem>>, vector<1x3x16x16xf32>
    %c2_354 = arith.constant 2 : index
    %c0_355 = arith.constant 0 : index
    %c0_356 = arith.constant 0 : index
    %c0_357 = arith.constant 0 : index
    %561 = vector.load %arg11[%c2_354, %c0_355, %c0_356, %c0_357] : memref<9x1x16x16xf32, #tpu.memory_space<vmem>>, vector<1x1x16x16xf32>
    %562 = vector.shape_cast %561 : vector<1x1x16x16xf32> to vector<1x16x16xf32>
    %563 = vector.shape_cast %562 : vector<1x16x16xf32> to vector<1x1x16x16xf32>
    %564 = vector.broadcast %563 : vector<1x1x16x16xf32> to vector<1x3x16x16xf32>
    %565 = arith.mulf %560, %564 : vector<1x3x16x16xf32>
    %566 = arith.addf %559, %565 : vector<1x3x16x16xf32>
    %c0_358 = arith.constant 0 : index
    %c0_359 = arith.constant 0 : index
    %c1_360 = arith.constant 1 : index
    %c0_361 = arith.constant 0 : index
    %567 = vector.load %arg12[%c0_358, %c0_359, %c1_360, %c0_361] : memref<1x3x18x18xf32, #tpu.memory_space<vmem>>, vector<1x3x16x16xf32>
    %c3_362 = arith.constant 3 : index
    %c0_363 = arith.constant 0 : index
    %c0_364 = arith.constant 0 : index
    %c0_365 = arith.constant 0 : index
    %568 = vector.load %arg11[%c3_362, %c0_363, %c0_364, %c0_365] : memref<9x1x16x16xf32, #tpu.memory_space<vmem>>, vector<1x1x16x16xf32>
    %569 = vector.shape_cast %568 : vector<1x1x16x16xf32> to vector<1x16x16xf32>
    %570 = vector.shape_cast %569 : vector<1x16x16xf32> to vector<1x1x16x16xf32>
    %571 = vector.broadcast %570 : vector<1x1x16x16xf32> to vector<1x3x16x16xf32>
    %572 = arith.mulf %567, %571 : vector<1x3x16x16xf32>
    %573 = arith.addf %566, %572 : vector<1x3x16x16xf32>
    %c0_366 = arith.constant 0 : index
    %c0_367 = arith.constant 0 : index
    %c1_368 = arith.constant 1 : index
    %c1_369 = arith.constant 1 : index
    %574 = vector.load %arg12[%c0_366, %c0_367, %c1_368, %c1_369] : memref<1x3x18x18xf32, #tpu.memory_space<vmem>>, vector<1x3x16x16xf32>
    %c4_370 = arith.constant 4 : index
    %c0_371 = arith.constant 0 : index
    %c0_372 = arith.constant 0 : index
    %c0_373 = arith.constant 0 : index
    %575 = vector.load %arg11[%c4_370, %c0_371, %c0_372, %c0_373] : memref<9x1x16x16xf32, #tpu.memory_space<vmem>>, vector<1x1x16x16xf32>
    %576 = vector.shape_cast %575 : vector<1x1x16x16xf32> to vector<1x16x16xf32>
    %577 = vector.shape_cast %576 : vector<1x16x16xf32> to vector<1x1x16x16xf32>
    %578 = vector.broadcast %577 : vector<1x1x16x16xf32> to vector<1x3x16x16xf32>
    %579 = arith.mulf %574, %578 : vector<1x3x16x16xf32>
    %580 = arith.addf %573, %579 : vector<1x3x16x16xf32>
    %c0_374 = arith.constant 0 : index
    %c0_375 = arith.constant 0 : index
    %c1_376 = arith.constant 1 : index
    %c2_377 = arith.constant 2 : index
    %581 = vector.load %arg12[%c0_374, %c0_375, %c1_376, %c2_377] : memref<1x3x18x18xf32, #tpu.memory_space<vmem>>, vector<1x3x16x16xf32>
    %c5_378 = arith.constant 5 : index
    %c0_379 = arith.constant 0 : index
    %c0_380 = arith.constant 0 : index
    %c0_381 = arith.constant 0 : index
    %582 = vector.load %arg11[%c5_378, %c0_379, %c0_380, %c0_381] : memref<9x1x16x16xf32, #tpu.memory_space<vmem>>, vector<1x1x16x16xf32>
    %583 = vector.shape_cast %582 : vector<1x1x16x16xf32> to vector<1x16x16xf32>
    %584 = vector.shape_cast %583 : vector<1x16x16xf32> to vector<1x1x16x16xf32>
    %585 = vector.broadcast %584 : vector<1x1x16x16xf32> to vector<1x3x16x16xf32>
    %586 = arith.mulf %581, %585 : vector<1x3x16x16xf32>
    %587 = arith.addf %580, %586 : vector<1x3x16x16xf32>
    %c0_382 = arith.constant 0 : index
    %c0_383 = arith.constant 0 : index
    %c2_384 = arith.constant 2 : index
    %c0_385 = arith.constant 0 : index
    %588 = vector.load %arg12[%c0_382, %c0_383, %c2_384, %c0_385] : memref<1x3x18x18xf32, #tpu.memory_space<vmem>>, vector<1x3x16x16xf32>
    %c6_386 = arith.constant 6 : index
    %c0_387 = arith.constant 0 : index
    %c0_388 = arith.constant 0 : index
    %c0_389 = arith.constant 0 : index
    %589 = vector.load %arg11[%c6_386, %c0_387, %c0_388, %c0_389] : memref<9x1x16x16xf32, #tpu.memory_space<vmem>>, vector<1x1x16x16xf32>
    %590 = vector.shape_cast %589 : vector<1x1x16x16xf32> to vector<1x16x16xf32>
    %591 = vector.shape_cast %590 : vector<1x16x16xf32> to vector<1x1x16x16xf32>
    %592 = vector.broadcast %591 : vector<1x1x16x16xf32> to vector<1x3x16x16xf32>
    %593 = arith.mulf %588, %592 : vector<1x3x16x16xf32>
    %594 = arith.addf %587, %593 : vector<1x3x16x16xf32>
    %c0_390 = arith.constant 0 : index
    %c0_391 = arith.constant 0 : index
    %c2_392 = arith.constant 2 : index
    %c1_393 = arith.constant 1 : index
    %595 = vector.load %arg12[%c0_390, %c0_391, %c2_392, %c1_393] : memref<1x3x18x18xf32, #tpu.memory_space<vmem>>, vector<1x3x16x16xf32>
    %c7_394 = arith.constant 7 : index
    %c0_395 = arith.constant 0 : index
    %c0_396 = arith.constant 0 : index
    %c0_397 = arith.constant 0 : index
    %596 = vector.load %arg11[%c7_394, %c0_395, %c0_396, %c0_397] : memref<9x1x16x16xf32, #tpu.memory_space<vmem>>, vector<1x1x16x16xf32>
    %597 = vector.shape_cast %596 : vector<1x1x16x16xf32> to vector<1x16x16xf32>
    %598 = vector.shape_cast %597 : vector<1x16x16xf32> to vector<1x1x16x16xf32>
    %599 = vector.broadcast %598 : vector<1x1x16x16xf32> to vector<1x3x16x16xf32>
    %600 = arith.mulf %595, %599 : vector<1x3x16x16xf32>
    %601 = arith.addf %594, %600 : vector<1x3x16x16xf32>
    %c0_398 = arith.constant 0 : index
    %c0_399 = arith.constant 0 : index
    %c2_400 = arith.constant 2 : index
    %c2_401 = arith.constant 2 : index
    %602 = vector.load %arg12[%c0_398, %c0_399, %c2_400, %c2_401] : memref<1x3x18x18xf32, #tpu.memory_space<vmem>>, vector<1x3x16x16xf32>
    %c8_402 = arith.constant 8 : index
    %c0_403 = arith.constant 0 : index
    %c0_404 = arith.constant 0 : index
    %c0_405 = arith.constant 0 : index
    %603 = vector.load %arg11[%c8_402, %c0_403, %c0_404, %c0_405] : memref<9x1x16x16xf32, #tpu.memory_space<vmem>>, vector<1x1x16x16xf32>
    %604 = vector.shape_cast %603 : vector<1x1x16x16xf32> to vector<1x16x16xf32>
    %605 = vector.shape_cast %604 : vector<1x16x16xf32> to vector<1x1x16x16xf32>
    %606 = vector.broadcast %605 : vector<1x1x16x16xf32> to vector<1x3x16x16xf32>
    %607 = arith.mulf %602, %606 : vector<1x3x16x16xf32>
    %608 = arith.addf %601, %607 : vector<1x3x16x16xf32>
    %cst_406 = arith.constant 9.99999974E-6 : f32
    %609 = vector.broadcast %cst_406 : f32 to vector<1x16x16xf32>
    %610 = arith.addf %253, %609 : vector<1x16x16xf32>
    %611 = arith.addf %253, %539 : vector<1x16x16xf32>
    %cst_407 = arith.constant 2.000000e-05 : f32
    %612 = vector.broadcast %cst_407 : f32 to vector<1x16x16xf32>
    %613 = arith.addf %611, %612 : vector<1x16x16xf32>
    %614 = arith.divf %610, %613 : vector<1x16x16xf32>
    %c0_408 = arith.constant 0 : index
    %c0_409 = arith.constant 0 : index
    %c0_410 = arith.constant 0 : index
    %615 = vector.load %arg9[%c0_408, %c0_409, %c0_410] : memref<1x16x16xf32, #tpu.memory_space<vmem>>, vector<1x16x16xf32>
    tpu.vector_store %arg9[%c0_408, %c0_409, %c0_410], %614 {strides = array<i32>} : memref<1x16x16xf32, #tpu.memory_space<vmem>>, vector<1x16x16xf32>,
    %cst_411 = arith.constant 1.000000e+00 : f32
    %616 = vector.broadcast %cst_411 : f32 to vector<1x16x16xf32>
    %617 = arith.subf %616, %614 : vector<1x16x16xf32>
    %c0_412 = arith.constant 0 : index
    %c0_413 = arith.constant 0 : index
    %c0_414 = arith.constant 0 : index
    %618 = vector.load %arg10[%c0_412, %c0_413, %c0_414] : memref<1x16x16xf32, #tpu.memory_space<vmem>>, vector<1x16x16xf32>
    tpu.vector_store %arg10[%c0_412, %c0_413, %c0_414], %617 {strides = array<i32>} : memref<1x16x16xf32, #tpu.memory_space<vmem>>, vector<1x16x16xf32>,
    %619 = vector.shape_cast %614 : vector<1x16x16xf32> to vector<1x1x16x16xf32>
    %c0_415 = arith.constant 0 : index
    %c0_416 = arith.constant 0 : index
    %c0_417 = arith.constant 0 : index
    %c0_418 = arith.constant 0 : index
    %620 = vector.load %arg6[%c0_415, %c0_416, %c0_417, %c0_418] : memref<1x3x16x16xf32, #tpu.memory_space<vmem>>, vector<1x3x16x16xf32>
    %621 = vector.broadcast %619 : vector<1x1x16x16xf32> to vector<1x3x16x16xf32>
    %622 = arith.mulf %621, %620 : vector<1x3x16x16xf32>
    %623 = vector.shape_cast %617 : vector<1x16x16xf32> to vector<1x1x16x16xf32>
    %624 = vector.broadcast %623 : vector<1x1x16x16xf32> to vector<1x3x16x16xf32>
    %625 = arith.mulf %624, %608 : vector<1x3x16x16xf32>
    %626 = arith.addf %622, %625 : vector<1x3x16x16xf32>
    %c0_419 = arith.constant 0 : index
    %c0_420 = arith.constant 0 : index
    %c0_421 = arith.constant 0 : index
    %c0_422 = arith.constant 0 : index
    %627 = vector.load %arg6[%c0_419, %c0_420, %c0_421, %c0_422] : memref<1x3x16x16xf32, #tpu.memory_space<vmem>>, vector<1x3x16x16xf32>
    tpu.vector_store %arg6[%c0_419, %c0_420, %c0_421, %c0_422], %626 {strides = array<i32>} : memref<1x3x16x16xf32, #tpu.memory_space<vmem>>, vector<1x3x16x16xf32>,
    return
  }
  func.func @transform_0(%arg0: i32) -> i32 {
    %c0_i32 = arith.constant 0 : i32
    %c0_i32_0 = arith.constant 0 : i32
    return %c0_i32 : i32
  }
  func.func @transform_1(%arg0: i32) -> (i32, i32, i32) {
    %c0_i32 = arith.constant 0 : i32
    %c0_i32_0 = arith.constant 0 : i32
    %c0_i32_1 = arith.constant 0 : i32
    return %arg0, %c0_i32, %c0_i32_0 : i32, i32, i32
  }
  func.func @transform_2(%arg0: i32) -> (i32, i32, i32) {
    %c0_i32 = arith.constant 0 : i32
    %c0_i32_0 = arith.constant 0 : i32
    %c0_i32_1 = arith.constant 0 : i32
    return %arg0, %c0_i32, %c0_i32_0 : i32, i32, i32
  }
  func.func @transform_3(%arg0: i32) -> (i32, i32, i32, i32) {
    %c0_i32 = arith.constant 0 : i32
    %c0_i32_0 = arith.constant 0 : i32
    %c0_i32_1 = arith.constant 0 : i32
    %c0_i32_2 = arith.constant 0 : i32
    return %arg0, %c0_i32, %c0_i32_0, %c0_i32_1 : i32, i32, i32, i32
  }
  func.func @transform_4(%arg0: i32) -> (i32, i32, i32, i32) {
    %c0_i32 = arith.constant 0 : i32
    %c0_i32_0 = arith.constant 0 : i32
    %c0_i32_1 = arith.constant 0 : i32
    %c0_i32_2 = arith.constant 0 : i32
    return %arg0, %c0_i32, %c0_i32_0, %c0_i32_1 : i32, i32, i32, i32
  }
  func.func @transform_5(%arg0: i32) -> (i32, i32, i32, i32) {
    %c0_i32 = arith.constant 0 : i32
    %c0_i32_0 = arith.constant 0 : i32
    %c0_i32_1 = arith.constant 0 : i32
    %c0_i32_2 = arith.constant 0 : i32
    return %arg0, %c0_i32, %c0_i32_0, %c0_i32_1 : i32, i32, i32, i32
  }
  func.func @transform_6(%arg0: i32) -> (i32, i32, i32) {
    %c0_i32 = arith.constant 0 : i32
    %c0_i32_0 = arith.constant 0 : i32
    %c0_i32_1 = arith.constant 0 : i32
    return %arg0, %c0_i32, %c0_i32_0 : i32, i32, i32
  }
  func.func @transform_7(%arg0: i32) -> (i32, i32, i32) {
    %c0_i32 = arith.constant 0 : i32
    %c0_i32_0 = arith.constant 0 : i32
    %c0_i32_1 = arith.constant 0 : i32
    return %arg0, %c0_i32, %c0_i32_0 : i32, i32, i32
  }
  func.func @transform_8(%arg0: i32) -> (i32, i32, i32) {
    %c0_i32 = arith.constant 0 : i32
    %c0_i32_0 = arith.constant 0 : i32
    %c0_i32_1 = arith.constant 0 : i32
    return %arg0, %c0_i32, %c0_i32_0 : i32, i32, i32
  }
  func.func @transform_9(%arg0: i32) -> (i32, i32, i32) {
    %c0_i32 = arith.constant 0 : i32
    %c0_i32_0 = arith.constant 0 : i32
    %c0_i32_1 = arith.constant 0 : i32
    return %arg0, %c0_i32, %c0_i32_0 : i32, i32, i32
  }
}

</mosaic_0001>

<bundles_post_ra>
// kernel: tpu_custom_call.1
= control target key start
LH: loop header
LB: loop body
LE: loop exit
PB: predicated region body
PF: predicated region fallthrough
CT: control target
= control target key end

     0   :  { %s4396_s0 = inlined_call_operand.vmem [shape: f32[36], index: 0, kind: input, shape index: {}]   ;;  %s4397_s1 = inlined_call_operand.vmem [shape: s32[2,18,18], index: 1, kind: input, shape index: {}]   ;;  %s4398_s2 = inlined_call_operand.vmem [shape: s32[2,18,18], index: 2, kind: input, shape index: {}]   ;;  %s4399_s3 = inlined_call_operand.vmem [shape: f32[2,3,16,16], index: 3, kind: input, shape index: {}]   ;;  %s4400_s4 = inlined_call_operand.hbm [shape: f32[2,3,16,16], index: 4, kind: input, shape index: {}]   ;;  %s4401_s5 = inlined_call_operand.hbm [shape: f32[2,3,16,16], index: 5, kind: output, shape index: {0}]   ;;  %s4402_s6 = inlined_call_operand.hbm [shape: f32[2,16,16], index: 6, kind: output, shape index: {1}]   ;;  %s4403_s7 = inlined_call_operand.hbm [shape: f32[2,16,16], index: 7, kind: output, shape index: {2}]   ;;  %s4404_s8 = inlined_call_operand.hbm [shape: f32[2,16,16], index: 8, kind: output, shape index: {3}]   ;;  %s4405_s9 = inlined_call_operand.hbm [shape: f32[2,16,16], index: 9, kind: output, shape index: {4}]  }
   0x1   :  { %4457 = sst [smem:[#allocation25_spill]] %s4396_s0 }
   0x2   :  { %4458 = sst [smem:[#allocation26_spill]] %s4397_s1 }
   0x3   :  { %4459 = sst [smem:[#allocation27_spill]] %s4400_s4 }
   0x4   :  { %15 = vsyncpa [#allocation7], 0 }
   0x5   :  { %16 = vsyncpa [#allocation5], 0 }
   0x6   :  { %18 = vsyncpa [#allocation5 + $0x1], 0 }
   0x7   :  { %19 = vsyncpa [#allocation6], 0 }
   0x8   :  { %21 = vsyncpa [#allocation6 + $0x1], 0 }
   0x9   :  { %22 = vsyncpa [#allocation11], 0 }
   0xa   :  { %24 = vsyncpa [#allocation11 + $0x1], 0 }
   0xb   :  { %25 = vsyncpa [#allocation14], 0 }
   0xc   :  { %27 = vsyncpa [#allocation14 + $0x1], 0  ;;  %s2701_s30 = smov 0   ;;  %s2703_s10 = smov 0  }
   0xd   :  { %s2705_s11 = smov 0   ;;  %s2707_s12 = smov 0  }
   0xe LB: > { %4460 = sst [smem:[#allocation21_spill]] %s2629_s11  ;;  %s2722_s13 = sadd.s32 4294967295, %s2633_s12   ;;  %s2633_s12 = sphi %s2707_s12, %s4528_s12   ;;  %s2629_s11 = sphi %s2705_s11, %s4527_s11   ;;  %s2625_s10 = sphi %s2703_s10, %s4526_s10   ;;  %s2621_s30 = sphi %s2701_s30, %s4525_s30  }
   0xf   : > { %s4408_s14 = sadd.s32 4294967294, %s2633_s12   ;;  %s2726_s15 = sadd.s32 1, %s2633_s12  }
  0x10   : > { %s139_s16 = sadd.s32 1, %s2629_s11  ;;  %s136_s17 = ssub.s32 %s2633_s12, %s2726_s15 }
  0x11   : > { %p146_p0 = scmp.ne.s32.totalorder %s2629_s11, %s2625_s10  ;;  %p137_p1 = scmp.eq.s32.totalorder %s136_s17, 0 }
  0x12   : > { %p147_p2 = scmp.eq.s32.totalorder %s2633_s12, 0  ;;  %p152_p3 = scmp.ne.s32.totalorder %s2625_s10, %s2621_s30 }
  0x13   : > { %p4407_p4 = scmp.eq.s32.totalorder %s2722_s13, 0  ;;  %p176_p7 = scmp.eq.s32.totalorder %s2722_s13, 1 }
  0x14   : > { %s2738_s18 = scalar_select %p137_p1, %s2629_s11, %s139_s16  }
  0x15   : > { %p2740_p5 = por %p147_p2, %p146_p0  ;;  %p2746_p6 = por %p4407_p4, %p152_p3 }
  0x16   : > { %4461 = sst [smem:[#allocation22_spill]] %s2738_s18  ;;  %p182_p8 = scmp.eq.s32.totalorder %s4408_s14, 1 }
  0x17   : > { %s4463_s20 = scalar_select %p2746_p6, 1, 0 }
  0x18   : > { %p2231_p9 = scmp.ge.s32.totalorder %s2633_s12, 1  ;;  %p293_p10 = scmp.lt.s32.totalorder %s2633_s12, 3 }
  0x19   : > { %p2755_p11 = por %p176_p7, %p146_p0  ;;  %p2759_p12 = por %p182_p8, %p152_p3 }
  0x1a   : > { %p2763_p13 = pnand %p2231_p9, %p293_p10  ;;  %s4467_s0 = sld [smem:[#allocation25_spill]] }
  0x1b   : > { %s4464_s21 = scalar_select %p2755_p11, 1, 0 }
  0x1c   : > { %s4465_s22 = scalar_select %p2759_p12, 1, 0 }
  0x1d   : > { %p2324_p1 = pneg %p2763_p13  ;;  %p2349_p2 = scmp.lt.s32.totalorder %s2633_s12, 2 }
  0x1e   : > { %s341_s28 = sand.u32 1, %s2629_s11  }
  0x1f   : > { %p2776_p7 = pnand %p2324_p1, %p4407_p4  ;;  %p2783_p3 = pnand %p2349_p2, %p2740_p5 }
  0x20   : > { %s306_s26 = sshll.u32 %s4467_s0, 4  ;;  %s2302_s16 = smul.u32 48, %s341_s28  ;;  %s307_s26 = int_to_ptr.vmem [resolvable:$true] %s306_s26 }
  0x21   : > { %s2398_s17 = scalar_lea.vmem %s307_s26, 16  ;;  %p2400_p9 = pneg %p2776_p7 }
  0x22   : > { %p2399_p8 = scmp.ne.s32.totalorder %s307_s26, %s2398_s17  ;;  %p2406_p12 = scmp.lt.s32.totalorder %s307_s26, %s307_s26 }
  0x23   : > { %p2407_p11 = scmp.lt.s32.totalorder %s2398_s17, %s2398_s17 }
  0x24   : > { %p2401_p10 = pnand %p2400_p9, %p2399_p8 }
  0x25   : > { %p2408_p1 = por %p2407_p11, %p2406_p12 }
  0x26   : > { %p2402_p0 = pneg %p2401_p10 }
  0x28   : > { %p2409_p4 = pnand %p2408_p1, %p2402_p0 }
  0x2a   : > { %2412 = shalt.err (!%p2409_p4)
}
  0x2b   : > { %s2635_s24 = smov [#allocation4]   ;;  %s2303_s19 = smul.u32 768, %s2633_s12 }
  0x2c   : > { %2327 = dma.vmem_to_smem (!%p2776_p7), %s307_s26, 16, %s2635_s24, [#allocation7]  }
  0x2d   : > { %s345_s25 = scalar_lea.vmem [#allocation8], %s2302_s16  ;;  %s4470_s4 = sld [smem:[#allocation27_spill]] }
  0x2e   : > { %s352_s14 = sshll.u32 %s345_s25, 4  ;;  %s2799_s17 = scalar_lea.sflag [#allocation5], %s341_s28  ;;  %s2792_s14 = int_to_ptr.vmem [resolvable:$true] %s352_s14 }
  0x2f   : > { %p2415_p5 = pneg %p2783_p3 }
  0x33   : > { %s2797_s11 = scalar_lea.hbm %s4470_s4, %s2303_s19  ;;  %s2418_s0 = scalar_lea.hbm %s4470_s4, 1536 }
  0x34   : > { %s2413_s27 = scalar_lea.hbm %s2797_s11, 768  ;;  %p2419_p0 = scmp.lt.u32.totalorder %s2797_s11, %s4470_s4 }
  0x35   : > { %p2414_p4 = scmp.ne.s32.totalorder %s2797_s11, %s2413_s27  ;;  %p2420_p2 = scmp.lt.u32.totalorder %s2418_s0, %s2413_s27 }
  0x36   : > { %p2422_p8 = scmp.lt.u32.totalorder %s2413_s27, %s2797_s11 }
  0x37   : > { %p2416_p11 = pnand %p2415_p5, %p2414_p4  ;;  %p2421_p7 = por %p2420_p2, %p2419_p0 }
  0x39   : > { %p2417_p12 = pneg %p2416_p11  ;;  %p2423_p9 = por %p2422_p8, %p2421_p7 }
  0x3b   : > { %p2424_p10 = pnand %p2423_p9, %p2417_p12 }
  0x3d   : > { %2427 = shalt.err (!%p2424_p10)
}
  0x3e   : > { %s2428_s28 = scalar_lea.vmem %s2792_s14, 768  ;;  %s2636_s19 = smov [#allocation8]  }
  0x3f   : > { %p2429_p1 = scmp.ne.s32.totalorder %s2792_s14, %s2428_s28  ;;  %s2433_s25 = sshll.u32 %s2636_s19, 4  ;;  %s2434_s25 = int_to_ptr.vmem [resolvable:$false] %s2433_s25 }
  0x40   : > { %s2435_s26 = scalar_lea.vmem %s2434_s25, 1536  ;;  %p2436_p6 = scmp.lt.s32.totalorder %s2792_s14, %s2434_s25 }
  0x41   : > { %p2431_p4 = pnand %p2429_p1, %p2415_p5  ;;  %p2437_p0 = scmp.lt.s32.totalorder %s2435_s26, %s2428_s28 }
  0x43   : > { %p2432_p11 = pneg %p2431_p4  ;;  %p2438_p2 = por %p2437_p0, %p2436_p6 }
  0x45   : > { %p2439_p7 = pnand %p2438_p2, %p2432_p11 }
  0x47   : > { %2442 = shalt.err (!%p2439_p7)
}
  0x48   : > { %s2637_s27 = smov 128   ;;  %s2638_s16 = smov 8  }
  0x49   : > { %2331 = dma.hbm_to_vmem [thread:$0]  (!%p2783_p3), %s2797_s11, 768, %s2792_s14, %s2799_s17, %s2637_s27, %s2637_s27, %s2638_s16  }
  0x4a   : > { %364 = sbr.rel (%p2763_p13) target bundleno = 758 (0x2f6), region = 40 }
  0x51   : > { %p4471_p5 = scmp.eq.s32.totalorder %s2722_s13, 0 }
  0x53   : > { %2600 = dma.done.wait (%p4471_p5), [#allocation7], 16   ;;  %p4472_p12 = pmov %p4471_p5 }
  0x54   : > { %s2834_s0 = sand.u32 1, %s2625_s10   ;;  %p4473_p6 = scmp.ne.s32.totalorder %s4463_s20, 0 }
  0x55   : > { %2602 = vsyncadd (%p4472_p12), [#allocation7], 4294967280  ;;  %s4411_s18 = smul.u32 48, %s2834_s0  ;;  %s371_s24 = scalar_lea.sflag [#allocation5], %s2834_s0 }
  0x57   : > { %s2840_s11 = scalar_lea.vmem [#allocation8], %s4411_s18 }
  0x58   : > { %2604 = dma.done.wait (%p4473_p6), %s371_s24, 768  }
  0x59   : > { %2606 = vsyncadd (%p4473_p6), %s371_s24, 4294966528 }
  0x5a   : > { %379 = sfence }
  0x5b   : > { %p445_p13 = scmp.lt.s32.totalorder %s2722_s13, 1  ;;  %s2245_s14 = sld [smem:[#allocation4 + $0x2]] }
  0x5c   : > { %s2254_s23 = sld [smem:[#allocation4 + $0xb]]  ;;  %s2263_s29 = sld [smem:[#allocation4 + $0x14]] }
  0x5d   : > { %s2848_s17 = scalar_select %p445_p13, %s2722_s13, 1 }
  0x5e   : > { %s2272_s28 = sld [smem:[#allocation4 + $0x1d]]  ;;  %s2244_s25 = sld [smem:[#allocation4 + $0x1]] }
  0x5f   : > { %s4412_s19 = smul.u32 24, %s2848_s17  ;;  %s2253_s26 = sld [smem:[#allocation4 + $0xa]] }
  0x60   : > { %s2262_s27 = sld [smem:[#allocation4 + $0x13]]  ;;  %s4474_s1 = sld [smem:[#allocation26_spill]] }
  0x61   : > { %v2858_v0 = vstv %s2245_s14  ;;  %s2271_s18 = sld [smem:[#allocation4 + $0x1c]]  ;;  %s2876_s14 = sld [smem:[#allocation4 + $0xd]] }
  0x62   : > { %v2863_v2 = vstv %s2254_s23  ;;  %v2865_v3 = vstv %s2263_s29  ;;  %s2870_s4 = sld [smem:[#allocation4 + $0x4]]  ;;  %s2885_s23 = sld [smem:[#allocation4 + $0x16]] }
  0x63   : > { %s2896_s29 = sld [smem:[#allocation4 + $0x1f]]  ;;  %s4448_s20 = smov 127  }
  0x64   : > { %v2881_v6 = vstv %s2272_s28  ;;  %v2890_v8 = vstv %s2244_s25  ;;  %s2911_s28 = sld [smem:[#allocation4 + $0x5]]  ;;  %s2924_s25 = sld [smem:[#allocation4 + $0xe]] }
  0x65   : > { %v2904_v12 = vstv %s2253_s26  ;;  %s2926_s26 = sld [smem:[#allocation4 + $0x17]]  ;;  %p4513_p8 = scmp.ne.s32.totalorder %s4464_s21, 0 }
  0x66   : > { %s2856_s24 = scalar_lea.vmem %s4474_s1, %s4412_s19  ;;  %v2906_v13 = vstv %s2262_s27  ;;  %s4446_s27 = smov 126  }
  0x67   : > { %v2861_v1 = vld [vmem:[%s2856_s24] sm:$0xff]  ;;  %v2868_v4 = vld [vmem:[%s2856_s24 + $0x8] sm:$0xff]  ;;  %v2919_v17 = vstv %s2271_s18  ;;  %s2939_s18 = sld [smem:[#allocation4 + $0x20]]  ;;  %s2954_s16 = sld [smem:[#allocation4 + $0x7]]  ;;  %v2965_v28 = vstv %s2876_s14 }
  0x68   : > { %vm571_vm0 = vcmp.eq.s32.totalorder %v2861_v1, 0  ;;  %vm576_vm1 = vcmp.eq.s32.totalorder %v2861_v1, 1  ;;  %vm581_vm2 = vcmp.eq.s32.totalorder %v2861_v1, 2  ;;  %vm4420_vm3 = vcmp.eq.s32.totalorder %v2861_v1, 3  ;;  %v2909_v14 = vld [vmem:[%s2856_s24 + $0x9] sm:$0xff]  ;;  %v2952_v25 = vld [vmem:[%s2856_s24 + $0x1] sm:$0xff] }
  0x69   : > { %v574_v5 = vsel %vm571_vm0, %v2858_v0, 0.0  ;;  %vm572_vm4 = vcmp.eq.s32.totalorder %v2868_v4, 0  ;;  %vm577_vm5 = vcmp.eq.s32.totalorder %v2868_v4, 1  ;;  %vm582_vm6 = vcmp.eq.s32.totalorder %v2868_v4, 2  ;;  %s2977_s19 = sld [smem:[#allocation4 + $0x10]]  ;;  %s2990_s14 = sld [smem:[#allocation4 + $0x22]] }
  0x6a   : > { %v579_v7 = vsel %vm576_vm1, %v2863_v2, %v574_v5  ;;  %v575_v9 = vsel %vm572_vm4, %v2858_v0, 0.0  ;;  %v539_v11 = vsel %vm571_vm0, %v2890_v8, 0.0  ;;  %vm4413_vm7 = vcmp.eq.s32.totalorder %v2868_v4, 3  ;;  %v3012_v39 = vld [vmem:[%s2856_s24 + $0xa] sm:$0xff]  ;;  %v3058_v51 = vld [vmem:[%s2856_s24 + $0x2] sm:$0xff]  ;;  %s4475_s24 = smul.u32 24, %s2848_s17 }
  0x6b   : > { %v584_v10 = vsel %vm581_vm2, %v2865_v3, %v579_v7  ;;  %v544_v16 = vsel %vm576_vm1, %v2904_v12, %v539_v11  ;;  %v580_v18 = vsel %vm577_vm5, %v2863_v2, %v575_v9  ;;  %v540_v21 = vsel %vm572_vm4, %v2890_v8, 0.0 }
  0x6c   : > { %v589_v15 = vsel %vm4420_vm3, %v2881_v6, %v584_v10  ;;  %v549_v19 = vsel %vm581_vm2, %v2906_v13, %v544_v16  ;;  %v585_v20 = vsel %vm582_vm6, %v2865_v3, %v580_v18  ;;  %v545_v24 = vsel %vm577_vm5, %v2904_v12, %v540_v21 }
  0x6d   : > { %593 = vrot.lane.b32.xlu1 %v589_v15, %s4446_s27  ;;  %v554_v22 = vsel %vm4420_vm3, %v2919_v17, %v549_v19  ;;  %v590_v23 = vsel %vm4413_vm7, %v2881_v6, %v585_v20  ;;  %vm634_vm8 = vcmp.eq.s32.totalorder %v2909_v14, 0  ;;  %v550_v26 = vsel %vm582_vm6, %v2906_v13, %v545_v24 }
  0x6e   : > { %558 = vrot.lane.b32.xlu0 %v554_v22, %s4448_s20  ;;  %v2961_v27 = vstv %s2870_s4  ;;  %vm4429_vm9 = vcmp.eq.s32.totalorder %v2909_v14, 1  ;;  %v555_v29 = vsel %vm4413_vm7, %v2919_v17, %v550_v26  ;;  %vm4419_vm10 = vcmp.eq.s32.totalorder %v2909_v14, 2  ;;  %s2979_s4 = sld [smem:[#allocation4 + $0x19]] }
  0x6f   : > { %v637_v30 = vsel %vm634_vm8, %v2961_v27, 0.0  ;;  %v2975_v31 = vstv %s2885_s23  ;;  %vm4418_vm11 = vcmp.eq.s32.totalorder %v2909_v14, 3  ;;  %v2987_v33 = vstv %s2896_s29  ;;  %s3014_s23 = sld [smem:[#allocation4 + $0x8]]  ;;  %s3028_s29 = sld [smem:[#allocation4 + $0x11]] }
  0x70   : > { %v642_v32 = vsel %vm4429_vm9, %v2965_v28, %v637_v30  ;;  %vm4415_vm12 = vcmp.eq.s32.totalorder %v2952_v25, 0  ;;  %vm4414_vm13 = vcmp.eq.s32.totalorder %v2952_v25, 1  ;;  %vm4417_vm14 = vcmp.eq.s32.totalorder %v2952_v25, 2 }
  0x71   : > { %595 = vrot.lane.b32.xlu1 %v590_v23, %s4446_s27  ;;  %v647_v34 = vsel %vm4419_vm10, %v2975_v31, %v642_v32  ;;  %v636_v35 = vsel %vm4415_vm12, %v2961_v27, 0.0  ;;  %vm4416_vm15 = vcmp.eq.s32.totalorder %v2952_v25, 3  ;;  %v3009_v38 = vstv %s2911_s28  ;;  %s3030_s28 = sld [smem:[#allocation4 + $0x1a]] }
  0x72   : > { %560 = vrot.lane.b32.xlu0 %v555_v29, %s4448_s20  ;;  %v652_v36 = vsel %vm4418_vm11, %v2987_v33, %v647_v34  ;;  %v641_v37 = vsel %vm4414_vm13, %v2965_v28, %v636_v35  ;;  %v672_v41 = vsel %vm634_vm8, %v3009_v38, 0.0  ;;  %v3023_v42 = vstv %s2924_s25  ;;  %s3045_s25 = sld [smem:[#allocation4 + $0x23]] }
  0x73   : > { %v646_v40 = vsel %vm4417_vm14, %v2975_v31, %v641_v37  ;;  %v3026_v43 = vstv %s2926_s26  ;;  %v677_v45 = vsel %vm4429_vm9, %v3023_v42, %v672_v41  ;;  %v3040_v46 = vstv %s2939_s18  ;;  %s3339_s26 = sld [smem:[#allocation4 + $0x6]]  ;;  %s3341_s18 = sld [smem:[#allocation4 + $0xf]] }
  0x74   : > { %v651_v44 = vsel %vm4416_vm15, %v2987_v33, %v646_v40  ;;  %v671_v47 = vsel %vm4415_vm12, %v3009_v38, 0.0  ;;  %v682_v48 = vsel %vm4419_vm10, %v3026_v43, %v677_v45  ;;  %vm4421_vm7 = vcmp.eq.s32.totalorder %v3012_v39, 0 }
  0x75   : > { %657 = vrot.lane.b32.xlu1 %v652_v36, %s4448_s20  ;;  %v676_v49 = vsel %vm4414_vm13, %v3023_v42, %v671_v47  ;;  %v3055_v50 = vstv %s2954_s16  ;;  %v687_v52 = vsel %vm4418_vm11, %v3040_v46, %v682_v48  ;;  %vm4422_vm13 = vcmp.eq.s32.totalorder %v3012_v39, 1  ;;  %s3086_s16 = scalar_lea.vmem %s4398_s2, %s4475_s24  ;;  %s3327_s24 = sld [smem:[#allocation4 + $0x1e]] }
  0x76   : > { %655 = vrot.lane.b32.xlu0 %v651_v44, %s4448_s20  ;;  %v681_v53 = vsel %vm4417_vm14, %v3026_v43, %v676_v49  ;;  %v734_v54 = vsel %vm4421_vm7, %v3055_v50, 0.0  ;;  %v3075_v56 = vstv %s2977_s19  ;;  %vm4425_vm12 = vcmp.eq.s32.totalorder %v3012_v39, 2  ;;  %v3117_v7 = vld [vmem:[%s3086_s16] sm:$0xff]  ;;  %v3145_v21 = vld [vmem:[%s3086_s16 + $0x8] sm:$0xff]  ;;  %s3251_s19 = sld [smem:[#allocation4]] }
  0x77   : > { %v686_v55 = vsel %vm4416_vm15, %v3040_v46, %v681_v53  ;;  %v3079_v57 = vstv %s2979_s4  ;;  %v739_v58 = vsel %vm4422_vm13, %v3075_v56, %v734_v54  ;;  %vm4424_vm15 = vcmp.eq.s32.totalorder %v3012_v39, 3  ;;  %v3175_v34 = vld [vmem:[%s3086_s16 + $0x1] sm:$0xff]  ;;  %v3208_v45 = vld [vmem:[%s3086_s16 + $0x9] sm:$0xff]  ;;  %s3266_s4 = sld [smem:[#allocation4 + $0x9]] }
  0x78   : > { %v3094_v59 = vstv %s2990_s14  ;;  %vm4428_vm14 = vcmp.eq.s32.totalorder %v3058_v51, 0  ;;  %v744_v60 = vsel %vm4425_vm12, %v3079_v57, %v739_v58  ;;  %vm4423_vm11 = vcmp.eq.s32.totalorder %v3058_v51, 1  ;;  %v3240_v53 = vld [vmem:[%s3086_s16 + $0x2] sm:$0xff]  ;;  %v3264_v58 = vld [vmem:[%s3086_s16 + $0xa] sm:$0xff]  ;;  %s3279_s14 = sld [smem:[#allocation4 + $0x12]]  ;;  %s3354_s16 = sld [smem:[#allocation4 + $0x18]] }
  0x79   : > { %692 = vrot.lane.b32.xlu1 %v687_v52, %s4446_s27  ;;  %v733_v61 = vsel %vm4428_vm14, %v3055_v50, 0.0  ;;  %vm4427_vm10 = vcmp.eq.s32.totalorder %v3058_v51, 2  ;;  %v749_v62 = vsel %vm4424_vm15, %v3094_v59, %v744_v60  ;;  %vm4426_vm3 = vcmp.eq.s32.totalorder %v3058_v51, 3 }
  0x7a   : > { %690 = vrot.lane.b32.xlu0 %v686_v55, %s4446_s27  ;;  %v738_v63 = vsel %vm4423_vm11, %v3075_v56, %v733_v61  ;;  %v3114_v5 = vstv %s3014_s23  ;;  %v3126_v11 = vstv %s3028_s29  ;;  %v3129_v15 = vstv %s3030_s28  ;;  %s3281_s23 = sld [smem:[#allocation4 + $0x1b]]  ;;  %s3306_s28 = sld [smem:[#allocation4 + $0xc]] }
  0x7b   : > { %v743_v9 = vsel %vm4427_vm10, %v3079_v57, %v738_v63  ;;  %v769_v10 = vsel %vm4421_vm7, %v3114_v5, 0.0  ;;  %v3139_v19 = vstv %s3045_s25  ;;  %v768_v20 = vsel %vm4428_vm14, %v3114_v5, 0.0  ;;  %s3295_s29 = sld [smem:[#allocation4 + $0x3]]  ;;  %s3316_s25 = sld [smem:[#allocation4 + $0x15]] }
  0x7c   : > { %v748_v16 = vsel %vm4426_vm3, %v3094_v59, %v743_v9  ;;  %v774_v18 = vsel %vm4422_vm13, %v3126_v11, %v769_v10  ;;  %v773_v23 = vsel %vm4423_vm11, %v3126_v11, %v768_v20  ;;  %vm4445_vm7 = vcmp.eq.s32.totalorder %v3117_v7, 0 }
  0x7d   : > { %754 = vrot.lane.b32.xlu1 %v749_v62, %s4448_s20  ;;  %v779_v22 = vsel %vm4425_vm12, %v3129_v15, %v774_v18  ;;  %vm4436_vm13 = vcmp.eq.s32.totalorder %v3117_v7, 1  ;;  %v778_v26 = vsel %vm4427_vm10, %v3129_v15, %v773_v23  ;;  %v1227_v29 = vsel %vm4445_vm7, %v2890_v8, 0.0 }
  0x7e   : > { %752 = vrot.lane.b32.xlu0 %v748_v16, %s4448_s20  ;;  %v784_v24 = vsel %vm4424_vm15, %v3139_v19, %v779_v22  ;;  %vm4431_vm11 = vcmp.eq.s32.totalorder %v3117_v7, 2  ;;  %v783_v30 = vsel %vm4426_vm3, %v3139_v19, %v778_v26  ;;  %v1231_v32 = vsel %vm4436_vm13, %v2904_v12, %v1227_v29 }
  0x7f   : > { %vm4433_vm15 = vcmp.eq.s32.totalorder %v3117_v7, 3  ;;  %vm4430_vm12 = vcmp.eq.s32.totalorder %v3145_v21, 0  ;;  %v1235_v35 = vsel %vm4431_vm11, %v2906_v13, %v1231_v32  ;;  %vm4432_vm3 = vcmp.eq.s32.totalorder %v3145_v21, 1 }
  0x80   : > { %v1228_v36 = vsel %vm4430_vm12, %v2890_v8, 0.0  ;;  %vm4435_vm10 = vcmp.eq.s32.totalorder %v3145_v21, 2  ;;  %v1239_v37 = vsel %vm4433_vm15, %v2919_v17, %v1235_v35  ;;  %vm4434_vm14 = vcmp.eq.s32.totalorder %v3145_v21, 3 }
  0x81   : > { %789 = vrot.lane.b32.xlu1 %v784_v24, %s4446_s27  ;;  %v1232_v40 = vsel %vm4432_vm3, %v2904_v12, %v1228_v36  ;;  %v1257_v41 = vsel %vm4445_vm7, %v2858_v0, 0.0  ;;  %v1258_v12 = vsel %vm4430_vm12, %v2858_v0, 0.0  ;;  %vm4437_vm9 = vcmp.eq.s32.totalorder %v3175_v34, 0 }
  0x82   : > { %787 = vrot.lane.b32.xlu0 %v783_v30, %s4446_s27  ;;  %v1236_v8 = vsel %vm4435_vm10, %v2906_v13, %v1232_v40  ;;  %v1261_v44 = vsel %vm4436_vm13, %v2863_v2, %v1257_v41  ;;  %v1262_v48 = vsel %vm4432_vm3, %v2863_v2, %v1258_v12  ;;  %v1309_v0 = vsel %vm4437_vm9, %v2961_v27, 0.0 }
  0x83   : > { %v1240_v47 = vsel %vm4434_vm14, %v2919_v17, %v1236_v8  ;;  %v1265_v13 = vsel %vm4431_vm11, %v2865_v3, %v1261_v44  ;;  %v1266_v17 = vsel %vm4435_vm10, %v2865_v3, %v1262_v48  ;;  %vm4444_vm12 = vcmp.eq.s32.totalorder %v3175_v34, 1 }
  0x84   : > { %v1269_v49 = vsel %vm4433_vm15, %v2881_v6, %v1265_v13  ;;  %vm4438_vm11 = vcmp.eq.s32.totalorder %v3175_v34, 2  ;;  %v1270_v2 = vsel %vm4434_vm14, %v2881_v6, %v1266_v17  ;;  %v1313_v52 = vsel %vm4444_vm12, %v2965_v28, %v1309_v0 }
  0x85   : > { %1243 = vrot.lane.b32.xlu1 %v1239_v37, %s4448_s20  ;;  %vm4440_vm3 = vcmp.eq.s32.totalorder %v3175_v34, 3  ;;  %vm4441_vm15 = vcmp.eq.s32.totalorder %v3208_v45, 0  ;;  %v1317_v3 = vsel %vm4438_vm11, %v2975_v31, %v1313_v52  ;;  %vm4439_vm14 = vcmp.eq.s32.totalorder %v3208_v45, 1 }
  0x86   : > { %1245 = vrot.lane.b32.xlu0 %v1240_v47, %s4448_s20  ;;  %v1310_v6 = vsel %vm4441_vm15, %v2961_v27, 0.0  ;;  %vm4443_vm10 = vcmp.eq.s32.totalorder %v3208_v45, 2  ;;  %v1321_v54 = vsel %vm4440_vm3, %v2987_v33, %v1317_v3  ;;  %vm4442_vm13 = vcmp.eq.s32.totalorder %v3208_v45, 3 }
  0x87   : > { %v1314_v55 = vsel %vm4439_vm14, %v2965_v28, %v1310_v6  ;;  %v1339_v27 = vsel %vm4437_vm9, %v3009_v38, 0.0  ;;  %v1340_v61 = vsel %vm4441_vm15, %v3009_v38, 0.0  ;;  %vm1389_vm9 = vcmp.eq.s32.totalorder %v3240_v53, 0 }
  0x88   : > { %v1318_v60 = vsel %vm4443_vm10, %v2975_v31, %v1314_v55  ;;  %v1343_v28 = vsel %vm4444_vm12, %v3023_v42, %v1339_v27  ;;  %v1344_v63 = vsel %vm4439_vm14, %v3023_v42, %v1340_v61  ;;  %v1391_v38 = vsel %vm1389_vm9, %v3055_v50, 0.0 }
  0x89   : > { %1273 = vrot.lane.b32.xlu1 %v1269_v49, %s4446_s27  ;;  %v1322_v62 = vsel %vm4442_vm13, %v2987_v33, %v1318_v60  ;;  %v1347_v31 = vsel %vm4438_vm11, %v3026_v43, %v1343_v28  ;;  %v1348_v9 = vsel %vm4443_vm10, %v3026_v43, %v1344_v63  ;;  %vm1393_vm11 = vcmp.eq.s32.totalorder %v3240_v53, 1 }
  0x8a   : > { %1275 = vrot.lane.b32.xlu0 %v1270_v2, %s4446_s27  ;;  %v1351_v33 = vsel %vm4440_vm3, %v3040_v46, %v1347_v31  ;;  %vm1397_vm14 = vcmp.eq.s32.totalorder %v3240_v53, 2  ;;  %v1352_v42 = vsel %vm4442_vm13, %v3040_v46, %v1348_v9  ;;  %v1395_v10 = vsel %vm1393_vm11, %v3075_v56, %v1391_v38  ;;  %s3356_s27 = sld [smem:[#allocation4 + $0x21]] }
  0x8b   : > { %vm1401_vm3 = vcmp.eq.s32.totalorder %v3240_v53, 3  ;;  %vm1390_vm15 = vcmp.eq.s32.totalorder %v3264_v58, 0  ;;  %v1399_v43 = vsel %vm1397_vm14, %v3079_v57, %v1395_v10  ;;  %vm1394_vm13 = vcmp.eq.s32.totalorder %v3264_v58, 1 }
  0x8c   : > { %v1392_v46 = vsel %vm1390_vm15, %v3055_v50, 0.0  ;;  %vm1398_vm10 = vcmp.eq.s32.totalorder %v3264_v58, 2  ;;  %vm529_vm12 = vcmask 130048   ;;  %v1403_v16 = vsel %vm1401_vm3, %v3094_v59, %v1399_v43 }
  0x8d   : > { %1325 = vrot.lane.b32.xlu1 %v1321_v54, %s4448_s20  ;;  %v1396_v18 = vsel %vm1394_vm13, %v3075_v56, %v1392_v46  ;;  %vm1402_vm7 = vcmp.eq.s32.totalorder %v3264_v58, 3  ;;  %v1421_v50 = vsel %vm1389_vm9, %v3114_v5, 0.0  ;;  %v1422_v22 = vsel %vm1390_vm15, %v3114_v5, 0.0 }
  0x8e   : > { %1327 = vrot.lane.b32.xlu0 %v1322_v62, %s4448_s20  ;;  %v1400_v20 = vsel %vm1398_vm10, %v3079_v57, %v1396_v18  ;;  %v1425_v56 = vsel %vm1393_vm11, %v3126_v11, %v1421_v50  ;;  %v511_v23 = vstv %s3251_s19  ;;  %v1426_v26 = vsel %vm1394_vm13, %v3126_v11, %v1422_v22  ;;  %s4476_s20 = smov 126   ;;  %s4478_s19 = smov 127  }
  0x8f   : > { %v1404_v24 = vsel %vm1402_vm7, %v3094_v59, %v1400_v20  ;;  %v1429_v57 = vsel %vm1397_vm14, %v3129_v15, %v1425_v56  ;;  %v516_v5 = vstv %s3266_s4  ;;  %v1430_v59 = vsel %vm1398_vm10, %v3129_v15, %v1426_v26  ;;  %s2642_s4 = smov 2  }
  0x90   : > { %v1433_v29 = vsel %vm1401_vm3, %v3139_v19, %v1429_v57  ;;  %v521_v30 = vstv %s3279_s14  ;;  %v526_v32 = vstv %s3281_s23  ;;  %v1434_v35 = vsel %vm1402_vm7, %v3139_v19, %v1430_v59  ;;  %s3562_s14 = sshll.u32 %s2834_s0, 4 }
  0x91   : > { %1355 = vrot.lane.b32.xlu1 %v1351_v33, %s4476_s20  ;;  %v512_v11 = vsel %vm571_vm0, %v511_v23, 0.0  ;;  %v513_v36 = vsel %vm572_vm4, %v511_v23, 0.0  ;;  %v608_v37 = vstv %s3295_s29  ;;  %v613_v41 = vstv %s3306_s28  ;;  %s3579_s23 = scalar_lea.vmem [#allocation10], %s3562_s14  ;;  %s2306_s29 = smul.u32 48, %s2848_s17 }
  0x92   : > { %1357 = vrot.lane.b32.xlu0 %v1352_v42, %s4476_s20  ;;  %v517_v40 = vsel %vm576_vm1, %v516_v5, %v512_v11  ;;  %v518_v15 = vsel %vm577_vm5, %v516_v5, %v513_v36  ;;  %v610_v19 = vsel %vm634_vm8, %v608_v37, 0.0  ;;  %vm4477_vm0 = vcmp.eq.s32.totalorder %v2909_v14, 1  ;;  %s2644_s17 = smov [#allocation10]  }
  0x93   : > { %v522_v8 = vsel %vm581_vm2, %v521_v30, %v517_v40  ;;  %v523_v44 = vsel %vm582_vm6, %v521_v30, %v518_v15  ;;  %v615_v12 = vsel %vm4477_vm0, %v613_v41, %v610_v19  ;;  %v618_v47 = vstv %s3316_s25  ;;  %s3613_s25 = scalar_lea.vmem %s4399_s3, %s2306_s29  ;;  %s2447_s28 = sshll.u32 %s2644_s17, 4  ;;  %s2448_s28 = int_to_ptr.vmem [resolvable:$false] %s2447_s28 }
  0x94   : > { %vm4479_vm1 = vcmp.eq.s32.totalorder %v2861_v1, 3  ;;  %vm4480_vm4 = vcmp.eq.s32.totalorder %v2868_v4, 3  ;;  %vm4481_vm2 = vcmp.eq.s32.totalorder %v2909_v14, 2  ;;  %v623_v49 = vstv %s3327_s24  ;;  %s3630_s24 = scalar_lea.vmem [#allocation12], %s3562_s14 }
  0x95   : > { %1407 = vrot.lane.b32.xlu1 %v1403_v16, %s4478_s19  ;;  %v527_v13 = vsel %vm4479_vm1, %v526_v32, %v522_v8  ;;  %v3405_v48 = vsel %vm4480_vm4, %v526_v32, %v523_v44  ;;  %v620_v0 = vsel %vm4481_vm2, %v618_v47, %v615_v12  ;;  %vm4482_vm5 = vcmp.eq.s32.totalorder %v2909_v14, 3 }
  0x96   : > { %530 = vst.msk [vmem:[#allocation2] sm:$0xff] %vm529_vm12, %v527_v13  ;;  %531 = vst.msk [vmem:[#allocation2 + $0x8] sm:$0xff] %vm529_vm12, %v3405_v48  ;;  %v3415_v17 = vsel %vm4482_vm5, %v623_v49, %v620_v0  ;;  %vm4483_vm6 = vcmp.eq.s32.totalorder %v2952_v25, 0  ;;  %v705_v2 = vstv %s3339_s26  ;;  %v710_v4 = vstv %s3341_s18  ;;  %1409 = vrot.lane.b32.xlu0 %v1404_v24, %s4478_s19  ;;  %s3672_s26 = scalar_lea.vmem [#allocation13], %s3562_s14  ;;  %s3688_s18 = scalar_lea.vmem [#allocation15], %s3562_s14 }
  0x97   : > { %v609_v1 = vsel %vm4483_vm6, %v608_v37, 0.0  ;;  %628 = vst.msk [vmem:[#allocation2 + $0x38] sm:$0xff] %vm529_vm12, %v3415_v17  ;;  %vm4484_vm8 = vcmp.eq.s32.totalorder %v2952_v25, 1  ;;  %vm4485_vm0 = vcmp.eq.s32.totalorder %v3012_v39, 0  ;;  %v715_v6 = vstv %s3354_s16  ;;  %s4087_s16 = sshll.u32 %s2722_s13, 8 }
  0x98   : > { %v614_v52 = vsel %vm4484_vm8, %v613_v41, %v609_v1  ;;  %v707_v3 = vsel %vm4485_vm0, %v705_v2, 0.0  ;;  %v720_v14 = vstv %s3356_s27  ;;  %vm4486_vm1 = vcmp.eq.s32.totalorder %v2952_v25, 2  ;;  %s2641_s27 = smov 1   ;;  %s4096_s14 = scalar_lea.hbm %s4402_s6, %s4087_s16 }
  0x99   : > { %v619_v54 = vsel %vm4486_vm1, %v618_v47, %v614_v52  ;;  %vm4487_vm4 = vcmp.eq.s32.totalorder %v3012_v39, 1  ;;  %vm4488_vm2 = vcmp.eq.s32.totalorder %v3058_v51, 0  ;;  %vm4489_vm5 = vcmp.eq.s32.totalorder %v3117_v7, 0  ;;  %1437 = vrot.lane.b32.xlu1 %v1433_v29, %s4476_s20 }
  0x9a   : > { %v712_v55 = vsel %vm4487_vm4, %v710_v4, %v707_v3  ;;  %v706_v27 = vsel %vm4488_vm2, %v705_v2, 0.0  ;;  %v1205_v60 = vsel %vm4489_vm5, %v511_v23, 0.0  ;;  %vm4490_vm6 = vcmp.eq.s32.totalorder %v2952_v25, 3  ;;  %1439 = vrot.lane.b32.xlu0 %v1434_v35, %s4476_s20 }
  0x9b   : > { %v624_v28 = vsel %vm4490_vm6, %v623_v49, %v619_v54  ;;  %vm4491_vm8 = vcmp.eq.s32.totalorder %v3012_v39, 2  ;;  %vm4492_vm0 = vcmp.eq.s32.totalorder %v3058_v51, 1  ;;  %vm4493_vm1 = vcmp.eq.s32.totalorder %v3117_v7, 1 }
  0x9c   : > { %v717_v61 = vsel %vm4491_vm8, %v715_v6, %v712_v55  ;;  %v711_v62 = vsel %vm4492_vm0, %v710_v4, %v706_v27  ;;  %v1209_v31 = vsel %vm4493_vm1, %v516_v5, %v1205_v60  ;;  %627 = vst.msk [vmem:[#allocation2 + $0x30] sm:$0xff] %vm529_vm12, %v624_v28  ;;  %vm4494_vm4 = vcmp.eq.s32.totalorder %v3012_v39, 3 }
  0x9d   : > { %v3450_v63 = vsel %vm4494_vm4, %v720_v14, %v717_v61  ;;  %vm4495_vm2 = vcmp.eq.s32.totalorder %v3058_v51, 2  ;;  %vm4496_vm5 = vcmp.eq.s32.totalorder %v3117_v7, 2  ;;  %vm4497_vm6 = vcmp.eq.s32.totalorder %v3145_v21, 0  ;;  %v3483_v16 = vld [vmem:[#allocation2] sm:$0xff]  ;;  %v3489_v50 = vld [vmem:[#allocation2 + $0x8] sm:$0xff] }
  0x9e   : > { %v716_v38 = vsel %vm4495_vm2, %v715_v6, %v711_v62  ;;  %v1213_v25 = vsel %vm4496_vm5, %v521_v30, %v1209_v31  ;;  %v1206_v33 = vsel %vm4497_vm6, %v511_v23, 0.0  ;;  %725 = vst.msk [vmem:[#allocation2 + $0x68] sm:$0xff] %vm529_vm12, %v3450_v63  ;;  %vm4498_vm8 = vcmp.eq.s32.totalorder %v3058_v51, 3 }
  0x9f   : > { %v3463_v9 = vsel %vm4498_vm8, %v720_v14, %v716_v38  ;;  %vm4499_vm0 = vcmp.eq.s32.totalorder %v3117_v7, 3  ;;  %vm4500_vm1 = vcmp.eq.s32.totalorder %v3145_v21, 1  ;;  %vm4501_vm4 = vcmp.eq.s32.totalorder %v3175_v34, 0 }
  0xa0   : > { %v3467_v39 = vsel %vm4499_vm0, %v526_v32, %v1213_v25  ;;  %v1210_v42 = vsel %vm4500_vm1, %v516_v5, %v1206_v33  ;;  %v1287_v10 = vsel %vm4501_vm4, %v608_v37, 0.0  ;;  %724 = vst.msk [vmem:[#allocation2 + $0x60] sm:$0xff] %vm529_vm12, %v3463_v9  ;;  %vm4502_vm2 = vcmp.eq.s32.totalorder %v3145_v21, 2 }
  0xa1   : > { %v1214_v43 = vsel %vm4502_vm2, %v521_v30, %v1210_v42  ;;  %vm4503_vm5 = vcmp.eq.s32.totalorder %v3175_v34, 1  ;;  %vm4504_vm6 = vcmp.eq.s32.totalorder %v3208_v45, 0  ;;  %v1369_v46 = vsel %vm1389_vm9, %v705_v2, 0.0  ;;  %1219 = vst.msk [vmem:[#allocation2] sm:$0xff] %vm529_vm12, %v3467_v39 }
  0xa2   : > { %v1291_v51 = vsel %vm4503_vm5, %v613_v41, %v1287_v10  ;;  %v1288_v7 = vsel %vm4504_vm6, %v608_v37, 0.0  ;;  %vm4505_vm8 = vcmp.eq.s32.totalorder %v3145_v21, 3  ;;  %vm4506_vm0 = vcmp.eq.s32.totalorder %v3175_v34, 2 }
  0xa3   : > { %v3487_v18 = vsel %vm4505_vm8, %v526_v32, %v1214_v43  ;;  %v1295_v20 = vsel %vm4506_vm0, %v618_v47, %v1291_v51  ;;  %vm4507_vm1 = vcmp.eq.s32.totalorder %v3208_v45, 1  ;;  %v1373_v22 = vsel %vm1393_vm11, %v710_v4, %v1369_v46 }
  0xa4   : > { %v1292_v56 = vsel %vm4507_vm1, %v613_v41, %v1288_v7  ;;  %1220 = vst.msk [vmem:[#allocation2 + $0x8] sm:$0xff] %vm529_vm12, %v3487_v18  ;;  %vm4508_vm9 = vcmp.eq.s32.totalorder %v3175_v34, 3  ;;  %vm4509_vm4 = vcmp.eq.s32.totalorder %v3208_v45, 2  ;;  %v1377_v24 = vsel %vm1397_vm14, %v715_v6, %v1373_v22 }
  0xa5   : > { %v3503_v21 = vsel %vm4508_vm9, %v623_v49, %v1295_v20  ;;  %v1296_v23 = vsel %vm4509_vm4, %v618_v47, %v1292_v56  ;;  %v1370_v57 = vsel %vm1390_vm15, %v705_v2, 0.0  ;;  %vm4510_vm11 = vcmp.eq.s32.totalorder %v3208_v45, 3 }
  0xa6   : > { %v3513_v26 = vsel %vm4510_vm11, %v623_v49, %v1296_v23  ;;  %v3517_v5 = vsel %vm1401_vm3, %v720_v14, %v1377_v24  ;;  %v1374_v34 = vsel %vm1394_vm13, %v710_v4, %v1370_v57  ;;  %vm496_vm3 = vcmask 146432  }
  0xa7   : > { %v1378_v29 = vsel %vm1398_vm10, %v715_v6, %v1374_v34  ;;  %vm852_vm10 = vcmask 138248  }
  0xa8   : > { %v3525_v59 = vsel %vm1402_vm7, %v720_v14, %v1378_v29  ;;  %vm499_vm7 = vcmask 140288  }
  0xdf   : > { %v594_v30 = vpop.permute.xlu1 %593 }
  0xe0   : > { %600 = vst.msk [vmem:[#allocation2 + $0x20] sm:$0xff] %vm529_vm12, %v594_v30  ;;  %v559_v45 = vpop.permute.xlu0 %558 }
  0xe1   : > { %565 = vst.msk [vmem:[#allocation2 + $0x10] sm:$0xff] %vm529_vm12, %v559_v45  ;;  %v567_v32 = vadd.f32 %v559_v45, %v527_v13 }
  0xe3   : > { %v596_v53 = vpop.permute.xlu1 %595  ;;  %v602_v11 = vadd.f32 %v594_v30, %v567_v32 }
  0xe4   : > { %601 = vst.msk [vmem:[#allocation2 + $0x28] sm:$0xff] %vm529_vm12, %v596_v53  ;;  %v561_v35 = vpop.permute.xlu0 %560 }
  0xe5   : > { %566 = vst.msk [vmem:[#allocation2 + $0x18] sm:$0xff] %vm529_vm12, %v561_v35  ;;  %v568_v36 = vadd.f32 %v561_v35, %v3405_v48  ;;  %v629_v41 = vadd.f32 %v624_v28, %v602_v11 }
  0xe7   : > { %v658_v37 = vpop.permute.xlu1 %657  ;;  %v603_v58 = vadd.f32 %v596_v53, %v568_v36  ;;  %v925_v44 = vld [vmem:[#allocation2 + $0x20] sm:$0xff] }
  0xe8   : > { %663 = vst.msk [vmem:[#allocation2 + $0x48] sm:$0xff] %vm529_vm12, %v658_v37  ;;  %v656_v40 = vpop.permute.xlu0 %655  ;;  %v879_v15 = vld [vmem:[#allocation2 + $0x10] sm:$0xff] }
  0xe9   : > { %v630_v19 = vadd.f32 %v3415_v17, %v603_v58  ;;  %662 = vst.msk [vmem:[#allocation2 + $0x40] sm:$0xff] %vm529_vm12, %v656_v40  ;;  %883 = vrot.lane.b32.xlu0 %v879_v15, %s2641_s27  ;;  %v664_v47 = vadd.f32 %v656_v40, %v629_v41 }
  0xeb   : > { %v693_v8 = vpop.permute.xlu1 %692  ;;  %v665_v12 = vadd.f32 %v658_v37, %v630_v19  ;;  %v926_v1 = vld [vmem:[#allocation2 + $0x28] sm:$0xff] }
  0xec   : > { %698 = vst.msk [vmem:[#allocation2 + $0x58] sm:$0xff] %vm529_vm12, %v693_v8  ;;  %v691_v13 = vpop.permute.xlu0 %690  ;;  %v880_v48 = vld [vmem:[#allocation2 + $0x18] sm:$0xff] }
  0xed   : > { %v700_v0 = vadd.f32 %v693_v8, %v665_v12  ;;  %697 = vst.msk [vmem:[#allocation2 + $0x50] sm:$0xff] %vm529_vm12, %v691_v13  ;;  %v699_v49 = vadd.f32 %v691_v13, %v664_v47  ;;  %929 = vrot.lane.b32.xlu0 %v925_v44, %s2642_s4  ;;  %885 = vrot.lane.b32.xlu1 %v880_v48, %s2641_s27 }
  0xef   : > { %v755_v17 = vpop.permute.xlu1 %754  ;;  %v727_v2 = vadd.f32 %v3450_v63, %v700_v0  ;;  %v726_v4 = vadd.f32 %v3463_v9, %v699_v49  ;;  %v992_v54 = vld [vmem:[#allocation2 + $0x48] sm:$0xff] }
  0xf0   : > { %760 = vst.msk [vmem:[#allocation2 + $0x78] sm:$0xff] %vm529_vm12, %v755_v17  ;;  %v753_v52 = vpop.permute.xlu0 %752  ;;  %v991_v3 = vld [vmem:[#allocation2 + $0x40] sm:$0xff] }
  0xf1   : > { %v762_v6 = vadd.f32 %v755_v17, %v727_v2  ;;  %759 = vst.msk [vmem:[#allocation2 + $0x70] sm:$0xff] %vm529_vm12, %v753_v52  ;;  %931 = vrot.lane.b32.xlu1 %v926_v1, %s2642_s4  ;;  %995 = vrot.lane.b32.xlu0 %v991_v3, %s2641_s27  ;;  %v761_v55 = vadd.f32 %v753_v52, %v726_v4 }
  0xf3   : > { %v790_v14 = vpop.permute.xlu1 %789  ;;  %v1038_v63 = vld [vmem:[#allocation2 + $0x58] sm:$0xff] }
  0xf4   : > { %795 = vst.msk [vmem:[#allocation2 + $0x88] sm:$0xff] %vm529_vm12, %v790_v14  ;;  %v3547_v27 = vadd.f32 %v790_v14, %v762_v6  ;;  %v788_v60 = vpop.permute.xlu0 %787  ;;  %v1037_v28 = vld [vmem:[#allocation2 + $0x50] sm:$0xff] }
  0xf5   : > { %794 = vst.msk [vmem:[#allocation2 + $0x80] sm:$0xff] %vm529_vm12, %v788_v60  ;;  %v3551_v62 = vadd.f32 %v788_v60, %v761_v55  ;;  %997 = vrot.lane.b32.xlu1 %v992_v54, %s2641_s27  ;;  %1041 = vrot.lane.b32.xlu0 %v1037_v28, %s2642_s4  ;;  %v2643_v54 = vmov 0.0  }
  0xf6   : > { %v2280_v61 = vadd.f32 -1.0, %v3547_v27  ;;  %v811_v17 = vsub.f32 1.0, %v3547_v27  ;;  %497 = vst.msk [vmem:[#allocation3] sm:$0xff] %vm496_vm3, %v2643_v54  ;;  %498 = vst.msk [vmem:[#allocation3 + $0x8] sm:$0xff] %vm496_vm3, %v2643_v54 }
  0xf7   : > { %v1244_v31 = vpop.permute.xlu1 %1243  ;;  %v1104_v38 = vld [vmem:[#allocation2 + $0x78] sm:$0xff]  ;;  %v2279_v33 = vadd.f32 -1.0, %v3551_v62  ;;  %v810_v13 = vsub.f32 1.0, %v3551_v62  ;;  %501 = vst.msk [vmem:[#allocation3 + $0x18] sm:$0xff] %vm496_vm3, %v2643_v54  ;;  %502 = vst.msk [vmem:[#allocation3 + $0x20] sm:$0xff] %vm496_vm3, %v2643_v54 }
  0xf8   : > { %v801_v25 = vmax.f32 %v2280_v61, 0.0  ;;  %1249 = vst.msk [vmem:[#allocation2 + $0x10] sm:$0xff] %vm529_vm12, %v1244_v31  ;;  %v1251_v9 = vadd.f32 %v1244_v31, %v3467_v39  ;;  %v1246_v42 = vpop.permute.xlu0 %1245  ;;  %v1103_v20 = vld [vmem:[#allocation2 + $0x70] sm:$0xff]  ;;  %v813_v28 = vmax.f32 %v811_v17, 0.0 }
  0xf9   : > { %v800_v43 = vmax.f32 %v2279_v33, 0.0  ;;  %1250 = vst.msk [vmem:[#allocation2 + $0x18] sm:$0xff] %vm529_vm12, %v1246_v42  ;;  %1043 = vrot.lane.b32.xlu1 %v1038_v63, %s2642_s4  ;;  %1109 = vrot.lane.b32.xlu0 %v1104_v38, %s2641_s27  ;;  %v1252_v51 = vadd.f32 %v1246_v42, %v3487_v18  ;;  %v3601_v3 = vmax.f32 %v810_v13, 0.0 }
  0xfa   : > { %v803_v10 = vsub.f32 1.0, %v801_v25  ;;  %504 = vst.msk [vmem:[#allocation3 + $0x30] sm:$0xff] %vm496_vm3, %v2643_v54  ;;  %505 = vst.msk [vmem:[#allocation3 + $0x38] sm:$0xff] %vm496_vm3, %v2643_v54 }
  0xfb   : > { %v1274_v7 = vpop.permute.xlu1 %1273  ;;  %v1150_v46 = vld [vmem:[#allocation2 + $0x88] sm:$0xff]  ;;  %v802_v22 = vsub.f32 1.0, %v800_v43  ;;  %500 = vst.msk [vmem:[#allocation3 + $0x10] sm:$0x3] %vm499_vm7, %v2643_v54  ;;  %503 = vst.msk [vmem:[#allocation3 + $0x28] sm:$0x3] %vm499_vm7, %v2643_v54 }
  0xfc   : > { %v3565_v56 = vmax.f32 %v803_v10, 0.0  ;;  %1279 = vst.msk [vmem:[#allocation2 + $0x20] sm:$0xff] %vm529_vm12, %v1274_v7  ;;  %v1281_v39 = vadd.f32 %v1274_v7, %v1251_v9  ;;  %v1276_v23 = vpop.permute.xlu0 %1275  ;;  %v1149_v30 = vld [vmem:[#allocation2 + $0x80] sm:$0xff]  ;;  %v814_v25 = vsub.f32 1.0, %v3601_v3 }
  0xfd   : > { %v3569_v57 = vmax.f32 %v802_v22, 0.0  ;;  %1280 = vst.msk [vmem:[#allocation2 + $0x28] sm:$0xff] %vm529_vm12, %v1276_v23  ;;  %v1282_v34 = vadd.f32 %v1276_v23, %v1252_v51  ;;  %1155 = vrot.lane.b32.xlu0 %v1150_v46, %s2642_s4  ;;  %1107 = vrot.lane.b32.xlu1 %v1103_v20, %s2641_s27  ;;  %v815_v51 = vsub.f32 1.0, %v813_v28 }
  0xfe   : > { %v807_v24 = vsub.f32 1.0, %v3565_v56  ;;  %v1303_v18 = vadd.f32 %v3503_v21, %v1281_v39  ;;  %506 = vst.msk [vmem:[#allocation3 + $0x40] sm:$0x3] %vm499_vm7, %v2643_v54  ;;  %v1470_v54 = vld [vmem:[%s2840_s11 + $0x28] sm:$0xff] }
  0xff   : > { %v1326_v29 = vpop.permute.xlu1 %1325  ;;  %v806_v45 = vsub.f32 1.0, %v3569_v57  ;;  %v1304_v32 = vadd.f32 %v3513_v26, %v1282_v34  ;;  %v1527_v58 = vld [vmem:[#allocation2 + $0x10] sm:$0xff] }
 0x100   : > { %1331 = vst.msk [vmem:[#allocation2 + $0x40] sm:$0xff] %vm529_vm12, %v1326_v29  ;;  %809 = vst.msk [vmem:[%s3579_s23 + $0x8] sm:$0xff] %vm529_vm12, %v807_v24  ;;  %v1333_v53 = vadd.f32 %v1326_v29, %v1303_v18  ;;  %v1328_v35 = vpop.permute.xlu0 %1327  ;;  %v1528_v11 = vld [vmem:[#allocation2 + $0x18] sm:$0xff]  ;;  %v816_v24 = vld [vmem:[%s3613_s25] sm:$0xff] }
 0x101   : > { %1332 = vst.msk [vmem:[#allocation2 + $0x48] sm:$0xff] %vm529_vm12, %v1328_v35  ;;  %v1334_v36 = vadd.f32 %v1328_v35, %v1304_v32  ;;  %1153 = vrot.lane.b32.xlu1 %v1149_v30, %s2642_s4  ;;  %1533 = vrot.lane.b32.xlu0 %v1528_v11, %s2641_s27  ;;  %808 = vst.msk [vmem:[%s3579_s23] sm:$0xff] %vm529_vm12, %v806_v45  ;;  %v3623_v32 = vld [vmem:[#allocation2 + $0x30] sm:$0xff]  ;;  %v822_v11 = vmul.f32 %v816_v24, %v3569_v57 }
 0x102   : > { %1301 = vst.msk [vmem:[#allocation2 + $0x30] sm:$0xff] %vm529_vm12, %v3503_v21 }
 0x103   : > { %v1356_v37 = vpop.permute.xlu1 %1355  ;;  %v1573_v12 = vld [vmem:[#allocation2 + $0x20] sm:$0xff] }
 0x104   : > { %1361 = vst.msk [vmem:[#allocation2 + $0x50] sm:$0xff] %vm529_vm12, %v1356_v37  ;;  %v1363_v40 = vadd.f32 %v1356_v37, %v1333_v53  ;;  %v1358_v15 = vpop.permute.xlu0 %1357  ;;  %v1574_v19 = vld [vmem:[#allocation2 + $0x28] sm:$0xff]  ;;  %v818_v37 = vld [vmem:[%s3613_s25 + $0x10] sm:$0xff] }
 0x105   : > { %1362 = vst.msk [vmem:[#allocation2 + $0x58] sm:$0xff] %vm529_vm12, %v1358_v15  ;;  %v1364_v41 = vadd.f32 %v1358_v15, %v1334_v36  ;;  %1531 = vrot.lane.b32.xlu1 %v1527_v58, %s2641_s27  ;;  %1579 = vrot.lane.b32.xlu0 %v1574_v19, %s2642_s4  ;;  %v817_v36 = vld [vmem:[%s3613_s25 + $0x8] sm:$0xff]  ;;  %v3640_v58 = vld [vmem:[#allocation2 + $0x38] sm:$0xff]  ;;  %v820_v19 = vld [vmem:[%s3613_s25 + $0x20] sm:$0xff] }
 0x106   : > { %v1385_v8 = vadd.f32 %v3517_v5, %v1363_v40  ;;  %v823_v21 = vmul.f32 %v817_v36, %v3565_v56  ;;  %v824_v40 = vmul.f32 %v818_v37, %v3569_v57  ;;  %1302 = vst.msk [vmem:[#allocation2 + $0x38] sm:$0xff] %vm529_vm12, %v3513_v26  ;;  %v819_v15 = vld [vmem:[%s3613_s25 + $0x18] sm:$0xff]  ;;  %v821_v26 = vld [vmem:[%s3613_s25 + $0x28] sm:$0xff]  ;;  %s2449_s25 = scalar_lea.vmem %s2448_s28, 512 }
 0x107   : > { %v1408_v44 = vpop.permute.xlu1 %1407  ;;  %v1386_v47 = vadd.f32 %v3525_v59, %v1364_v41  ;;  %v1639_v2 = vld [vmem:[#allocation2 + $0x40] sm:$0xff]  ;;  %v827_v17 = vmul.f32 %v821_v26, %v3565_v56 }
 0x108   : > { %1413 = vst.msk [vmem:[#allocation2 + $0x70] sm:$0xff] %vm529_vm12, %v1408_v44  ;;  %v1410_v48 = vpop.permute.xlu0 %1409  ;;  %v1640_v0 = vld [vmem:[#allocation2 + $0x48] sm:$0xff]  ;;  %v1415_v49 = vadd.f32 %v1408_v44, %v1385_v8  ;;  %v3650_v41 = vld [vmem:[#allocation2 + $0x60] sm:$0xff]  ;;  %v825_v8 = vmul.f32 %v819_v15, %v3565_v56  ;;  %v826_v44 = vmul.f32 %v820_v19, %v3569_v57 }
 0x109   : > { %1414 = vst.msk [vmem:[#allocation2 + $0x78] sm:$0xff] %vm529_vm12, %v1410_v48  ;;  %1577 = vrot.lane.b32.xlu1 %v1573_v12, %s2642_s4  ;;  %1645 = vrot.lane.b32.xlu0 %v1640_v0, %s2641_s27  ;;  %v1416_v4 = vadd.f32 %v1410_v48, %v1386_v47  ;;  %1383 = vst.msk [vmem:[#allocation2 + $0x60] sm:$0xff] %vm529_vm12, %v3517_v5  ;;  %v1843_v12 = vadd.f32 1e-05, %v814_v25  ;;  %v1466_v47 = vld [vmem:[%s2840_s11 + $0x8] sm:$0xff]  ;;  %v1468_v5 = vld [vmem:[%s2840_s11 + $0x18] sm:$0xff] }
 0x10a   : > { %v1844_v48 = vadd.f32 1e-05, %v815_v51  ;;  %v3679_v56 = vld [vmem:[#allocation2 + $0x68] sm:$0xff] }
 0x10b   : > { %v1438_v1 = vpop.permute.xlu1 %1437  ;;  %v1685_v61 = vld [vmem:[#allocation2 + $0x50] sm:$0xff]  ;;  %1384 = vst.msk [vmem:[#allocation2 + $0x68] sm:$0xff] %vm529_vm12, %v3525_v59 }
 0x10c   : > { %1443 = vst.msk [vmem:[#allocation2 + $0x80] sm:$0xff] %vm529_vm12, %v1438_v1  ;;  %v1445_v52 = vadd.f32 %v1438_v1, %v1415_v49  ;;  %v1440_v6 = vpop.permute.xlu0 %1439  ;;  %v1686_v14 = vld [vmem:[#allocation2 + $0x58] sm:$0xff] }
 0x10d   : > { %1444 = vst.msk [vmem:[#allocation2 + $0x88] sm:$0xff] %vm529_vm12, %v1440_v6  ;;  %v1446_v60 = vadd.f32 %v1440_v6, %v1416_v4  ;;  %1643 = vrot.lane.b32.xlu1 %v1639_v2, %s2641_s27  ;;  %1691 = vrot.lane.b32.xlu0 %v1686_v14, %s2642_s4  ;;  %v1465_v1 = vld [vmem:[%s2840_s11] sm:$0xff]  ;;  %v1467_v14 = vld [vmem:[%s2840_s11 + $0x10] sm:$0xff] }
 0x10e   : > { %v2281_v55 = vadd.f32 -1.0, %v1445_v52  ;;  %v1459_v27 = vsub.f32 1.0, %v1445_v52 }
 0x10f   : > { %v2282_v63 = vadd.f32 -1.0, %v1446_v60  ;;  %v1460_v38 = vsub.f32 1.0, %v1446_v60  ;;  %v1751_v7 = vld [vmem:[#allocation2 + $0x70] sm:$0xff]  ;;  %v1469_v60 = vld [vmem:[%s2840_s11 + $0x20] sm:$0xff]  ;;  %s4454_s11 = sand.u32 1, %s2722_s13  }
 0x110   : > { %v1449_v62 = vmax.f32 %v2281_v55, 0.0  ;;  %v1461_v31 = vmax.f32 %v1459_v27, 0.0  ;;  %v1752_v33 = vld [vmem:[#allocation2 + $0x78] sm:$0xff]  ;;  %s4104_s29 = scalar_lea.sflag [#allocation11], %s4454_s11 }
 0x111   : > { %v1450_v10 = vmax.f32 %v2282_v63, 0.0  ;;  %v1462_v43 = vmax.f32 %v1460_v38, 0.0  ;;  %1689 = vrot.lane.b32.xlu1 %v1685_v61, %s2642_s4  ;;  %1757 = vrot.lane.b32.xlu0 %v1752_v33, %s2641_s27 }
 0x112   : > { %v1451_v9 = vsub.f32 1.0, %v1449_v62  ;;  %v1463_v42 = vsub.f32 1.0, %v1461_v31 }
 0x113   : > { %v1452_v22 = vsub.f32 1.0, %v1450_v10  ;;  %v1464_v39 = vsub.f32 1.0, %v1462_v43  ;;  %v1797_v45 = vld [vmem:[#allocation2 + $0x80] sm:$0xff] }
 0x114   : > { %v3615_v46 = vmax.f32 %v1451_v9, 0.0  ;;  %v1845_v20 = vadd.f32 %v1463_v42, %v814_v25  ;;  %v1798_v23 = vld [vmem:[#allocation2 + $0x88] sm:$0xff] }
 0x115   : > { %v3619_v29 = vmax.f32 %v1452_v22, 0.0  ;;  %v1846_v30 = vadd.f32 %v1464_v39, %v815_v51  ;;  %1755 = vrot.lane.b32.xlu1 %v1751_v7, %s2641_s27  ;;  %1803 = vrot.lane.b32.xlu0 %v1798_v23, %s2642_s4 }
 0x116   : > { %v1455_v34 = vsub.f32 1.0, %v3615_v46  ;;  %v1847_v18 = vadd.f32 2e-05, %v1845_v20  ;;  %v1471_v3 = vmul.f32 %v1465_v1, %v3615_v46  ;;  %v1473_v55 = vmul.f32 %v1467_v14, %v3615_v46 }
 0x117   : > { %v1456_v53 = vsub.f32 1.0, %v3619_v29  ;;  %v1848_v35 = vadd.f32 2e-05, %v1846_v30  ;;  %v1472_v57 = vmul.f32 %v1466_v47, %v3619_v29  ;;  %v1474_v6 = vmul.f32 %v1468_v5, %v3619_v29 }
 0x118   : > { %2394 = vrcp.f32 %v1847_v18  ;;  %1457 = vst.msk [vmem:[%s3630_s24] sm:$0xff] %vm529_vm12, %v1455_v34  ;;  %v1476_v27 = vmul.f32 %v1470_v54, %v3619_v29  ;;  %v1475_v59 = vmul.f32 %v1469_v60, %v3615_v46 }
 0x119   : > { %2396 = vrcp.f32 %v1848_v35  ;;  %1801 = vrot.lane.b32.xlu1 %v1797_v45, %s2642_s4  ;;  %834 = vrot.lane.b32.xlu0 %v822_v11, %s2641_s27  ;;  %1458 = vst.msk [vmem:[%s3630_s24 + $0x8] sm:$0xff] %vm529_vm12, %v1456_v53 }
 0x11d   : > { %836 = vrot.lane.b32.xlu1 %v823_v21, %s2641_s27  ;;  %838 = vrot.lane.b32.xlu0 %v824_v40, %s2641_s27 }
 0x121   : > { %840 = vrot.lane.b32.xlu1 %v825_v8, %s2641_s27  ;;  %842 = vrot.lane.b32.xlu0 %v826_v44, %s2641_s27 }
 0x122   : > { %v2395_v13 = vpop.eup %2394 }
 0x123   : > { %v3660_v0 = vmul.f32 %v2395_v13, %v1843_v12  ;;  %v2397_v49 = vpop.eup %2396 }
 0x124   : > { %v3669_v4 = vmul.f32 %v2397_v49, %v1844_v48 }
 0x125   : > { %v3667_v2 = vsub.f32 1.0, %v3660_v0  ;;  %1853 = vst.msk [vmem:[%s3672_s26] sm:$0xff] %vm529_vm12, %v3660_v0  ;;  %844 = vrot.lane.b32.xlu1 %v827_v17, %s2641_s27  ;;  %1485 = vrot.lane.b32.xlu0 %v1472_v57, %s2641_s27 }
 0x126   : > { %4511 = vst [vmem:[#allocation23_spill] sm:$0xff] %v3669_v4  ;;  %v3682_v52 = vsub.f32 1.0, %v3669_v4  ;;  %1854 = vst.msk [vmem:[%s3672_s26 + $0x8] sm:$0xff] %vm529_vm12, %v3669_v4 }
 0x127   : > { %1857 = vst.msk [vmem:[%s3688_s18] sm:$0xff] %vm529_vm12, %v3667_v2 }
 0x128   : > { %4512 = vst [vmem:[#allocation24_spill] sm:$0xff] %v3682_v52  ;;  %1858 = vst.msk [vmem:[%s3688_s18 + $0x8] sm:$0xff] %vm529_vm12, %v3682_v52 }
 0x129   : > { %1483 = vrot.lane.b32.xlu1 %v1471_v3, %s2641_s27  ;;  %1489 = vrot.lane.b32.xlu0 %v1474_v6, %s2641_s27 }
 0x12d   : > { %1487 = vrot.lane.b32.xlu1 %v1473_v55, %s2641_s27  ;;  %1493 = vrot.lane.b32.xlu0 %v1476_v27, %s2641_s27 }
 0x131   : > { %1491 = vrot.lane.b32.xlu1 %v1475_v59, %s2641_s27 }
 0x15b   : > { %v884_v28 = vpop.permute.xlu0 %883 }
 0x15f   : > { %v3711_v61 = vpop.permute.xlu1 %885  ;;  %v3713_v62 = vpop.permute.xlu0 %929 }
 0x163   : > { %v3715_v31 = vpop.permute.xlu1 %931  ;;  %v3717_v63 = vpop.permute.xlu0 %995 }
 0x167   : > { %v3719_v38 = vpop.permute.xlu1 %997  ;;  %v3721_v25 = vpop.permute.xlu0 %1041 }
 0x16b   : > { %v3723_v33 = vpop.permute.xlu1 %1043  ;;  %v3725_v9 = vpop.permute.xlu0 %1109 }
 0x16f   : > { %v3727_v42 = vpop.permute.xlu1 %1107  ;;  %v3729_v10 = vpop.permute.xlu0 %1155 }
 0x173   : > { %v3731_v43 = vpop.permute.xlu1 %1153  ;;  %v3733_v51 = vpop.permute.xlu0 %1533 }
 0x177   : > { %v3735_v7 = vpop.permute.xlu1 %1531  ;;  %v3737_v46 = vpop.permute.xlu0 %1579 }
 0x17b   : > { %v3739_v20 = vpop.permute.xlu1 %1577  ;;  %v3741_v22 = vpop.permute.xlu0 %1645 }
 0x17f   : > { %v3743_v39 = vpop.permute.xlu1 %1643  ;;  %v3745_v23 = vpop.permute.xlu0 %1691 }
 0x183   : > { %v3747_v24 = vpop.permute.xlu1 %1689  ;;  %v3749_v34 = vpop.permute.xlu0 %1757 }
 0x187   : > { %v3751_v18 = vpop.permute.xlu1 %1755  ;;  %v3753_v29 = vpop.permute.xlu0 %1803 }
 0x18b   : > { %v3755_v30 = vpop.permute.xlu1 %1801  ;;  %v835_v45 = vpop.permute.xlu0 %834 }
 0x18c   : > { %853 = vst.msk [vmem:[#allocation3 + $0x1] sm:$0xff] %vm852_vm10, %v835_v45 }
 0x18f   : > { %v837_v53 = vpop.permute.xlu1 %836  ;;  %v839_v35 = vpop.permute.xlu0 %838 }
 0x190   : > { %854 = vst.msk [vmem:[#allocation3 + $0x9] sm:$0xff] %vm852_vm10, %v837_v53  ;;  %855 = vst.msk [vmem:[#allocation3 + $0x19] sm:$0xff] %vm852_vm10, %v839_v35 }
 0x193   : > { %v841_v11 = vpop.permute.xlu1 %840  ;;  %v843_v36 = vpop.permute.xlu0 %842  ;;  %v3760_v37 = vld [vmem:[#allocation3] sm:$0xff] }
 0x194   : > { %856 = vst.msk [vmem:[#allocation3 + $0x21] sm:$0xff] %vm852_vm10, %v841_v11  ;;  %857 = vst.msk [vmem:[#allocation3 + $0x31] sm:$0xff] %vm852_vm10, %v843_v36  ;;  %v889_v21 = vmul.f32 %v884_v28, %v3760_v37  ;;  %v3783_v48 = vld [vmem:[#allocation3 + $0x1] sm:$0xff]  ;;  %v935_v35 = vmul.f32 %v3713_v62, %v3760_v37 }
 0x196   : > { %901 = vrot.lane.b32.xlu0 %v889_v21, %s4478_s19 }
 0x197   : > { %v845_v40 = vpop.permute.xlu1 %844  ;;  %v1486_v15 = vpop.permute.xlu0 %1485  ;;  %v3766_v19 = vld [vmem:[#allocation3 + $0x8] sm:$0xff]  ;;  %v3768_v8 = vld [vmem:[#allocation3 + $0x18] sm:$0xff] }
 0x198   : > { %v3770_v44 = vld [vmem:[#allocation3 + $0x9] sm:$0xff]  ;;  %858 = vst.msk [vmem:[#allocation3 + $0x39] sm:$0xff] %vm852_vm10, %v845_v40  ;;  %v890_v12 = vmul.f32 %v3711_v61, %v3766_v19  ;;  %v891_v26 = vmul.f32 %v884_v28, %v3768_v8  ;;  %v3802_v55 = vld [vmem:[#allocation3 + $0x19] sm:$0xff]  ;;  %v936_v40 = vmul.f32 %v3715_v31, %v3766_v19 }
 0x199   : > { %v3776_v47 = vld [vmem:[#allocation3 + $0x2] sm:$0xff]  ;;  %v3778_v13 = vld [vmem:[#allocation3 + $0xa] sm:$0xff] }
 0x19a   : > { %1502 = vst.msk [vmem:[#allocation3 + $0x9] sm:$0xff] %vm852_vm10, %v1486_v15  ;;  %903 = vrot.lane.b32.xlu1 %v890_v12, %s4478_s19  ;;  %905 = vrot.lane.b32.xlu0 %v891_v26, %s4478_s19 }
 0x19b   : > { %v1484_v49 = vpop.permute.xlu1 %1483  ;;  %v1490_v17 = vpop.permute.xlu0 %1489  ;;  %v3785_v57 = vld [vmem:[#allocation3 + $0x20] sm:$0xff]  ;;  %v3787_v1 = vld [vmem:[#allocation3 + $0x30] sm:$0xff] }
 0x19c   : > { %v3789_v5 = vld [vmem:[#allocation3 + $0x21] sm:$0xff]  ;;  %v892_v3 = vmul.f32 %v3711_v61, %v3785_v57  ;;  %v893_v6 = vmul.f32 %v884_v28, %v3787_v1  ;;  %1501 = vst.msk [vmem:[#allocation3 + $0x1] sm:$0xff] %vm852_vm10, %v1484_v49  ;;  %v3820_v21 = vld [vmem:[#allocation3 + $0x31] sm:$0xff]  ;;  %v938_v15 = vmul.f32 %v3715_v31, %v3785_v57  ;;  %v939_v12 = vmul.f32 %v3713_v62, %v3787_v1 }
 0x19d   : > { %v3795_v14 = vld [vmem:[#allocation3 + $0x1a] sm:$0xff]  ;;  %v3797_v54 = vld [vmem:[#allocation3 + $0x22] sm:$0xff]  ;;  %v1001_v49 = vmul.f32 %v3717_v63, %v3783_v48 }
 0x19e   : > { %1504 = vst.msk [vmem:[#allocation3 + $0x21] sm:$0xff] %vm852_vm10, %v1490_v17  ;;  %907 = vrot.lane.b32.xlu1 %v892_v3, %s4478_s19  ;;  %909 = vrot.lane.b32.xlu0 %v893_v6, %s4478_s19  ;;  %v1002_v17 = vmul.f32 %v3719_v38, %v3770_v44  ;;  %v1005_v3 = vmul.f32 %v3717_v63, %v3820_v21 }
 0x19f   : > { %v1488_v27 = vpop.permute.xlu1 %1487  ;;  %v1494_v60 = vpop.permute.xlu0 %1493  ;;  %v3804_v59 = vld [vmem:[#allocation3 + $0x38] sm:$0xff] }
 0x1a0   : > { %v3806_v45 = vld [vmem:[#allocation3 + $0x39] sm:$0xff]  ;;  %v894_v53 = vmul.f32 %v3711_v61, %v3804_v59  ;;  %1503 = vst.msk [vmem:[#allocation3 + $0x19] sm:$0xff] %vm852_vm10, %v1488_v27  ;;  %v937_v61 = vmul.f32 %v3713_v62, %v3768_v8  ;;  %v940_v26 = vmul.f32 %v3715_v31, %v3804_v59  ;;  %v1003_v62 = vmul.f32 %v3717_v63, %v3802_v55 }
 0x1a1   : > { %v3808_v28 = vld [vmem:[#allocation3 + $0x32] sm:$0xff]  ;;  %v3815_v11 = vld [vmem:[#allocation3 + $0x3a] sm:$0xff]  ;;  %v1004_v31 = vmul.f32 %v3719_v38, %v3789_v5  ;;  %v1006_v6 = vmul.f32 %v3719_v38, %v3806_v45  ;;  %v1047_v27 = vmul.f32 %v3721_v25, %v3783_v48  ;;  %v1049_v63 = vmul.f32 %v3721_v25, %v3802_v55 }
 0x1a2   : > { %1506 = vst.msk [vmem:[#allocation3 + $0x39] sm:$0xff] %vm852_vm10, %v1494_v60  ;;  %911 = vrot.lane.b32.xlu1 %v894_v53, %s4478_s19  ;;  %947 = vrot.lane.b32.xlu0 %v935_v35, %s4476_s20  ;;  %v1048_v60 = vmul.f32 %v3723_v33, %v3770_v44  ;;  %v1050_v38 = vmul.f32 %v3723_v33, %v3789_v5 }
 0x1a3   : > { %v1492_v36 = vpop.permute.xlu1 %1491  ;;  %v1051_v53 = vmul.f32 %v3721_v25, %v3820_v21  ;;  %v1052_v35 = vmul.f32 %v3723_v33, %v3806_v45  ;;  %v1115_v25 = vmul.f32 %v3727_v42, %v3795_v14  ;;  %v1116_v33 = vmul.f32 %v3725_v9, %v3797_v54 }
 0x1a4   : > { %1505 = vst.msk [vmem:[#allocation3 + $0x31] sm:$0xff] %vm852_vm10, %v1492_v36  ;;  %v1113_v36 = vmul.f32 %v3727_v42, %v3776_v47 }
 0x1a6   : > { %949 = vrot.lane.b32.xlu1 %v936_v40, %s4476_s20  ;;  %951 = vrot.lane.b32.xlu0 %v937_v61, %s4476_s20  ;;  %v1114_v40 = vmul.f32 %v3725_v9, %v3778_v13  ;;  %v1117_v61 = vmul.f32 %v3727_v42, %v3808_v28  ;;  %v1161_v42 = vmul.f32 %v3731_v43, %v3795_v14 }
 0x1a9   : > { %v4035_v52 = vld [vmem:[#allocation3 + $0x3a] sm:$0xff] }
 0x1aa   : > { %953 = vrot.lane.b32.xlu1 %v938_v15, %s4476_s20  ;;  %955 = vrot.lane.b32.xlu0 %v939_v12, %s4476_s20  ;;  %v1118_v15 = vmul.f32 %v3725_v9, %v3815_v11  ;;  %v1159_v12 = vmul.f32 %v3731_v43, %v3776_v47  ;;  %v1162_v9 = vmul.f32 %v3729_v10, %v3797_v54 }
 0x1ae   : > { %957 = vrot.lane.b32.xlu1 %v940_v26, %s4476_s20  ;;  %1013 = vrot.lane.b32.xlu0 %v1001_v49, %s4478_s19  ;;  %v1160_v26 = vmul.f32 %v3729_v10, %v3778_v13  ;;  %v1163_v49 = vmul.f32 %v3731_v43, %v3808_v28 }
 0x1b2   : > { %1015 = vrot.lane.b32.xlu1 %v1002_v17, %s4478_s19  ;;  %1017 = vrot.lane.b32.xlu0 %v1003_v62, %s4478_s19  ;;  %v3905_v17 = vld [vmem:[#allocation3 + $0x8] sm:$0xff]  ;;  %v1164_v62 = vmul.f32 %v3729_v10, %v3815_v11  ;;  %v3925_v10 = vld [vmem:[#allocation3 + $0x38] sm:$0xff] }
 0x1b6   : > { %1019 = vrot.lane.b32.xlu1 %v1004_v31, %s4478_s19  ;;  %1021 = vrot.lane.b32.xlu0 %v1005_v3, %s4478_s19  ;;  %v1538_v31 = vmul.f32 %v3733_v51, %v3905_v17  ;;  %v3913_v3 = vld [vmem:[#allocation3] sm:$0xff] }
 0x1b7   : > { %v1537_v43 = vmul.f32 %v3735_v7, %v3913_v3 }
 0x1ba   : > { %1023 = vrot.lane.b32.xlu1 %v1006_v6, %s4478_s19  ;;  %1059 = vrot.lane.b32.xlu0 %v1047_v27, %s4476_s20  ;;  %v3915_v6 = vld [vmem:[#allocation3 + $0x20] sm:$0xff] }
 0x1bb   : > { %v1540_v27 = vmul.f32 %v3733_v51, %v3915_v6 }
 0x1be   : > { %1061 = vrot.lane.b32.xlu1 %v1048_v60, %s4476_s20  ;;  %1063 = vrot.lane.b32.xlu0 %v1049_v63, %s4476_s20  ;;  %v3923_v60 = vld [vmem:[#allocation3 + $0x18] sm:$0xff] }
 0x1bf   : > { %v1539_v63 = vmul.f32 %v3735_v7, %v3923_v60 }
 0x1c2   : > { %1065 = vrot.lane.b32.xlu1 %v1050_v38, %s4476_s20  ;;  %1067 = vrot.lane.b32.xlu0 %v1051_v53, %s4476_s20  ;;  %v1542_v38 = vmul.f32 %v3733_v51, %v3925_v10  ;;  %v3933_v53 = vld [vmem:[#allocation3 + $0x30] sm:$0xff]  ;;  %v1586_v51 = vmul.f32 %v3737_v46, %v3915_v6 }
 0x1c6   : > { %1069 = vrot.lane.b32.xlu1 %v1052_v35, %s4476_s20  ;;  %1125 = vrot.lane.b32.xlu0 %v1113_v36, %s4478_s19  ;;  %v1541_v35 = vmul.f32 %v3735_v7, %v3933_v53  ;;  %v1584_v36 = vmul.f32 %v3737_v46, %v3905_v17  ;;  %v1585_v7 = vmul.f32 %v3739_v20, %v3923_v60 }
 0x1ca   : > { %1127 = vrot.lane.b32.xlu1 %v1114_v40, %s4478_s19  ;;  %1129 = vrot.lane.b32.xlu0 %v1115_v25, %s4478_s19  ;;  %v1583_v40 = vmul.f32 %v3739_v20, %v3913_v3  ;;  %v1588_v25 = vmul.f32 %v3737_v46, %v3925_v10 }
 0x1ce   : > { %1131 = vrot.lane.b32.xlu1 %v1116_v33, %s4478_s19  ;;  %1133 = vrot.lane.b32.xlu0 %v1117_v61, %s4478_s19  ;;  %v3953_v33 = vld [vmem:[#allocation3 + $0x1] sm:$0xff]  ;;  %v1587_v61 = vmul.f32 %v3739_v20, %v3933_v53  ;;  %v3973_v20 = vld [vmem:[#allocation3 + $0x31] sm:$0xff] }
 0x1d2   : > { %1135 = vrot.lane.b32.xlu1 %v1118_v15, %s4478_s19  ;;  %1171 = vrot.lane.b32.xlu0 %v1159_v12, %s4476_s20  ;;  %v1649_v15 = vmul.f32 %v3743_v39, %v3953_v33  ;;  %v3961_v12 = vld [vmem:[#allocation3 + $0x9] sm:$0xff] }
 0x1d3   : > { %v1650_v46 = vmul.f32 %v3741_v22, %v3961_v12 }
 0x1d6   : > { %1173 = vrot.lane.b32.xlu1 %v1160_v26, %s4476_s20  ;;  %1175 = vrot.lane.b32.xlu0 %v1161_v42, %s4476_s20  ;;  %v3963_v26 = vld [vmem:[#allocation3 + $0x19] sm:$0xff] }
 0x1d7   : > { %v1651_v42 = vmul.f32 %v3743_v39, %v3963_v26 }
 0x1da   : > { %1177 = vrot.lane.b32.xlu1 %v1162_v9, %s4476_s20  ;;  %1179 = vrot.lane.b32.xlu0 %v1163_v49, %s4476_s20  ;;  %v3971_v9 = vld [vmem:[#allocation3 + $0x21] sm:$0xff] }
 0x1db   : > { %v1652_v49 = vmul.f32 %v3741_v22, %v3971_v9 }
 0x1de   : > { %1181 = vrot.lane.b32.xlu1 %v1164_v62, %s4476_s20  ;;  %1551 = vrot.lane.b32.xlu0 %v1538_v31, %s4478_s19  ;;  %v1653_v62 = vmul.f32 %v3743_v39, %v3973_v20  ;;  %v3981_v31 = vld [vmem:[#allocation3 + $0x39] sm:$0xff]  ;;  %v1697_v39 = vmul.f32 %v3747_v24, %v3963_v26 }
 0x1e2   : > { %1549 = vrot.lane.b32.xlu1 %v1537_v43, %s4478_s19  ;;  %1555 = vrot.lane.b32.xlu0 %v1540_v27, %s4478_s19  ;;  %v1654_v43 = vmul.f32 %v3741_v22, %v3981_v31  ;;  %v1695_v27 = vmul.f32 %v3747_v24, %v3953_v33  ;;  %v1698_v22 = vmul.f32 %v3745_v23, %v3971_v9 }
 0x1e6   : > { %1553 = vrot.lane.b32.xlu1 %v1539_v63, %s4478_s19  ;;  %1559 = vrot.lane.b32.xlu0 %v1542_v38, %s4478_s19  ;;  %v1696_v63 = vmul.f32 %v3745_v23, %v3961_v12 }
 0x1ea   : > { %1557 = vrot.lane.b32.xlu1 %v1541_v35, %s4478_s19  ;;  %1597 = vrot.lane.b32.xlu0 %v1584_v36, %s4476_s20  ;;  %v1699_v35 = vmul.f32 %v3747_v24, %v3973_v20  ;;  %v4001_v36 = vld [vmem:[#allocation3 + $0x2] sm:$0xff] }
 0x1ee   : > { %1595 = vrot.lane.b32.xlu1 %v1583_v40, %s4476_s20  ;;  %1601 = vrot.lane.b32.xlu0 %v1586_v51, %s4476_s20 }
 0x1f2   : > { %1599 = vrot.lane.b32.xlu1 %v1585_v7, %s4476_s20  ;;  %1605 = vrot.lane.b32.xlu0 %v1588_v25, %s4476_s20  ;;  %v1700_v7 = vmul.f32 %v3745_v23, %v3981_v31  ;;  %v1761_v25 = vmul.f32 %v3751_v18, %v4001_v36  ;;  %v867_v23 = vmul.f32 %v3483_v16, %v3760_v37 }
 0x1f3   : > { %v868_v37 = vmul.f32 %v3489_v50, %v3766_v19 }
 0x1f6   : > { %1603 = vrot.lane.b32.xlu1 %v1587_v61, %s4476_s20  ;;  %1661 = vrot.lane.b32.xlu0 %v1649_v15, %s4478_s19  ;;  %v4009_v61 = vld [vmem:[#allocation3 + $0xa] sm:$0xff]  ;;  %v4011_v15 = vld [vmem:[#allocation3 + $0x1a] sm:$0xff] }
 0x1fa   : > { %1663 = vrot.lane.b32.xlu1 %v1650_v46, %s4478_s19  ;;  %1665 = vrot.lane.b32.xlu0 %v1651_v42, %s4478_s19  ;;  %v1762_v42 = vmul.f32 %v3749_v34, %v4009_v61 }
 0x1fe   : > { %1667 = vrot.lane.b32.xlu1 %v1652_v49, %s4478_s19  ;;  %1669 = vrot.lane.b32.xlu0 %v1653_v62, %s4478_s19  ;;  %v1763_v49 = vmul.f32 %v3751_v18, %v4011_v15  ;;  %v4021_v62 = vld [vmem:[#allocation3 + $0x22] sm:$0xff] }
 0x202   : > { %1671 = vrot.lane.b32.xlu1 %v1654_v43, %s4478_s19  ;;  %1707 = vrot.lane.b32.xlu0 %v1695_v27, %s4476_s20  ;;  %v4023_v43 = vld [vmem:[#allocation3 + $0x32] sm:$0xff] }
 0x206   : > { %1709 = vrot.lane.b32.xlu1 %v1696_v63, %s4476_s20  ;;  %1711 = vrot.lane.b32.xlu0 %v1697_v39, %s4476_s20 }
 0x208   : > { %v902_v38 = vpop.permute.xlu0 %901 }
 0x209   : > { %v919_v27 = vadd.f32 %v902_v38, %v867_v23  ;;  %v979_v38 = vmul.f32 %v3623_v32, %v3783_v48  ;;  %v980_v48 = vmul.f32 %v3640_v58, %v3770_v44  ;;  %v872_v44 = vmul.f32 %v3489_v50, %v3804_v59 }
 0x20a   : > { %1713 = vrot.lane.b32.xlu1 %v1698_v22, %s4476_s20  ;;  %1715 = vrot.lane.b32.xlu0 %v1699_v35, %s4476_s20  ;;  %v1764_v22 = vmul.f32 %v3749_v34, %v4021_v62  ;;  %v1765_v35 = vmul.f32 %v3751_v18, %v4023_v43  ;;  %v870_v18 = vmul.f32 %v3489_v50, %v3785_v57 }
 0x20c   : > { %v904_v40 = vpop.permute.xlu1 %903  ;;  %v906_v51 = vpop.permute.xlu0 %905 }
 0x20e   : > { %1717 = vrot.lane.b32.xlu1 %v1700_v7, %s4476_s20  ;;  %1773 = vrot.lane.b32.xlu0 %v1761_v25, %s4478_s19  ;;  %v869_v7 = vmul.f32 %v3483_v16, %v3768_v8  ;;  %v1766_v8 = vmul.f32 %v3749_v34, %v4035_v52 }
 0x210   : > { %v908_v24 = vpop.permute.xlu1 %907  ;;  %v910_v46 = vpop.permute.xlu0 %909 }
 0x211   : > { %v922_v57 = vadd.f32 %v908_v24, %v870_v18 }
 0x212   : > { %1775 = vrot.lane.b32.xlu1 %v1762_v42, %s4478_s19  ;;  %1777 = vrot.lane.b32.xlu0 %v1763_v49, %s4478_s19  ;;  %v920_v42 = vadd.f32 %v904_v40, %v868_v37  ;;  %v921_v49 = vadd.f32 %v906_v51, %v869_v7  ;;  %v871_v40 = vmul.f32 %v3483_v16, %v3787_v1 }
 0x214   : > { %v912_v63 = vpop.permute.xlu1 %911  ;;  %v948_v39 = vpop.permute.xlu0 %947  ;;  %v923_v34 = vadd.f32 %v910_v46, %v871_v40  ;;  %v982_v46 = vmul.f32 %v3640_v58, %v3789_v5  ;;  %v1810_v5 = vmul.f32 %v3753_v29, %v4021_v62 }
 0x215   : > { %v965_v25 = vadd.f32 %v948_v39, %v919_v27  ;;  %v1807_v27 = vmul.f32 %v3755_v30, %v4001_v36  ;;  %v924_v50 = vadd.f32 %v912_v63, %v872_v44  ;;  %v984_v63 = vmul.f32 %v3640_v58, %v3806_v45 }
 0x216   : > { %1779 = vrot.lane.b32.xlu1 %v1764_v22, %s4478_s19  ;;  %1781 = vrot.lane.b32.xlu0 %v1765_v35, %s4478_s19  ;;  %v981_v22 = vmul.f32 %v3623_v32, %v3802_v55  ;;  %v1809_v55 = vmul.f32 %v3755_v30, %v4011_v15 }
 0x217   : > { %v4041_v23 = vadd.f32 %v979_v38, %v965_v25  ;;  %v983_v25 = vmul.f32 %v3623_v32, %v3820_v21  ;;  %v1811_v32 = vmul.f32 %v3755_v30, %v4023_v43 }
 0x218   : > { %v950_v19 = vpop.permute.xlu1 %949  ;;  %v952_v4 = vpop.permute.xlu0 %951 }
 0x219   : > { %v966_v51 = vadd.f32 %v950_v19, %v920_v42  ;;  %v967_v39 = vadd.f32 %v952_v4, %v921_v49  ;;  %v1808_v4 = vmul.f32 %v3753_v29, %v4009_v61 }
 0x21a   : > { %1783 = vrot.lane.b32.xlu1 %v1766_v8, %s4478_s19  ;;  %1819 = vrot.lane.b32.xlu0 %v1807_v27, %s4476_s20  ;;  %s1939_s19 = sshll.u32 %s3579_s23, 4  ;;  %s4098_s19 = int_to_ptr.vmem [resolvable:$true] %s1939_s19 }
 0x21b   : > { %v4057_v35 = vadd.f32 %v980_v48, %v966_v51  ;;  %v4059_v37 = vadd.f32 %v981_v22, %v967_v39  ;;  %s2443_s23 = scalar_lea.vmem %s4098_s19, 256  ;;  %p2450_p1 = scmp.lt.s32.totalorder %s4098_s19, %s2448_s28 }
 0x21c   : > { %v954_v16 = vpop.permute.xlu1 %953  ;;  %v956_v1 = vpop.permute.xlu0 %955  ;;  %p2444_p3 = scmp.ne.s32.totalorder %s4098_s19, %s2443_s23  ;;  %p2451_p4 = scmp.lt.s32.totalorder %s2449_s25, %s2443_s23 }
 0x21d   : > { %v968_v7 = vadd.f32 %v954_v16, %v922_v57  ;;  %v969_v24 = vadd.f32 %v956_v1, %v923_v34 }
 0x21e   : > { %1821 = vrot.lane.b32.xlu1 %v1808_v4, %s4476_s20  ;;  %1823 = vrot.lane.b32.xlu0 %v1809_v55, %s4476_s20  ;;  %p2445_p9 = pnand %p2444_p3, %p4513_p8  ;;  %p2452_p11 = por %p2451_p4, %p2450_p1 }
 0x21f   : > { %v4073_v59 = vadd.f32 %v982_v46, %v968_v7  ;;  %v4075_v38 = vadd.f32 %v983_v25, %v969_v24 }
 0x220   : > { %v958_v42 = vpop.permute.xlu1 %957  ;;  %v4078_v49 = vpop.permute.xlu0 %1013  ;;  %p2446_p10 = pneg %p2445_p9 }
 0x221   : > { %v970_v21 = vadd.f32 %v958_v42, %v924_v50 }
 0x222   : > { %1825 = vrot.lane.b32.xlu1 %v1810_v5, %s4476_s20  ;;  %1827 = vrot.lane.b32.xlu0 %v1811_v32, %s4476_s20  ;;  %p2453_p0 = pnand %p2452_p11, %p2446_p10 }
 0x223   : > { %v4100_v30 = vadd.f32 %v984_v63, %v970_v21 }
 0x224   : > { %2456 = shalt.err (!%p2453_p0)
}
 0x225   : > { %s2457_s27 = scalar_lea.hbm %s4096_s14, 256  ;;  %s2461_s17 = scalar_lea.hbm %s4402_s6, 512 }
 0x226   : > { %p2458_p2 = scmp.ne.s32.totalorder %s4096_s14, %s2457_s27  ;;  %p2462_p12 = scmp.lt.u32.totalorder %s4096_s14, %s4402_s6 }
 0x227   : > { %p2463_p6 = scmp.lt.u32.totalorder %s2461_s17, %s2457_s27  ;;  %p2465_p3 = scmp.lt.u32.totalorder %s2457_s27, %s4096_s14 }
 0x228   : > { %p2459_p7 = pnand %p2458_p2, %p4513_p8 }
 0x229   : > { %p2464_p13 = por %p2463_p6, %p2462_p12 }
 0x22a   : > { %p2460_p5 = pneg %p2459_p7 }
 0x22b   : > { %p2466_p9 = por %p2465_p3, %p2464_p13 }
 0x22d   : > { %p2467_p10 = pnand %p2466_p9, %p2460_p5 }
 0x22f   : > { %2470 = shalt.err (!%p2467_p10)
}
 0x230   : > { %s4455_s23 = smov 128   ;;  %s2646_s11 = smov 8   ;;  %v4131_v58 = vpop.permute.xlu1 %1015  ;;  %v4133_v45 = vpop.permute.xlu0 %1017  ;;  %v1812_v18 = vmul.f32 %v3753_v29, %v4035_v52 }
 0x231   : > { %2315 = dma.vmem_to_hbm [thread:$0]  (%p4513_p8), %s4098_s19, 256, %s4096_s14, %s4104_s29, %s4455_s23, %s4455_s23, %s2646_s11  }
 0x232   : > { %s4141_s27 = scalar_lea.hbm %s4404_s8, %s4087_s16  ;;  %s1971_s4 = sshll.u32 %s3672_s26, 4  ;;  %1829 = vrot.lane.b32.xlu1 %v1812_v18, %s4476_s20  ;;  %s4145_s4 = int_to_ptr.vmem [resolvable:$true] %s1971_s4 }
 0x233   : > { %s4514_s17 = sand.u32 1, %s2722_s13   ;;  %s2471_s14 = scalar_lea.vmem %s4145_s4, 256 }
 0x234   : > { %s4149_s19 = scalar_lea.sflag [#allocation14], %s4514_s17  ;;  %p2472_p1 = scmp.ne.s32.totalorder %s4145_s4, %s2471_s14 }
 0x235   : > { %s2647_s28 = smov [#allocation13]  }
 0x236   : > { %p2473_p4 = pnand %p2472_p1, %p4513_p8  ;;  %s2475_s1 = sshll.u32 %s2647_s28, 4  ;;  %s2476_s1 = int_to_ptr.vmem [resolvable:$false] %s2475_s1 }
 0x237   : > { %s2477_s25 = scalar_lea.vmem %s2476_s1, 512  ;;  %p2478_p0 = scmp.lt.s32.totalorder %s4145_s4, %s2476_s1 }
 0x238   : > { %p2474_p11 = pneg %p2473_p4  ;;  %p2479_p2 = scmp.lt.s32.totalorder %s2477_s25, %s2471_s14 }
 0x23a   : > { %p2480_p7 = por %p2479_p2, %p2478_p0 }
 0x23c   : > { %p2481_p5 = pnand %p2480_p7, %p2474_p11 }
 0x23e   : > { %2484 = shalt.err (!%p2481_p5)
}
 0x23f   : > { %s2485_s20 = scalar_lea.hbm %s4141_s27, 256  ;;  %s2489_s28 = scalar_lea.hbm %s4404_s8, 512 }
 0x240   : > { %p2486_p12 = scmp.ne.s32.totalorder %s4141_s27, %s2485_s20  ;;  %p2490_p3 = scmp.lt.u32.totalorder %s4141_s27, %s4404_s8 }
 0x241   : > { %p2491_p9 = scmp.lt.u32.totalorder %s2489_s28, %s2485_s20  ;;  %p2493_p1 = scmp.lt.u32.totalorder %s2485_s20, %s4141_s27 }
 0x242   : > { %p2487_p6 = pnand %p2486_p12, %p4513_p8 }
 0x243   : > { %p2492_p10 = por %p2491_p9, %p2490_p3 }
 0x244   : > { %p2488_p13 = pneg %p2487_p6 }
 0x245   : > { %p2494_p4 = por %p2493_p1, %p2492_p10 }
 0x247   : > { %p2495_p11 = pnand %p2494_p4, %p2488_p13 }
 0x249   : > { %2498 = shalt.err (!%p2495_p11)
}
 0x24a   : > { %s4515_s14 = smov 128   ;;  %v4176_v29 = vpop.permute.xlu1 %1019  ;;  %v4178_v19 = vpop.permute.xlu0 %1021  ;;  %s4184_s20 = scalar_lea.hbm %s4403_s7, %s4087_s16  ;;  %v1031_v8 = vadd.f32 %v4078_v49, %v4041_v23 }
 0x24b   : > { %2317 = dma.vmem_to_hbm [thread:$0]  (%p4513_p8), %s4145_s4, 256, %s4141_s27, %s4149_s19, %s4515_s14, %s4515_s14, %s2646_s11  }
 0x24c   : > { %s1955_s26 = sshll.u32 %s3630_s24, 4  ;;  %s4191_s1 = scalar_lea.hbm %s4405_s9, %s4087_s16  ;;  %s4195_s26 = int_to_ptr.vmem [resolvable:$true] %s1955_s26 }
 0x24d   : > { %s2499_s4 = scalar_lea.vmem %s4195_s26, 256  ;;  %s2648_s24 = smov [#allocation12]  }
 0x24e   : > { %v4198_v27 = vpop.permute.xlu1 %1023  ;;  %v1060_v48 = vpop.permute.xlu0 %1059  ;;  %p2500_p0 = scmp.ne.s32.totalorder %s4195_s26, %s2499_s4  ;;  %s2503_s16 = sshll.u32 %s2648_s24, 4  ;;  %s2504_s16 = int_to_ptr.vmem [resolvable:$false] %s2503_s16 }
 0x24f   : > { %s2505_s23 = scalar_lea.vmem %s2504_s16, 512  ;;  %p2506_p5 = scmp.lt.s32.totalorder %s4195_s26, %s2504_s16 }
 0x250   : > { %p2501_p2 = pnand %p2500_p0, %p4513_p8  ;;  %p2507_p12 = scmp.lt.s32.totalorder %s2505_s23, %s2499_s4 }
 0x252   : > { %p2502_p7 = pneg %p2501_p2  ;;  %p2508_p6 = por %p2507_p12, %p2506_p5 }
 0x254   : > { %p2509_p13 = pnand %p2508_p6, %p2502_p7 }
 0x256   : > { %2512 = shalt.err (!%p2509_p13)
}
 0x257   : > { %s2513_s25 = scalar_lea.hbm %s4184_s20, 256  ;;  %s2517_s24 = scalar_lea.hbm %s4403_s7, 512 }
 0x258   : > { %p2514_p3 = scmp.ne.s32.totalorder %s4184_s20, %s2513_s25  ;;  %p2518_p1 = scmp.lt.u32.totalorder %s4184_s20, %s4403_s7 }
 0x259   : > { %p2519_p4 = scmp.lt.u32.totalorder %s2517_s24, %s2513_s25  ;;  %p2521_p0 = scmp.lt.u32.totalorder %s2513_s25, %s4184_s20 }
 0x25a   : > { %p2515_p9 = pnand %p2514_p3, %p4513_p8 }
 0x25b   : > { %p2520_p11 = por %p2519_p4, %p2518_p1 }
 0x25c   : > { %p2516_p10 = pneg %p2515_p9 }
 0x25d   : > { %p2522_p2 = por %p2521_p0, %p2520_p11 }
 0x25f   : > { %p2523_p7 = pnand %p2522_p2, %p2516_p10 }
 0x261   : > { %2526 = shalt.err (!%p2523_p7)
}
 0x262   : > { %2316 = dma.vmem_to_hbm [thread:$0]  (%p4513_p8), %s4195_s26, 256, %s4184_s20, %s4104_s29, %s4515_s14, %s4515_s14, %s2646_s11   ;;  %v1077_v23 = vadd.f32 %v1060_v48, %v1031_v8  ;;  %v1091_v40 = vmul.f32 %v3650_v41, %v3776_v47 }
 0x263   : > { %s4516_s27 = sshll.u32 %s3688_s18, 4  ;;  %s2649_s23 = smov [#allocation15]   ;;  %s4229_s27 = int_to_ptr.vmem [resolvable:$true] %s4516_s27 }
 0x264   : > { %s2527_s4 = scalar_lea.vmem %s4229_s27, 256  ;;  %s2531_s25 = sshll.u32 %s2649_s23, 4  ;;  %s2532_s25 = int_to_ptr.vmem [resolvable:$false] %s2531_s25 }
 0x265   : > { %p2528_p5 = scmp.ne.s32.totalorder %s4229_s27, %s2527_s4  ;;  %s2533_s17 = scalar_lea.vmem %s2532_s25, 512 }
 0x266   : > { %p2534_p13 = scmp.lt.s32.totalorder %s4229_s27, %s2532_s25  ;;  %p2535_p3 = scmp.lt.s32.totalorder %s2533_s17, %s2527_s4 }
 0x267   : > { %p2529_p12 = pnand %p2528_p5, %p4513_p8 }
 0x268   : > { %p2536_p9 = por %p2535_p3, %p2534_p13 }
 0x269   : > { %p2530_p6 = pneg %p2529_p12 }
 0x26b   : > { %p2537_p10 = pnand %p2536_p9, %p2530_p6 }
 0x26d   : > { %2540 = shalt.err (!%p2537_p10)
}
 0x26e   : > { %s2541_s18 = scalar_lea.hbm %s4191_s1, 256  ;;  %s2545_s26 = scalar_lea.hbm %s4405_s9, 512 }
 0x26f   : > { %p2542_p1 = scmp.ne.s32.totalorder %s4191_s1, %s2541_s18  ;;  %p2546_p0 = scmp.lt.u32.totalorder %s4191_s1, %s4405_s9 }
 0x270   : > { %p2547_p2 = scmp.lt.u32.totalorder %s2545_s26, %s2541_s18  ;;  %p2549_p5 = scmp.lt.u32.totalorder %s2541_s18, %s4191_s1 }
 0x271   : > { %p2543_p4 = pnand %p2542_p1, %p4513_p8 }
 0x272   : > { %p2548_p7 = por %p2547_p2, %p2546_p0 }
 0x273   : > { %p2544_p11 = pneg %p2543_p4 }
 0x274   : > { %p2550_p12 = por %p2549_p5, %p2548_p7 }
 0x276   : > { %p2551_p6 = pnand %p2550_p12, %p2544_p11 }
 0x278   : > { %2554 = shalt.err (!%p2551_p6)
}
 0x279   : > { %2318 = dma.vmem_to_hbm [thread:$0]  (%p4513_p8), %s4229_s27, 256, %s4191_s1, %s4149_s19, %s4515_s14, %s4515_s14, %s2646_s11   ;;  %v1032_v47 = vadd.f32 %v4131_v58, %v4057_v35  ;;  %v1033_v51 = vadd.f32 %v4133_v45, %v4059_v37  ;;  %v1097_v39 = vadd.f32 %v1091_v40, %v1077_v23  ;;  %v1062_v22 = vpop.permute.xlu1 %1061  ;;  %v1064_v57 = vpop.permute.xlu0 %1063  ;;  %v1092_v16 = vmul.f32 %v3679_v56, %v3778_v13 }
 0x27a   : > { %v1093_v1 = vmul.f32 %v3650_v41, %v3795_v14  ;;  %v1034_v4 = vadd.f32 %v4176_v29, %v4073_v59  ;;  %v1035_v35 = vadd.f32 %v4178_v19, %v4075_v38  ;;  %v1094_v50 = vmul.f32 %v3679_v56, %v3797_v54  ;;  %s4517_s19 = smul.u32 48, %s2834_s0  ;;  %s2650_s18 = smov [#allocation9]  }
 0x27b   : > { %v1078_v34 = vadd.f32 %v1062_v22, %v1032_v47  ;;  %v1079_v44 = vadd.f32 %v1064_v57, %v1033_v51  ;;  %v1095_v13 = vmul.f32 %v3650_v41, %v3808_v28  ;;  %v1036_v14 = vadd.f32 %v4198_v27, %v4100_v30  ;;  %s2307_s16 = smul.u32 768, %s2722_s13  ;;  %s1890_s13 = scalar_lea.sflag [#allocation6], %s2834_s0 }
 0x27c   : > { %v1096_v32 = vmul.f32 %v3679_v56, %v3815_v11  ;;  %s4278_s1 = scalar_lea.vmem [#allocation9], %s4517_s19  ;;  %s2559_s29 = sshll.u32 %s2650_s18, 4  ;;  %s2560_s29 = int_to_ptr.vmem [resolvable:$false] %s2559_s29 }
 0x27d   : > { %v1098_v55 = vadd.f32 %v1092_v16, %v1078_v34  ;;  %v1099_v7 = vadd.f32 %v1093_v1, %v1079_v44  ;;  %v1066_v37 = vpop.permute.xlu1 %1065  ;;  %v1068_v24 = vpop.permute.xlu0 %1067  ;;  %s1923_s27 = sshll.u32 %s4278_s1, 4  ;;  %s4343_s25 = scalar_lea.hbm %s4401_s5, %s2307_s16  ;;  %s4345_s27 = int_to_ptr.vmem [resolvable:$true] %s1923_s27 }
 0x27e   : > { %v1080_v46 = vadd.f32 %v1066_v37, %v1034_v4  ;;  %v1081_v25 = vadd.f32 %v1068_v24, %v1035_v35  ;;  %v1514_v4 = vld [vmem:[#allocation2 + $0x8] sm:$0xff]  ;;  %v1513_v37 = vld [vmem:[#allocation2] sm:$0xff]  ;;  %v1626_v24 = vld [vmem:[#allocation2 + $0x38] sm:$0xff]  ;;  %s2555_s17 = scalar_lea.vmem %s4345_s27, 768  ;;  %s2561_s20 = scalar_lea.vmem %s2560_s29, 1536 }
 0x27f   : > { %p2556_p13 = scmp.ne.s32.totalorder %s4345_s27, %s2555_s17  ;;  %p2562_p10 = scmp.lt.s32.totalorder %s4345_s27, %s2560_s29 }
 0x280   : > { %v1100_v42 = vadd.f32 %v1094_v50, %v1080_v46  ;;  %v1101_v59 = vadd.f32 %v1095_v13, %v1081_v25  ;;  %v1515_v13 = vmul.f32 %v1513_v37, %v3913_v3  ;;  %v1630_v3 = vmul.f32 %v1626_v24, %v3971_v9  ;;  %p2563_p1 = scmp.lt.s32.totalorder %s2561_s20, %s2555_s17 }
 0x281   : > { %v1070_v49 = vpop.permute.xlu1 %1069  ;;  %v1126_v38 = vpop.permute.xlu0 %1125  ;;  %p2557_p3 = pnand %p2556_p13, %p4513_p8 }
 0x282   : > { %v1082_v5 = vadd.f32 %v1070_v49, %v1036_v14  ;;  %v1143_v18 = vadd.f32 %v1126_v38, %v1097_v39  ;;  %v1518_v14 = vmul.f32 %v1514_v4, %v3915_v6  ;;  %v1625_v49 = vld [vmem:[#allocation2 + $0x30] sm:$0xff]  ;;  %p2564_p4 = por %p2563_p1, %p2562_p10 }
 0x283   : > { %p2558_p9 = pneg %p2557_p3 }
 0x284   : > { %v1102_v21 = vadd.f32 %v1096_v32, %v1082_v5 }
 0x285   : > { %v1128_v63 = vpop.permute.xlu1 %1127  ;;  %v1130_v58 = vpop.permute.xlu0 %1129  ;;  %p2565_p11 = pnand %p2564_p4, %p2558_p9 }
 0x286   : > { %v1144_v19 = vadd.f32 %v1128_v63, %v1098_v55  ;;  %v1145_v30 = vadd.f32 %v1130_v58, %v1099_v7  ;;  %v1516_v7 = vmul.f32 %v1514_v4, %v3905_v17  ;;  %v1520_v17 = vmul.f32 %v1514_v4, %v3925_v10 }
 0x287   : > { %v1629_v10 = vmul.f32 %v1625_v49, %v3963_v26 }
 0x289   : > { %v1132_v45 = vpop.permute.xlu1 %1131  ;;  %v1134_v54 = vpop.permute.xlu0 %1133 }
 0x28a   : > { %v1146_v48 = vadd.f32 %v1132_v45, %v1100_v42  ;;  %v1147_v23 = vadd.f32 %v1134_v54, %v1101_v59  ;;  %v1628_v59 = vmul.f32 %v1626_v24, %v3961_v12 }
 0x28d   : > { %v1136_v29 = vpop.permute.xlu1 %1135  ;;  %v1172_v41 = vpop.permute.xlu0 %1171 }
 0x28e   : > { %v1189_v28 = vadd.f32 %v1172_v41, %v1143_v18  ;;  %v1148_v22 = vadd.f32 %v1136_v29, %v1102_v21  ;;  %v1517_v21 = vmul.f32 %v1513_v37, %v3923_v60  ;;  %v1627_v18 = vmul.f32 %v1625_v49, %v3953_v33 }
 0x290   : > { %1195 = vst.msk [vmem:[%s4278_s1] sm:$0xff] %vm529_vm12, %v1189_v28  ;;  %v1519_v28 = vmul.f32 %v1513_v37, %v3933_v53 }
 0x291   : > { %v1174_v56 = vpop.permute.xlu1 %1173  ;;  %v1176_v11 = vpop.permute.xlu0 %1175 }
 0x292   : > { %v1190_v8 = vadd.f32 %v1174_v56, %v1144_v19  ;;  %v1191_v27 = vadd.f32 %v1176_v11, %v1145_v30  ;;  %v1632_v11 = vmul.f32 %v1626_v24, %v3981_v31 }
 0x294   : > { %1196 = vst.msk [vmem:[%s4278_s1 + $0x8] sm:$0xff] %vm529_vm12, %v1190_v8  ;;  %1197 = vst.msk [vmem:[%s4278_s1 + $0x10] sm:$0xff] %vm529_vm12, %v1191_v27 }
 0x295   : > { %v1178_v40 = vpop.permute.xlu1 %1177  ;;  %v1180_v47 = vpop.permute.xlu0 %1179 }
 0x296   : > { %v1192_v51 = vadd.f32 %v1178_v40, %v1146_v48  ;;  %v1193_v39 = vadd.f32 %v1180_v47, %v1147_v23  ;;  %v1631_v40 = vmul.f32 %v1625_v49, %v3973_v20 }
 0x298   : > { %1198 = vst.msk [vmem:[%s4278_s1 + $0x18] sm:$0xff] %vm529_vm12, %v1192_v51  ;;  %1199 = vst.msk [vmem:[%s4278_s1 + $0x20] sm:$0xff] %vm529_vm12, %v1193_v39 }
 0x299   : > { %v1182_v57 = vpop.permute.xlu1 %1181  ;;  %v1552_v34 = vpop.permute.xlu0 %1551 }
 0x29a   : > { %v1194_v44 = vadd.f32 %v1182_v57, %v1148_v22  ;;  %v1568_v46 = vadd.f32 %v1552_v34, %v1516_v7  ;;  %v1737_v57 = vld [vmem:[#allocation2 + $0x60] sm:$0xff] }
 0x29b   : > { %v1739_v31 = vmul.f32 %v1737_v57, %v4001_v36 }
 0x29c   : > { %1200 = vst.msk [vmem:[%s4278_s1 + $0x28] sm:$0xff] %vm529_vm12, %v1194_v44 }
 0x29d   : > { %v1550_v16 = vpop.permute.xlu1 %1549  ;;  %v1556_v1 = vpop.permute.xlu0 %1555 }
 0x29e   : > { %v1567_v38 = vadd.f32 %v1550_v16, %v1515_v13  ;;  %v1570_v5 = vadd.f32 %v1556_v1, %v1518_v14  ;;  %v1738_v1 = vld [vmem:[#allocation2 + $0x68] sm:$0xff] }
 0x2a1   : > { %v1554_v35 = vpop.permute.xlu1 %1553  ;;  %v1560_v55 = vpop.permute.xlu0 %1559 }
 0x2a2   : > { %v1569_v6 = vadd.f32 %v1554_v35, %v1517_v21  ;;  %v1572_v29 = vadd.f32 %v1560_v55, %v1520_v17 }
 0x2a5   : > { %v1558_v25 = vpop.permute.xlu1 %1557  ;;  %v1598_v50 = vpop.permute.xlu0 %1597 }
 0x2a6   : > { %v1614_v42 = vadd.f32 %v1598_v50, %v1568_v46  ;;  %v1571_v8 = vadd.f32 %v1558_v25, %v1519_v28  ;;  %v1740_v46 = vmul.f32 %v1738_v1, %v4009_v61  ;;  %v1741_v25 = vmul.f32 %v1737_v57, %v4011_v15 }
 0x2a7   : > { %v1744_v15 = vmul.f32 %v1738_v1, %v4035_v52  ;;  %v1860_v52 = vld [vmem:[%s4278_s1 + $0x8] sm:$0xff] }
 0x2a8   : > { %v1634_v32 = vadd.f32 %v1628_v59, %v1614_v42 }
 0x2a9   : > { %v1596_v63 = vpop.permute.xlu1 %1595  ;;  %v1602_v58 = vpop.permute.xlu0 %1601 }
 0x2aa   : > { %v1613_v45 = vadd.f32 %v1596_v63, %v1567_v38  ;;  %v1616_v54 = vadd.f32 %v1602_v58, %v1570_v5  ;;  %v1742_v5 = vmul.f32 %v1738_v1, %v4021_v62 }
 0x2ac   : > { %v1633_v41 = vadd.f32 %v1627_v18, %v1613_v45  ;;  %v1636_v12 = vadd.f32 %v1630_v3, %v1616_v54 }
 0x2ad   : > { %v1600_v19 = vpop.permute.xlu1 %1599  ;;  %v1606_v30 = vpop.permute.xlu0 %1605 }
 0x2ae   : > { %v1615_v56 = vadd.f32 %v1600_v19, %v1569_v6  ;;  %v1618_v60 = vadd.f32 %v1606_v30, %v1572_v29 }
 0x2b0   : > { %v1635_v27 = vadd.f32 %v1629_v10, %v1615_v56  ;;  %v1638_v48 = vadd.f32 %v1632_v11, %v1618_v60  ;;  %v1861_v10 = vld [vmem:[%s4278_s1 + $0x10] sm:$0xff] }
 0x2b1   : > { %v1604_v33 = vpop.permute.xlu1 %1603  ;;  %v1662_v23 = vpop.permute.xlu0 %1661 }
 0x2b2   : > { %v1617_v9 = vadd.f32 %v1604_v33, %v1571_v8  ;;  %v1679_v34 = vadd.f32 %v1662_v23, %v1633_v41  ;;  %v4518_v23 = vld [vmem:[#allocation23_spill] sm:$0xff] }
 0x2b4   : > { %v1637_v47 = vadd.f32 %v1631_v40, %v1617_v9  ;;  %v1866_v9 = vmul.f32 %v1860_v52, %v4518_v23  ;;  %v1867_v40 = vmul.f32 %v1861_v10, %v3660_v0 }
 0x2b5   : > { %v1664_v51 = vpop.permute.xlu1 %1663  ;;  %v1666_v39 = vpop.permute.xlu0 %1665 }
 0x2b6   : > { %v1680_v4 = vadd.f32 %v1664_v51, %v1634_v32  ;;  %v1681_v35 = vadd.f32 %v1666_v39, %v1635_v27  ;;  %v1743_v32 = vmul.f32 %v1737_v57, %v4023_v43  ;;  %v1859_v43 = vld [vmem:[%s4278_s1] sm:$0xff]  ;;  %v4519_v39 = vld [vmem:[#allocation24_spill] sm:$0xff] }
 0x2b7   : > { %v1865_v56 = vmul.f32 %v1859_v43, %v3660_v0  ;;  %v1862_v57 = vld [vmem:[%s4278_s1 + $0x18] sm:$0xff] }
 0x2b9   : > { %v1668_v53 = vpop.permute.xlu1 %1667  ;;  %v1670_v22 = vpop.permute.xlu0 %1669 }
 0x2ba   : > { %v1682_v50 = vadd.f32 %v1668_v53, %v1636_v12  ;;  %v1683_v13 = vadd.f32 %v1670_v22, %v1637_v47 }
 0x2bd   : > { %v1672_v44 = vpop.permute.xlu1 %1671  ;;  %v1708_v16 = vpop.permute.xlu0 %1707 }
 0x2be   : > { %v1725_v26 = vadd.f32 %v1708_v16, %v1679_v34  ;;  %v1684_v21 = vadd.f32 %v1672_v44, %v1638_v48  ;;  %v1863_v16 = vld [vmem:[%s4278_s1 + $0x20] sm:$0xff] }
 0x2c0   : > { %v1745_v55 = vadd.f32 %v1739_v31, %v1725_v26 }
 0x2c1   : > { %v1710_v7 = vpop.permute.xlu1 %1709  ;;  %v1712_v37 = vpop.permute.xlu0 %1711 }
 0x2c2   : > { %v1726_v24 = vadd.f32 %v1710_v7, %v1680_v4  ;;  %v1727_v20 = vadd.f32 %v1712_v37, %v1681_v35  ;;  %v1868_v35 = vmul.f32 %v1862_v57, %v4518_v23  ;;  %v1869_v37 = vmul.f32 %v1863_v16, %v3660_v0 }
 0x2c4   : > { %v1746_v14 = vadd.f32 %v1740_v46, %v1726_v24  ;;  %v1747_v42 = vadd.f32 %v1741_v25, %v1727_v20  ;;  %v1864_v46 = vld [vmem:[%s4278_s1 + $0x28] sm:$0xff] }
 0x2c5   : > { %v1714_v59 = vpop.permute.xlu1 %1713  ;;  %v1716_v49 = vpop.permute.xlu0 %1715 }
 0x2c6   : > { %v1728_v38 = vadd.f32 %v1714_v59, %v1682_v50  ;;  %v1729_v36 = vadd.f32 %v1716_v49, %v1683_v13 }
 0x2c8   : > { %v1748_v17 = vadd.f32 %v1742_v5, %v1728_v38  ;;  %v1749_v63 = vadd.f32 %v1743_v32, %v1729_v36 }
 0x2c9   : > { %v1718_v58 = vpop.permute.xlu1 %1717  ;;  %v1774_v61 = vpop.permute.xlu0 %1773 }
 0x2ca   : > { %v1730_v45 = vadd.f32 %v1718_v58, %v1684_v21  ;;  %v1791_v41 = vadd.f32 %v1774_v61, %v1745_v55 }
 0x2cc   : > { %v1750_v54 = vadd.f32 %v1744_v15, %v1730_v45 }
 0x2cd   : > { %v1776_v18 = vpop.permute.xlu1 %1775  ;;  %v1778_v3 = vpop.permute.xlu0 %1777 }
 0x2ce   : > { %v1792_v19 = vadd.f32 %v1776_v18, %v1746_v14  ;;  %v1793_v30 = vadd.f32 %v1778_v3, %v1747_v42  ;;  %v1870_v14 = vmul.f32 %v1864_v46, %v4518_v23 }
 0x2d1   : > { %v1780_v6 = vpop.permute.xlu1 %1779  ;;  %v1782_v29 = vpop.permute.xlu0 %1781 }
 0x2d2   : > { %v1794_v47 = vadd.f32 %v1780_v6, %v1748_v17  ;;  %v1795_v51 = vadd.f32 %v1782_v29, %v1749_v63 }
 0x2d5   : > { %v1784_v62 = vpop.permute.xlu1 %1783  ;;  %v1820_v12 = vpop.permute.xlu0 %1819 }
 0x2d6   : > { %v1837_v28 = vadd.f32 %v1820_v12, %v1791_v41  ;;  %v1796_v55 = vadd.f32 %v1784_v62, %v1750_v54 }
 0x2d8   : > { %v1871_v60 = vmul.f32 %v3667_v2, %v1837_v28 }
 0x2d9   : > { %v1822_v11 = vpop.permute.xlu1 %1821  ;;  %v1824_v8 = vpop.permute.xlu0 %1823 }
 0x2da   : > { %v1877_v27 = vadd.f32 %v1871_v60, %v1865_v56  ;;  %v1838_v48 = vadd.f32 %v1822_v11, %v1792_v19  ;;  %v1839_v33 = vadd.f32 %v1824_v8, %v1793_v30 }
 0x2dc   : > { %1883 = vst.msk [vmem:[%s4278_s1] sm:$0xff] %vm529_vm12, %v1877_v27  ;;  %v1872_v53 = vmul.f32 %v4519_v39, %v1838_v48  ;;  %v1873_v22 = vmul.f32 %v3667_v2, %v1839_v33 }
 0x2dd   : > { %v1826_v34 = vpop.permute.xlu1 %1825  ;;  %v1828_v44 = vpop.permute.xlu0 %1827 }
 0x2de   : > { %v1878_v26 = vadd.f32 %v1872_v53, %v1866_v9  ;;  %v1879_v31 = vadd.f32 %v1873_v22, %v1867_v40  ;;  %v1840_v1 = vadd.f32 %v1826_v34, %v1794_v47  ;;  %v1841_v4 = vadd.f32 %v1828_v44, %v1795_v51 }
 0x2e0   : > { %1884 = vst.msk [vmem:[%s4278_s1 + $0x8] sm:$0xff] %vm529_vm12, %v1878_v26  ;;  %1885 = vst.msk [vmem:[%s4278_s1 + $0x10] sm:$0xff] %vm529_vm12, %v1879_v31  ;;  %v1874_v7 = vmul.f32 %v4519_v39, %v1840_v1  ;;  %v1875_v24 = vmul.f32 %v3667_v2, %v1841_v4 }
 0x2e1   : > { %v1830_v20 = vpop.permute.xlu1 %1829 }
 0x2e2   : > { %v1880_v25 = vadd.f32 %v1874_v7, %v1868_v35  ;;  %v1881_v50 = vadd.f32 %v1875_v24, %v1869_v37  ;;  %v1842_v13 = vadd.f32 %v1830_v20, %v1796_v55 }
 0x2e4   : > { %1886 = vst.msk [vmem:[%s4278_s1 + $0x18] sm:$0xff] %vm529_vm12, %v1880_v25  ;;  %1887 = vst.msk [vmem:[%s4278_s1 + $0x20] sm:$0xff] %vm529_vm12, %v1881_v50  ;;  %v1876_v0 = vmul.f32 %v4519_v39, %v1842_v13 }
 0x2e6   : > { %v1882_v42 = vadd.f32 %v1876_v0, %v1870_v14 }
 0x2e8   : > { %1888 = vst.msk [vmem:[%s4278_s1 + $0x28] sm:$0xff] %vm529_vm12, %v1882_v42 }
 0x2e9   : > { %2568 = shalt.err (!%p2565_p11)
}
 0x2ea   : > { %s2569_s26 = scalar_lea.hbm %s4343_s25, 768  ;;  %s2573_s19 = scalar_lea.hbm %s4401_s5, 1536 }
 0x2eb   : > { %p2570_p0 = scmp.ne.s32.totalorder %s4343_s25, %s2569_s26  ;;  %p2574_p5 = scmp.lt.u32.totalorder %s4343_s25, %s4401_s5 }
 0x2ec   : > { %p2575_p12 = scmp.lt.u32.totalorder %s2573_s19, %s2569_s26  ;;  %p2577_p13 = scmp.lt.u32.totalorder %s2569_s26, %s4343_s25 }
 0x2ed   : > { %p2571_p2 = pnand %p2570_p0, %p4513_p8 }
 0x2ee   : > { %p2576_p6 = por %p2575_p12, %p2574_p5 }
 0x2ef   : > { %p2572_p7 = pneg %p2571_p2 }
 0x2f0   : > { %p2578_p3 = por %p2577_p13, %p2576_p6 }
 0x2f2   : > { %p2579_p9 = pnand %p2578_p3, %p2572_p7 }
 0x2f4   : > { %2582 = shalt.err (!%p2579_p9)
}
 0x2f5   : > { %2314 = dma.vmem_to_hbm [thread:$0]  (%p4513_p8), %s4345_s27, 768, %s4343_s25, %s1890_s13, %s4515_s14, %s4515_s14, %s2646_s11  }
 0x2f6 PF: > { %s2002_s4 = sand.u32 1, %s2621_s30   ;;  %p4520_p10 = scmp.ne.s32.totalorder %s4465_s22, 0 }
 0x2f7   : > { %p4521_p1 = scmp.ge.s32.totalorder %s2633_s12, 2  ;;  %s2003_s23 = scalar_lea.sflag [#allocation6], %s2002_s4 }
 0x2f9   : > { %p2333_p4 = pnand %p4521_p1, %p4520_p10 }
 0x2fb   : > { %2608 = dma.done.wait (!%p2333_p4), %s2003_s23, 768  }
 0x2fc   : > { %2610 = vsyncadd (!%p2333_p4), %s2003_s23, 4294966528  ;;  %s4522_s21 = sadd.s32 4294967294, %s2633_s12  }
 0x2fd   : > { %s2011_s17 = sand.u32 1, %s4522_s21  }
 0x2fe   : > { %s2012_s18 = scalar_lea.sflag [#allocation11], %s2011_s17 }
 0x2ff   : > { %2612 = dma.done.wait (!%p2333_p4), %s2012_s18, 512  }
 0x300   : > { %2614 = vsyncadd (!%p2333_p4), %s2012_s18, 4294966784  ;;  %s2030_s0 = scalar_lea.sflag [#allocation14], %s2011_s17 }
 0x301   : > { %2616 = dma.done.wait (!%p2333_p4), %s2030_s0, 512  }
 0x302   : > { %2618 = vsyncadd (!%p2333_p4), %s2030_s0, 4294966784  ;;  %s4523_s11 = sld [smem:[#allocation21_spill]]  ;;  %s4524_s14 = sld [smem:[#allocation22_spill]] }
 0x303   : > { %p30_p8 = scmp.ge.s32.totalorder %s2726_s15, 4   ;;  %s4525_s30 = smov %s2625_s10 }
 0x304   : > { %s4528_s12 = smov %s2726_s15 }
 0x305   :  { %32 = sbr.rel (!%p30_p8) target bundleno = 14 (0xe), region = 171 }
 0x308   : > { %s4526_s10 = smov %s4523_s11  ;;  %s4527_s11 = smov %s4524_s14 }
 0x30c   :  { %2044 = vsyncpa [#allocation5], 1 }
 0x30d   :  { %2046 = vsyncpa [#allocation5 + $0x1], 1 }
 0x30e   :  { %2047 = vsyncpa [#allocation6], 1 }
 0x30f   :  { %2049 = vsyncpa [#allocation6 + $0x1], 1 }
 0x310   :  { %2050 = vsyncpa [#allocation11], 1 }
 0x311   :  { %2052 = vsyncpa [#allocation11 + $0x1], 1 }
 0x312   :  { %2053 = vsyncpa [#allocation14], 1 }
 0x313   :  { %2055 = vsyncpa [#allocation14 + $0x1], 1 }
 0x314   :  { %2056 = vsyncpa [#allocation7], 1 }
 0x315   :  { %2058 = vsyncpa [#allocation7 + $0x1], 1 }

</bundles_post_ra>
